<compile_context>
chip_gen: v7x
topology: tpu7x:2x2x1
jax: 0.10.0
libtpu: 0.0.40
codegen_flags: <defaults>
</compile_context>

<pallas_src>
import functools

import jax
import jax.numpy as jnp
from jax.experimental import pallas as pl
from jax.experimental.pallas import tpu as pltpu


_TAPS = tuple((dy, dx) for dy in range(3) for dx in range(3))   # row-major 3x3 taps


def _fused_double_conv_kernel(
        x_ref, w1_ref, s1_ref, b1_ref, w2_ref, s2_ref, b2_ref,   # inputs
        o_ref,                                                    # output
        xp_ref, slab1_ref, midp_ref, slab2_ref,                   # VMEM scratch
        *, H, W, Cin, Cmid, Cout):
    """Fused (conv3x3 pad=1 -> folded BN -> ReLU) x 2 for one batch element.

    x_ref     : (1, H, W, Cin)       bf16 input tile (NHWC, channels on lanes)
    w1_ref    : (9*Cin, Cmid)        bf16 im2col-packed conv1 weight
    s1_ref/b1_ref : (1, Cmid)        f32 folded BN1 scale / shift
    w2_ref    : (9*Cmid, Cout)       bf16 im2col-packed conv2 weight
    s2_ref/b2_ref : (1, Cout)        f32 folded BN2 scale / shift
    o_ref     : (1, H, W, Cout)      f32 output tile
    xp_ref    : (H+2, W+2, Cin)      zero-padded input halo (VMEM only)
    slab1_ref : (H, W, 9*Cin)        im2col slab for conv1
    midp_ref  : (H+2, W+2, Cmid)     zero-padded layer-1 activation (VMEM only)
    slab2_ref : (H, W, 9*Cmid)       im2col slab for conv2
    """
    # ------------------------- layer 1 -------------------------------------
    # padding=1 halo built in VMEM (zero border) — no jnp.pad / HBM copy.
    xp_ref[...] = jnp.zeros_like(xp_ref)
    xp_ref[1:H + 1, 1:W + 1, :] = x_ref[0]

    # im2col: pack the 9 shifted taps on the channel axis so the whole conv is
    # one MXU contraction with K = 9*Cin instead of 9 tiny K = Cin matmuls.
    for t, (dy, dx) in enumerate(_TAPS):
        slab1_ref[:, :, t * Cin:(t + 1) * Cin] = xp_ref[dy:dy + H, dx:dx + W, :]

    acc1 = jax.lax.dot_general(                       # (H, W, Cmid), f32 accumulate
        slab1_ref[...], w1_ref[...],
        dimension_numbers=(((2,), (0,)), ((), ())),
        preferred_element_type=jnp.float32)
    y1 = jnp.maximum(acc1 * s1_ref[0] + b1_ref[0], 0.0)   # folded BN + ReLU in f32

    # ------------------------- layer 2 --------------------------------------
    # Layer-2 consumes the layer-1 result straight from VMEM (fusion: the
    # intermediate activation never touches HBM).
    midp_ref[...] = jnp.zeros_like(midp_ref)
    midp_ref[1:H + 1, 1:W + 1, :] = y1.astype(midp_ref.dtype)   # bf16 for the MXU

    for t, (dy, dx) in enumerate(_TAPS):
        slab2_ref[:, :, t * Cmid:(t + 1) * Cmid] = midp_ref[dy:dy + H, dx:dx + W, :]

    acc2 = jax.lax.dot_general(                       # (H, W, Cout), f32 accumulate
        slab2_ref[...], w2_ref[...],
        dimension_numbers=(((2,), (0,)), ((), ())),
        preferred_element_type=jnp.float32)
    y2 = jnp.maximum(acc2 * s2_ref[0] + b2_ref[0], 0.0)

    # TODO(synk): at production channel widths make this store lane-dense
    # (pack W*Cout on the lane axis or pad Cout to a multiple of 128); at the
    # toy Cout here the full (1, H, W, Cout) block still writes back as one DMA.
    o_ref[0] = y2.astype(o_ref.dtype)


def prepare_params(params, compute_dtype=jnp.bfloat16, eps=1e-5):
    """One-time (off the hot path) parameter preprocessing:
      - fold BatchNorm (eval mode, running stats) + conv bias into per-channel
        f32 scale/shift applied on the f32 accumulator inside the kernel, and
      - repack conv weights (Cout, Cin, 3, 3) -> (9*Cin, Cout) in bf16 so each
        conv is a single im2col contraction."""
    def fold(bias, gamma, beta, mean, var):
        scale = gamma / jnp.sqrt(var + eps)
        shift = beta + (bias - mean) * scale
        return (scale.astype(jnp.float32).reshape(1, -1),
                shift.astype(jnp.float32).reshape(1, -1))

    def pack(w_oihw):
        co, ci, kh, kw = w_oihw.shape
        # (Cout, Cin, ky, kx) -> (ky, kx, Cin, Cout) -> (ky*kx*Cin, Cout);
        # row-major (ky, kx, Cin) matches the kernel's im2col slab ordering.
        return (jnp.transpose(w_oihw, (2, 3, 1, 0))
                .reshape(kh * kw * ci, co).astype(compute_dtype))

    s1, sh1 = fold(params["b1"], params["g1"], params["beta1"],
                   params["m1"], params["v1"])
    s2, sh2 = fold(params["b2"], params["g2"], params["beta2"],
                   params["m2"], params["v2"])
    return {"w1": pack(params["w1"]), "s1": s1, "sh1": sh1,
            "w2": pack(params["w2"]), "s2": s2, "sh2": sh2}


def double_conv(x_nchw, prepared):
    """Fused DoubleConv forward. x_nchw: (N, Cin, H, W) -> (N, Cout, H, W)."""
    N, Cin, H, W = x_nchw.shape
    Cmid = prepared["w1"].shape[-1]
    Cout = prepared["w2"].shape[-1]

    # NCHW -> NHWC (channels on the lane axis) + bf16 for HBM/MXU traffic.
    x = jnp.transpose(x_nchw, (0, 2, 3, 1)).astype(jnp.bfloat16)

    kernel = functools.partial(_fused_double_conv_kernel,
                               H=H, W=W, Cin=Cin, Cmid=Cmid, Cout=Cout)

    out = pl.pallas_call(
        kernel,
        out_shape=jax.ShapeDtypeStruct((N, H, W, Cout), x_nchw.dtype),
        grid_spec=pltpu.PrefetchScalarGridSpec(
            num_scalar_prefetch=0,
            # TODO(synk): for UNet-scale images add spatial (H) tiling with a
            # 2-row fused halo (manual DMA / Element-indexed blocks) and budget
            # tiles for v7x's 64 MiB VMEM; whole-image blocks are only a few KiB
            # at these shapes, and grid=(N,) with N=2 keeps both v7x TCs busy.
            grid=(N,),
            in_specs=[
                pl.BlockSpec((1, H, W, Cin), lambda n: (n, 0, 0, 0)),
                pl.BlockSpec((9 * Cin, Cmid), lambda n: (0, 0)),
                pl.BlockSpec((1, Cmid), lambda n: (0, 0)),
                pl.BlockSpec((1, Cmid), lambda n: (0, 0)),
                pl.BlockSpec((9 * Cmid, Cout), lambda n: (0, 0)),
                pl.BlockSpec((1, Cout), lambda n: (0, 0)),
                pl.BlockSpec((1, Cout), lambda n: (0, 0)),
            ],
            out_specs=pl.BlockSpec((1, H, W, Cout), lambda n: (n, 0, 0, 0)),
            scratch_shapes=[
                pltpu.VMEM((H + 2, W + 2, Cin), jnp.bfloat16),    # padded input halo
                pltpu.VMEM((H, W, 9 * Cin), jnp.bfloat16),        # im2col slab, conv1
                pltpu.VMEM((H + 2, W + 2, Cmid), jnp.bfloat16),   # padded layer-1 act
                pltpu.VMEM((H, W, 9 * Cmid), jnp.bfloat16),       # im2col slab, conv2
            ],
        ),
        compiler_params=pltpu.CompilerParams(
            dimension_semantics=("parallel",),     # batch axis -> megacore / v7x TCs
            vmem_limit_bytes=48 * 1024 * 1024,     # explicit budget (fits v7x 64 MiB)
        ),
    )(x, prepared["w1"], prepared["s1"], prepared["sh1"],
      prepared["w2"], prepared["s2"], prepared["sh2"])

    # NHWC -> NCHW to match the PyTorch module's output layout.
    # TODO(synk): Dropout(drop_path_rate) omitted — default rate 0.0 is identity.
    return jnp.transpose(out, (0, 3, 1, 2))


def _reference(x_nchw, params):
    """Pure-JAX f32 reference (lax.conv) for correctness checking."""
    def layer(x, w, b, g, beta, m, v):
        y = jax.lax.conv_general_dilated(
            x, w, window_strides=(1, 1), padding="SAME",
            dimension_numbers=("NCHW", "OIHW", "NCHW"))
        y = y + b[None, :, None, None]
        y = (y - m[None, :, None, None]) / jnp.sqrt(v[None, :, None, None] + 1e-5)
        y = y * g[None, :, None, None] + beta[None, :, None, None]
        return jnp.maximum(y, 0.0)
    x = layer(x_nchw, params["w1"], params["b1"], params["g1"],
              params["beta1"], params["m1"], params["v1"])
    x = layer(x, params["w2"], params["b2"], params["g2"],
              params["beta2"], params["m2"], params["v2"])
    return x


def make_params(key, in_channels, out_channels):
    ks = jax.random.split(key, 8)
    fan1 = in_channels * 9
    fan2 = out_channels * 9
    return {
        "w1": jax.random.normal(ks[0], (out_channels, in_channels, 3, 3),
                                jnp.float32) * (2.0 / fan1) ** 0.5,
        "b1": jax.random.normal(ks[1], (out_channels,), jnp.float32) * 0.01,
        "g1": jnp.ones((out_channels,), jnp.float32),
        "beta1": jnp.zeros((out_channels,), jnp.float32),
        "m1": jax.random.normal(ks[2], (out_channels,), jnp.float32) * 0.1,
        "v1": jnp.abs(jax.random.normal(ks[3], (out_channels,),
                                        jnp.float32)) * 0.5 + 0.5,
        "w2": jax.random.normal(ks[4], (out_channels, out_channels, 3, 3),
                                jnp.float32) * (2.0 / fan2) ** 0.5,
        "b2": jax.random.normal(ks[5], (out_channels,), jnp.float32) * 0.01,
        "g2": jnp.ones((out_channels,), jnp.float32),
        "beta2": jnp.zeros((out_channels,), jnp.float32),
        "m2": jax.random.normal(ks[6], (out_channels,), jnp.float32) * 0.1,
        "v2": jnp.abs(jax.random.normal(ks[7], (out_channels,),
                                        jnp.float32)) * 0.5 + 0.5,
    }


if __name__ == "__main__":
    key = jax.random.PRNGKey(0)
    k_x, k_p = jax.random.split(key)

    N, Cin, Cout, H, W = 2, 4, 8, 16, 16
    x = jax.random.normal(k_x, (N, Cin, H, W), jnp.float32)
    params = make_params(k_p, Cin, Cout)

    prepared = prepare_params(params)   # BN fold + weight repack: once, off the hot path

    out = jax.block_until_ready(double_conv(x, prepared))
    ref = jax.block_until_ready(_reference(x, params))

    assert out.shape == (N, Cout, H, W), out.shape
    # bf16 matmul inputs (f32 accumulation) => tolerance loosened vs the pure-f32 ref.
    assert jnp.allclose(out, ref, atol=5e-2, rtol=5e-2), \
        float(jnp.max(jnp.abs(out - ref)))
    print("KERNEL_OK")
</pallas_src>

<mosaic_0001>
module attributes {stable_mosaic.version = 11 : i64} {
  func.func @_fused_double_conv_kernel(%arg0: i32, %arg1: memref<1x16x16x4xbf16, #tpu.memory_space<vmem>>, %arg2: memref<36x8xbf16, #tpu.memory_space<vmem>>, %arg3: memref<1x8xf32, #tpu.memory_space<vmem>>, %arg4: memref<1x8xf32, #tpu.memory_space<vmem>>, %arg5: memref<72x8xbf16, #tpu.memory_space<vmem>>, %arg6: memref<1x8xf32, #tpu.memory_space<vmem>>, %arg7: memref<1x8xf32, #tpu.memory_space<vmem>>, %arg8: memref<1x16x16x8xf32, #tpu.memory_space<vmem>>, %arg9: memref<18x18x4xbf16, #tpu.memory_space<vmem>>, %arg10: memref<16x16x36xbf16, #tpu.memory_space<vmem>>, %arg11: memref<18x18x8xbf16, #tpu.memory_space<vmem>>, %arg12: memref<16x16x72xbf16, #tpu.memory_space<vmem>>) attributes {dimension_semantics = [#tpu.dimension_semantics<parallel>], iteration_bounds = array<i64: 2>, scalar_prefetch = 0 : i64, scratch_operands = 4 : i64, tpu.core_type = #tpu.core_type<tc>, window_params = [{transform_indices = @transform_0, window_bounds = array<i64: 1, 16, 16, 4>}, {pipeline_mode = #tpu.pipeline_mode<synchronous>, transform_indices = @transform_1, window_bounds = array<i64: 36, 8>}, {pipeline_mode = #tpu.pipeline_mode<synchronous>, transform_indices = @transform_2, window_bounds = array<i64: 1, 8>}, {pipeline_mode = #tpu.pipeline_mode<synchronous>, transform_indices = @transform_3, window_bounds = array<i64: 1, 8>}, {pipeline_mode = #tpu.pipeline_mode<synchronous>, transform_indices = @transform_4, window_bounds = array<i64: 72, 8>}, {pipeline_mode = #tpu.pipeline_mode<synchronous>, transform_indices = @transform_5, window_bounds = array<i64: 1, 8>}, {pipeline_mode = #tpu.pipeline_mode<synchronous>, transform_indices = @transform_6, window_bounds = array<i64: 1, 8>}, {transform_indices = @transform_7, window_bounds = array<i64: 1, 16, 16, 8>}]} {
    %cst = arith.constant 0.000000e+00 : bf16
    %0 = vector.broadcast %cst : bf16 to vector<18x18x4xbf16>
    %c0 = arith.constant 0 : index
    %c0_0 = arith.constant 0 : index
    %c0_1 = arith.constant 0 : index
    %1 = vector.load %arg9[%c0, %c0_0, %c0_1] : memref<18x18x4xbf16, #tpu.memory_space<vmem>>, vector<18x18x4xbf16>
    tpu.vector_store %arg9[%c0, %c0_0, %c0_1], %0 {strides = array<i32>} : memref<18x18x4xbf16, #tpu.memory_space<vmem>>, vector<18x18x4xbf16>,
    %c0_2 = arith.constant 0 : index
    %c0_3 = arith.constant 0 : index
    %c0_4 = arith.constant 0 : index
    %c0_5 = arith.constant 0 : index
    %2 = vector.load %arg1[%c0_2, %c0_3, %c0_4, %c0_5] : memref<1x16x16x4xbf16, #tpu.memory_space<vmem>>, vector<1x16x16x4xbf16>
    %3 = vector.shape_cast %2 : vector<1x16x16x4xbf16> to vector<16x16x4xbf16>
    %c1 = arith.constant 1 : index
    %c1_6 = arith.constant 1 : index
    %c0_7 = arith.constant 0 : index
    %4 = vector.load %arg9[%c1, %c1_6, %c0_7] : memref<18x18x4xbf16, #tpu.memory_space<vmem>>, vector<16x16x4xbf16>
    tpu.vector_store %arg9[%c1, %c1_6, %c0_7], %3 {strides = array<i32>} : memref<18x18x4xbf16, #tpu.memory_space<vmem>>, vector<16x16x4xbf16>,
    %c0_8 = arith.constant 0 : index
    %c0_9 = arith.constant 0 : index
    %c0_10 = arith.constant 0 : index
    %5 = vector.load %arg9[%c0_8, %c0_9, %c0_10] : memref<18x18x4xbf16, #tpu.memory_space<vmem>>, vector<16x16x4xbf16>
    %c0_11 = arith.constant 0 : index
    %c0_12 = arith.constant 0 : index
    %c0_13 = arith.constant 0 : index
    %6 = vector.load %arg10[%c0_11, %c0_12, %c0_13] : memref<16x16x36xbf16, #tpu.memory_space<vmem>>, vector<16x16x4xbf16>
    tpu.vector_store %arg10[%c0_11, %c0_12, %c0_13], %5 {strides = array<i32>} : memref<16x16x36xbf16, #tpu.memory_space<vmem>>, vector<16x16x4xbf16>,
    %c0_14 = arith.constant 0 : index
    %c1_15 = arith.constant 1 : index
    %c0_16 = arith.constant 0 : index
    %7 = vector.load %arg9[%c0_14, %c1_15, %c0_16] : memref<18x18x4xbf16, #tpu.memory_space<vmem>>, vector<16x16x4xbf16>
    %c0_17 = arith.constant 0 : index
    %c0_18 = arith.constant 0 : index
    %c4 = arith.constant 4 : index
    %8 = vector.load %arg10[%c0_17, %c0_18, %c4] : memref<16x16x36xbf16, #tpu.memory_space<vmem>>, vector<16x16x4xbf16>
    tpu.vector_store %arg10[%c0_17, %c0_18, %c4], %7 {strides = array<i32>} : memref<16x16x36xbf16, #tpu.memory_space<vmem>>, vector<16x16x4xbf16>,
    %c0_19 = arith.constant 0 : index
    %c2 = arith.constant 2 : index
    %c0_20 = arith.constant 0 : index
    %9 = vector.load %arg9[%c0_19, %c2, %c0_20] : memref<18x18x4xbf16, #tpu.memory_space<vmem>>, vector<16x16x4xbf16>
    %c0_21 = arith.constant 0 : index
    %c0_22 = arith.constant 0 : index
    %c8 = arith.constant 8 : index
    %10 = vector.load %arg10[%c0_21, %c0_22, %c8] : memref<16x16x36xbf16, #tpu.memory_space<vmem>>, vector<16x16x4xbf16>
    tpu.vector_store %arg10[%c0_21, %c0_22, %c8], %9 {strides = array<i32>} : memref<16x16x36xbf16, #tpu.memory_space<vmem>>, vector<16x16x4xbf16>,
    %c1_23 = arith.constant 1 : index
    %c0_24 = arith.constant 0 : index
    %c0_25 = arith.constant 0 : index
    %11 = vector.load %arg9[%c1_23, %c0_24, %c0_25] : memref<18x18x4xbf16, #tpu.memory_space<vmem>>, vector<16x16x4xbf16>
    %c0_26 = arith.constant 0 : index
    %c0_27 = arith.constant 0 : index
    %c12 = arith.constant 12 : index
    %12 = vector.load %arg10[%c0_26, %c0_27, %c12] : memref<16x16x36xbf16, #tpu.memory_space<vmem>>, vector<16x16x4xbf16>
    tpu.vector_store %arg10[%c0_26, %c0_27, %c12], %11 {strides = array<i32>} : memref<16x16x36xbf16, #tpu.memory_space<vmem>>, vector<16x16x4xbf16>,
    %c1_28 = arith.constant 1 : index
    %c1_29 = arith.constant 1 : index
    %c0_30 = arith.constant 0 : index
    %13 = vector.load %arg9[%c1_28, %c1_29, %c0_30] : memref<18x18x4xbf16, #tpu.memory_space<vmem>>, vector<16x16x4xbf16>
    %c0_31 = arith.constant 0 : index
    %c0_32 = arith.constant 0 : index
    %c16 = arith.constant 16 : index
    %14 = vector.load %arg10[%c0_31, %c0_32, %c16] : memref<16x16x36xbf16, #tpu.memory_space<vmem>>, vector<16x16x4xbf16>
    tpu.vector_store %arg10[%c0_31, %c0_32, %c16], %13 {strides = array<i32>} : memref<16x16x36xbf16, #tpu.memory_space<vmem>>, vector<16x16x4xbf16>,
    %c1_33 = arith.constant 1 : index
    %c2_34 = arith.constant 2 : index
    %c0_35 = arith.constant 0 : index
    %15 = vector.load %arg9[%c1_33, %c2_34, %c0_35] : memref<18x18x4xbf16, #tpu.memory_space<vmem>>, vector<16x16x4xbf16>
    %c0_36 = arith.constant 0 : index
    %c0_37 = arith.constant 0 : index
    %c20 = arith.constant 20 : index
    %16 = vector.load %arg10[%c0_36, %c0_37, %c20] : memref<16x16x36xbf16, #tpu.memory_space<vmem>>, vector<16x16x4xbf16>
    tpu.vector_store %arg10[%c0_36, %c0_37, %c20], %15 {strides = array<i32>} : memref<16x16x36xbf16, #tpu.memory_space<vmem>>, vector<16x16x4xbf16>,
    %c2_38 = arith.constant 2 : index
    %c0_39 = arith.constant 0 : index
    %c0_40 = arith.constant 0 : index
    %17 = vector.load %arg9[%c2_38, %c0_39, %c0_40] : memref<18x18x4xbf16, #tpu.memory_space<vmem>>, vector<16x16x4xbf16>
    %c0_41 = arith.constant 0 : index
    %c0_42 = arith.constant 0 : index
    %c24 = arith.constant 24 : index
    %18 = vector.load %arg10[%c0_41, %c0_42, %c24] : memref<16x16x36xbf16, #tpu.memory_space<vmem>>, vector<16x16x4xbf16>
    tpu.vector_store %arg10[%c0_41, %c0_42, %c24], %17 {strides = array<i32>} : memref<16x16x36xbf16, #tpu.memory_space<vmem>>, vector<16x16x4xbf16>,
    %c2_43 = arith.constant 2 : index
    %c1_44 = arith.constant 1 : index
    %c0_45 = arith.constant 0 : index
    %19 = vector.load %arg9[%c2_43, %c1_44, %c0_45] : memref<18x18x4xbf16, #tpu.memory_space<vmem>>, vector<16x16x4xbf16>
    %c0_46 = arith.constant 0 : index
    %c0_47 = arith.constant 0 : index
    %c28 = arith.constant 28 : index
    %20 = vector.load %arg10[%c0_46, %c0_47, %c28] : memref<16x16x36xbf16, #tpu.memory_space<vmem>>, vector<16x16x4xbf16>
    tpu.vector_store %arg10[%c0_46, %c0_47, %c28], %19 {strides = array<i32>} : memref<16x16x36xbf16, #tpu.memory_space<vmem>>, vector<16x16x4xbf16>,
    %c2_48 = arith.constant 2 : index
    %c2_49 = arith.constant 2 : index
    %c0_50 = arith.constant 0 : index
    %21 = vector.load %arg9[%c2_48, %c2_49, %c0_50] : memref<18x18x4xbf16, #tpu.memory_space<vmem>>, vector<16x16x4xbf16>
    %c0_51 = arith.constant 0 : index
    %c0_52 = arith.constant 0 : index
    %c32 = arith.constant 32 : index
    %22 = vector.load %arg10[%c0_51, %c0_52, %c32] : memref<16x16x36xbf16, #tpu.memory_space<vmem>>, vector<16x16x4xbf16>
    tpu.vector_store %arg10[%c0_51, %c0_52, %c32], %21 {strides = array<i32>} : memref<16x16x36xbf16, #tpu.memory_space<vmem>>, vector<16x16x4xbf16>,
    %c0_53 = arith.constant 0 : index
    %c0_54 = arith.constant 0 : index
    %c0_55 = arith.constant 0 : index
    %23 = vector.load %arg10[%c0_53, %c0_54, %c0_55] : memref<16x16x36xbf16, #tpu.memory_space<vmem>>, vector<16x16x36xbf16>
    %c0_56 = arith.constant 0 : index
    %c0_57 = arith.constant 0 : index
    %24 = vector.load %arg2[%c0_56, %c0_57] : memref<36x8xbf16, #tpu.memory_space<vmem>>, vector<36x8xbf16>
    %cst_58 = arith.constant dense<0.000000e+00> : vector<16x16x8xf32>
    %25 = tpu.matmul %23, %24, %cst_58 {dimension_numbers = #tpu.dot_dimension_numbers<[2], [0], [0, 1], [1], [0, 0, 0, 1, 1, 1], [], []>} : vector<16x16x36xbf16>, vector<36x8xbf16>, vector<16x16x8xf32> -> vector<16x16x8xf32>
    %c0_59 = arith.constant 0 : index
    %c0_60 = arith.constant 0 : index
    %26 = vector.load %arg3[%c0_59, %c0_60] : memref<1x8xf32, #tpu.memory_space<vmem>>, vector<1x8xf32>
    %27 = vector.shape_cast %26 : vector<1x8xf32> to vector<8xf32>
    %28 = vector.shape_cast %27 : vector<8xf32> to vector<1x1x8xf32>
    %29 = vector.broadcast %28 : vector<1x1x8xf32> to vector<16x16x8xf32>
    %30 = arith.mulf %25, %29 : vector<16x16x8xf32>
    %c0_61 = arith.constant 0 : index
    %c0_62 = arith.constant 0 : index
    %31 = vector.load %arg4[%c0_61, %c0_62] : memref<1x8xf32, #tpu.memory_space<vmem>>, vector<1x8xf32>
    %32 = vector.shape_cast %31 : vector<1x8xf32> to vector<8xf32>
    %33 = vector.shape_cast %32 : vector<8xf32> to vector<1x1x8xf32>
    %34 = vector.broadcast %33 : vector<1x1x8xf32> to vector<16x16x8xf32>
    %35 = arith.addf %30, %34 : vector<16x16x8xf32>
    %cst_63 = arith.constant 0.000000e+00 : f32
    %36 = vector.broadcast %cst_63 : f32 to vector<16x16x8xf32>
    %37 = arith.maximumf %35, %36 : vector<16x16x8xf32>
    %cst_64 = arith.constant 0.000000e+00 : bf16
    %38 = vector.broadcast %cst_64 : bf16 to vector<18x18x8xbf16>
    %c0_65 = arith.constant 0 : index
    %c0_66 = arith.constant 0 : index
    %c0_67 = arith.constant 0 : index
    %39 = vector.load %arg11[%c0_65, %c0_66, %c0_67] : memref<18x18x8xbf16, #tpu.memory_space<vmem>>, vector<18x18x8xbf16>
    tpu.vector_store %arg11[%c0_65, %c0_66, %c0_67], %38 {strides = array<i32>} : memref<18x18x8xbf16, #tpu.memory_space<vmem>>, vector<18x18x8xbf16>,
    %40 = arith.truncf %37 : vector<16x16x8xf32> to vector<16x16x8xbf16>
    %c1_68 = arith.constant 1 : index
    %c1_69 = arith.constant 1 : index
    %c0_70 = arith.constant 0 : index
    %41 = vector.load %arg11[%c1_68, %c1_69, %c0_70] : memref<18x18x8xbf16, #tpu.memory_space<vmem>>, vector<16x16x8xbf16>
    tpu.vector_store %arg11[%c1_68, %c1_69, %c0_70], %40 {strides = array<i32>} : memref<18x18x8xbf16, #tpu.memory_space<vmem>>, vector<16x16x8xbf16>,
    %c0_71 = arith.constant 0 : index
    %c0_72 = arith.constant 0 : index
    %c0_73 = arith.constant 0 : index
    %42 = vector.load %arg11[%c0_71, %c0_72, %c0_73] : memref<18x18x8xbf16, #tpu.memory_space<vmem>>, vector<16x16x8xbf16>
    %c0_74 = arith.constant 0 : index
    %c0_75 = arith.constant 0 : index
    %c0_76 = arith.constant 0 : index
    %43 = vector.load %arg12[%c0_74, %c0_75, %c0_76] : memref<16x16x72xbf16, #tpu.memory_space<vmem>>, vector<16x16x8xbf16>
    tpu.vector_store %arg12[%c0_74, %c0_75, %c0_76], %42 {strides = array<i32>} : memref<16x16x72xbf16, #tpu.memory_space<vmem>>, vector<16x16x8xbf16>,
    %c0_77 = arith.constant 0 : index
    %c1_78 = arith.constant 1 : index
    %c0_79 = arith.constant 0 : index
    %44 = vector.load %arg11[%c0_77, %c1_78, %c0_79] : memref<18x18x8xbf16, #tpu.memory_space<vmem>>, vector<16x16x8xbf16>
    %c0_80 = arith.constant 0 : index
    %c0_81 = arith.constant 0 : index
    %c8_82 = arith.constant 8 : index
    %45 = vector.load %arg12[%c0_80, %c0_81, %c8_82] : memref<16x16x72xbf16, #tpu.memory_space<vmem>>, vector<16x16x8xbf16>
    tpu.vector_store %arg12[%c0_80, %c0_81, %c8_82], %44 {strides = array<i32>} : memref<16x16x72xbf16, #tpu.memory_space<vmem>>, vector<16x16x8xbf16>,
    %c0_83 = arith.constant 0 : index
    %c2_84 = arith.constant 2 : index
    %c0_85 = arith.constant 0 : index
    %46 = vector.load %arg11[%c0_83, %c2_84, %c0_85] : memref<18x18x8xbf16, #tpu.memory_space<vmem>>, vector<16x16x8xbf16>
    %c0_86 = arith.constant 0 : index
    %c0_87 = arith.constant 0 : index
    %c16_88 = arith.constant 16 : index
    %47 = vector.load %arg12[%c0_86, %c0_87, %c16_88] : memref<16x16x72xbf16, #tpu.memory_space<vmem>>, vector<16x16x8xbf16>
    tpu.vector_store %arg12[%c0_86, %c0_87, %c16_88], %46 {strides = array<i32>} : memref<16x16x72xbf16, #tpu.memory_space<vmem>>, vector<16x16x8xbf16>,
    %c1_89 = arith.constant 1 : index
    %c0_90 = arith.constant 0 : index
    %c0_91 = arith.constant 0 : index
    %48 = vector.load %arg11[%c1_89, %c0_90, %c0_91] : memref<18x18x8xbf16, #tpu.memory_space<vmem>>, vector<16x16x8xbf16>
    %c0_92 = arith.constant 0 : index
    %c0_93 = arith.constant 0 : index
    %c24_94 = arith.constant 24 : index
    %49 = vector.load %arg12[%c0_92, %c0_93, %c24_94] : memref<16x16x72xbf16, #tpu.memory_space<vmem>>, vector<16x16x8xbf16>
    tpu.vector_store %arg12[%c0_92, %c0_93, %c24_94], %48 {strides = array<i32>} : memref<16x16x72xbf16, #tpu.memory_space<vmem>>, vector<16x16x8xbf16>,
    %c1_95 = arith.constant 1 : index
    %c1_96 = arith.constant 1 : index
    %c0_97 = arith.constant 0 : index
    %50 = vector.load %arg11[%c1_95, %c1_96, %c0_97] : memref<18x18x8xbf16, #tpu.memory_space<vmem>>, vector<16x16x8xbf16>
    %c0_98 = arith.constant 0 : index
    %c0_99 = arith.constant 0 : index
    %c32_100 = arith.constant 32 : index
    %51 = vector.load %arg12[%c0_98, %c0_99, %c32_100] : memref<16x16x72xbf16, #tpu.memory_space<vmem>>, vector<16x16x8xbf16>
    tpu.vector_store %arg12[%c0_98, %c0_99, %c32_100], %50 {strides = array<i32>} : memref<16x16x72xbf16, #tpu.memory_space<vmem>>, vector<16x16x8xbf16>,
    %c1_101 = arith.constant 1 : index
    %c2_102 = arith.constant 2 : index
    %c0_103 = arith.constant 0 : index
    %52 = vector.load %arg11[%c1_101, %c2_102, %c0_103] : memref<18x18x8xbf16, #tpu.memory_space<vmem>>, vector<16x16x8xbf16>
    %c0_104 = arith.constant 0 : index
    %c0_105 = arith.constant 0 : index
    %c40 = arith.constant 40 : index
    %53 = vector.load %arg12[%c0_104, %c0_105, %c40] : memref<16x16x72xbf16, #tpu.memory_space<vmem>>, vector<16x16x8xbf16>
    tpu.vector_store %arg12[%c0_104, %c0_105, %c40], %52 {strides = array<i32>} : memref<16x16x72xbf16, #tpu.memory_space<vmem>>, vector<16x16x8xbf16>,
    %c2_106 = arith.constant 2 : index
    %c0_107 = arith.constant 0 : index
    %c0_108 = arith.constant 0 : index
    %54 = vector.load %arg11[%c2_106, %c0_107, %c0_108] : memref<18x18x8xbf16, #tpu.memory_space<vmem>>, vector<16x16x8xbf16>
    %c0_109 = arith.constant 0 : index
    %c0_110 = arith.constant 0 : index
    %c48 = arith.constant 48 : index
    %55 = vector.load %arg12[%c0_109, %c0_110, %c48] : memref<16x16x72xbf16, #tpu.memory_space<vmem>>, vector<16x16x8xbf16>
    tpu.vector_store %arg12[%c0_109, %c0_110, %c48], %54 {strides = array<i32>} : memref<16x16x72xbf16, #tpu.memory_space<vmem>>, vector<16x16x8xbf16>,
    %c2_111 = arith.constant 2 : index
    %c1_112 = arith.constant 1 : index
    %c0_113 = arith.constant 0 : index
    %56 = vector.load %arg11[%c2_111, %c1_112, %c0_113] : memref<18x18x8xbf16, #tpu.memory_space<vmem>>, vector<16x16x8xbf16>
    %c0_114 = arith.constant 0 : index
    %c0_115 = arith.constant 0 : index
    %c56 = arith.constant 56 : index
    %57 = vector.load %arg12[%c0_114, %c0_115, %c56] : memref<16x16x72xbf16, #tpu.memory_space<vmem>>, vector<16x16x8xbf16>
    tpu.vector_store %arg12[%c0_114, %c0_115, %c56], %56 {strides = array<i32>} : memref<16x16x72xbf16, #tpu.memory_space<vmem>>, vector<16x16x8xbf16>,
    %c2_116 = arith.constant 2 : index
    %c2_117 = arith.constant 2 : index
    %c0_118 = arith.constant 0 : index
    %58 = vector.load %arg11[%c2_116, %c2_117, %c0_118] : memref<18x18x8xbf16, #tpu.memory_space<vmem>>, vector<16x16x8xbf16>
    %c0_119 = arith.constant 0 : index
    %c0_120 = arith.constant 0 : index
    %c64 = arith.constant 64 : index
    %59 = vector.load %arg12[%c0_119, %c0_120, %c64] : memref<16x16x72xbf16, #tpu.memory_space<vmem>>, vector<16x16x8xbf16>
    tpu.vector_store %arg12[%c0_119, %c0_120, %c64], %58 {strides = array<i32>} : memref<16x16x72xbf16, #tpu.memory_space<vmem>>, vector<16x16x8xbf16>,
    %c0_121 = arith.constant 0 : index
    %c0_122 = arith.constant 0 : index
    %c0_123 = arith.constant 0 : index
    %60 = vector.load %arg12[%c0_121, %c0_122, %c0_123] : memref<16x16x72xbf16, #tpu.memory_space<vmem>>, vector<16x16x72xbf16>
    %c0_124 = arith.constant 0 : index
    %c0_125 = arith.constant 0 : index
    %61 = vector.load %arg5[%c0_124, %c0_125] : memref<72x8xbf16, #tpu.memory_space<vmem>>, vector<72x8xbf16>
    %cst_126 = arith.constant dense<0.000000e+00> : vector<16x16x8xf32>
    %62 = tpu.matmul %60, %61, %cst_126 {dimension_numbers = #tpu.dot_dimension_numbers<[2], [0], [0, 1], [1], [0, 0, 0, 1, 1, 1], [], []>} : vector<16x16x72xbf16>, vector<72x8xbf16>, vector<16x16x8xf32> -> vector<16x16x8xf32>
    %c0_127 = arith.constant 0 : index
    %c0_128 = arith.constant 0 : index
    %63 = vector.load %arg6[%c0_127, %c0_128] : memref<1x8xf32, #tpu.memory_space<vmem>>, vector<1x8xf32>
    %64 = vector.shape_cast %63 : vector<1x8xf32> to vector<8xf32>
    %65 = vector.shape_cast %64 : vector<8xf32> to vector<1x1x8xf32>
    %66 = vector.broadcast %65 : vector<1x1x8xf32> to vector<16x16x8xf32>
    %67 = arith.mulf %62, %66 : vector<16x16x8xf32>
    %c0_129 = arith.constant 0 : index
    %c0_130 = arith.constant 0 : index
    %68 = vector.load %arg7[%c0_129, %c0_130] : memref<1x8xf32, #tpu.memory_space<vmem>>, vector<1x8xf32>
    %69 = vector.shape_cast %68 : vector<1x8xf32> to vector<8xf32>
    %70 = vector.shape_cast %69 : vector<8xf32> to vector<1x1x8xf32>
    %71 = vector.broadcast %70 : vector<1x1x8xf32> to vector<16x16x8xf32>
    %72 = arith.addf %67, %71 : vector<16x16x8xf32>
    %cst_131 = arith.constant 0.000000e+00 : f32
    %73 = vector.broadcast %cst_131 : f32 to vector<16x16x8xf32>
    %74 = arith.maximumf %72, %73 : vector<16x16x8xf32>
    %c0_132 = arith.constant 0 : index
    %c0_133 = arith.constant 0 : index
    %c0_134 = arith.constant 0 : index
    %c0_135 = arith.constant 0 : index
    %75 = vector.load %arg8[%c0_132, %c0_133, %c0_134, %c0_135] : memref<1x16x16x8xf32, #tpu.memory_space<vmem>>, vector<1x16x16x8xf32>
    %76 = vector.shape_cast %75 : vector<1x16x16x8xf32> to vector<16x16x8xf32>
    %77 = vector.shape_cast %74 : vector<16x16x8xf32> to vector<1x16x16x8xf32>
    tpu.vector_store %arg8[%c0_132, %c0_133, %c0_134, %c0_135], %77 {strides = array<i32>} : memref<1x16x16x8xf32, #tpu.memory_space<vmem>>, vector<1x16x16x8xf32>,
    return
  }
  func.func @transform_0(%arg0: i32) -> (i32, i32, i32, i32) {
    %c0_i32 = arith.constant 0 : i32
    %c0_i32_0 = arith.constant 0 : i32
    %c0_i32_1 = arith.constant 0 : i32
    %c0_i32_2 = arith.constant 0 : i32
    return %arg0, %c0_i32, %c0_i32_0, %c0_i32_1 : i32, i32, i32, i32
  }
  func.func @transform_1(%arg0: i32) -> (i32, i32) {
    %c0_i32 = arith.constant 0 : i32
    %c0_i32_0 = arith.constant 0 : i32
    %c0_i32_1 = arith.constant 0 : i32
    return %c0_i32, %c0_i32_0 : i32, i32
  }
  func.func @transform_2(%arg0: i32) -> (i32, i32) {
    %c0_i32 = arith.constant 0 : i32
    %c0_i32_0 = arith.constant 0 : i32
    %c0_i32_1 = arith.constant 0 : i32
    return %c0_i32, %c0_i32_0 : i32, i32
  }
  func.func @transform_3(%arg0: i32) -> (i32, i32) {
    %c0_i32 = arith.constant 0 : i32
    %c0_i32_0 = arith.constant 0 : i32
    %c0_i32_1 = arith.constant 0 : i32
    return %c0_i32, %c0_i32_0 : i32, i32
  }
  func.func @transform_4(%arg0: i32) -> (i32, i32) {
    %c0_i32 = arith.constant 0 : i32
    %c0_i32_0 = arith.constant 0 : i32
    %c0_i32_1 = arith.constant 0 : i32
    return %c0_i32, %c0_i32_0 : i32, i32
  }
  func.func @transform_5(%arg0: i32) -> (i32, i32) {
    %c0_i32 = arith.constant 0 : i32
    %c0_i32_0 = arith.constant 0 : i32
    %c0_i32_1 = arith.constant 0 : i32
    return %c0_i32, %c0_i32_0 : i32, i32
  }
  func.func @transform_6(%arg0: i32) -> (i32, i32) {
    %c0_i32 = arith.constant 0 : i32
    %c0_i32_0 = arith.constant 0 : i32
    %c0_i32_1 = arith.constant 0 : i32
    return %c0_i32, %c0_i32_0 : i32, i32
  }
  func.func @transform_7(%arg0: i32) -> (i32, i32, i32, i32) {
    %c0_i32 = arith.constant 0 : i32
    %c0_i32_0 = arith.constant 0 : i32
    %c0_i32_1 = arith.constant 0 : i32
    %c0_i32_2 = arith.constant 0 : i32
    return %arg0, %c0_i32, %c0_i32_0, %c0_i32_1 : i32, i32, i32, i32
  }
}

</mosaic_0001>

<bundles_post_ra>
// kernel: tpu_custom_call.1
= control target key start
LH: loop header
LB: loop body
LE: loop exit
PB: predicated region body
PF: predicated region fallthrough
CT: control target
= control target key end

     0   :  { %s8852_s24 = smov 0   ;;  %s10647_s0 = inlined_call_operand.vmem [shape: bf16[2,16,16,4], index: 0, kind: input, shape index: {}]   ;;  %s10648_s1 = inlined_call_operand.vmem [shape: bf16[36,8], index: 1, kind: input, shape index: {}]   ;;  %s10649_s2 = inlined_call_operand.vmem [shape: f32[1,8], index: 2, kind: input, shape index: {}]   ;;  %s10650_s3 = inlined_call_operand.vmem [shape: f32[1,8], index: 3, kind: input, shape index: {}]   ;;  %s10651_s4 = inlined_call_operand.vmem [shape: bf16[72,8], index: 4, kind: input, shape index: {}]   ;;  %s10652_s5 = inlined_call_operand.vmem [shape: f32[1,8], index: 5, kind: input, shape index: {}]   ;;  %s10653_s6 = inlined_call_operand.vmem [shape: f32[1,8], index: 6, kind: input, shape index: {}]   ;;  %s10654_s7 = inlined_call_operand.vmem [shape: f32[2,16,16,8], index: 7, kind: output, shape index: {}]  }
   0x1 LB: > { %s7555_s25 = sadd.s32 4294967295, %s8797_s24   ;;  %p7559_p0 = scmp.ge.s32.totalorder %s8797_s24, 1  ;;  %s8797_s24 = sphi %s8852_s24, %s17_s24  }
   0x2   : > { %p237_p1 = scmp.lt.s32.totalorder %s8797_s24, 3 }
   0x4   : > { %p238_p2 = pnand %p7559_p0, %p237_p1 }
   0x5   : > { %vm280_vm0 = vcmask (!%p238_p2), 27648   ;;  %vm283_vm1 = vcmask (!%p238_p2), 24576   ;;  %v8799_v0 = vmov (!%p238_p2), 0   ;;  %p269_p3 = scmp.lt.s32.totalorder (!%p238_p2), %s7555_s25, 1  ;;  %vm10655_vm2 = vsmask.f32 (!%p238_p2), 256 }
   0x6   : > { %241 = sbr.rel (%p238_p2) target bundleno = 1087 (0x43f), region = 48  ;;  %281 = vst.msk [vmem:[#allocation2] sm:$0xf] (!%p238_p2), %vm280_vm0, %v8799_v0  ;;  %282 = vst.msk [vmem:[#allocation2 + $0x4] sm:$0xf] (!%p238_p2), %vm280_vm0, %v8799_v0  ;;  %vm10658_vm3 = vcmask (!%p238_p2), 1046528  }
   0x7   : > { %284 = vst.msk [vmem:[#allocation2 + $0x8] sm:$0x1] (!%p238_p2), %vm283_vm1, %v8799_v0  ;;  %287 = vst.msk [vmem:[#allocation2 + $0x14] sm:$0x1] (!%p238_p2), %vm283_vm1, %v8799_v0  ;;  %vm1130_vm4 = vsmask.f32 (!%p238_p2), 7424 }
   0x8   : > { %285 = vst.msk [vmem:[#allocation2 + $0xc] sm:$0xf] (!%p238_p2), %vm280_vm0, %v8799_v0  ;;  %286 = vst.msk [vmem:[#allocation2 + $0x10] sm:$0xf] (!%p238_p2), %vm280_vm0, %v8799_v0  ;;  %vm369_vm5 = vsmask.f32 (!%p238_p2), 4368 }
   0x9   : > { %288 = vst.msk [vmem:[#allocation2 + $0x18] sm:$0xf] (!%p238_p2), %vm280_vm0, %v8799_v0  ;;  %289 = vst.msk [vmem:[#allocation2 + $0x1c] sm:$0xf] (!%p238_p2), %vm280_vm0, %v8799_v0  ;;  %vm10656_vm6 = vsmask.f32 (!%p238_p2), 7938 }
   0xa   : > { %290 = vst.msk [vmem:[#allocation2 + $0x20] sm:$0x1] (!%p238_p2), %vm283_vm1, %v8799_v0  ;;  %293 = vst.msk [vmem:[#allocation2 + $0x2c] sm:$0x1] (!%p238_p2), %vm283_vm1, %v8799_v0  ;;  %s8800_s30 = smov (!%p238_p2), 8   ;;  %s8801_s8 = smov (!%p238_p2), 4  }
   0xb   : > { %291 = vst.msk [vmem:[#allocation2 + $0x24] sm:$0xf] (!%p238_p2), %vm280_vm0, %v8799_v0  ;;  %292 = vst.msk [vmem:[#allocation2 + $0x28] sm:$0xf] (!%p238_p2), %vm280_vm0, %v8799_v0  ;;  %s8802_s9 = smov (!%p238_p2), 12   ;;  %s8803_s10 = smov (!%p238_p2), 24  }
   0xc   : > { %294 = vst.msk [vmem:[#allocation2 + $0x30] sm:$0xf] (!%p238_p2), %vm280_vm0, %v8799_v0  ;;  %295 = vst.msk [vmem:[#allocation2 + $0x34] sm:$0xf] (!%p238_p2), %vm280_vm0, %v8799_v0  ;;  %s8804_s11 = smov (!%p238_p2), 20   ;;  %s8805_s12 = smov (!%p238_p2), 32  }
   0xd   : > { %296 = vst.msk [vmem:[#allocation2 + $0x38] sm:$0x1] %vm283_vm1, %v8799_v0  ;;  %299 = vst.msk [vmem:[#allocation2 + $0x44] sm:$0x1] %vm283_vm1, %v8799_v0  ;;  %s10718_s25 = smov (!%p269_p3, %s7555_s25), 1  ;;  %v8299_v3 = vld [vmem:[#allocation2] sm:$0xff]  }
   0xe   : > { %297 = vst.msk [vmem:[#allocation2 + $0x3c] sm:$0xf] %vm280_vm0, %v8799_v0  ;;  %298 = vst.msk [vmem:[#allocation2 + $0x40] sm:$0xf] %vm280_vm0, %v8799_v0  ;;  %s8122_s26 = sshll.u32 %s10718_s25, 7  ;;  %v1132_v7 = vshrl.u32 %v8299_v3, 16 }
   0xf   : > { %300 = vst.msk [vmem:[#allocation2 + $0x48] sm:$0xf] %vm280_vm0, %v8799_v0  ;;  %301 = vst.msk [vmem:[#allocation2 + $0x4c] sm:$0xf] %vm280_vm0, %v8799_v0  ;;  %s8978_s29 = scalar_lea.vmem %s10647_s0, %s8122_s26  ;;  %v8301_v6 = vld [vmem:[#allocation2] sm:$0xfe]  }
  0x10   : > { %302 = vst.msk [vmem:[#allocation2 + $0x50] sm:$0x1] %vm283_vm1, %v8799_v0  ;;  %305 = vst.msk [vmem:[#allocation2 + $0x5c] sm:$0x1] %vm283_vm1, %v8799_v0  ;;  %v336_v1 = vld [vmem:[%s8978_s29] sm:$0xf] }
  0x11   : > { %303 = vst.msk [vmem:[#allocation2 + $0x54] sm:$0xf] %vm280_vm0, %v8799_v0  ;;  %304 = vst.msk [vmem:[#allocation2 + $0x58] sm:$0xf] %vm280_vm0, %v8799_v0  ;;  %v337_v2 = vld [vmem:[%s8978_s29 + $0x4] sm:$0xf] }
  0x12   : > { %306 = vst.msk [vmem:[#allocation2 + $0x60] sm:$0xf] %vm280_vm0, %v8799_v0  ;;  %307 = vst.msk [vmem:[#allocation2 + $0x64] sm:$0xf] %vm280_vm0, %v8799_v0  ;;  %v338_v5 = vld [vmem:[%s8978_s29 + $0x8] sm:$0xf] }
  0x13   : > { %308 = vst.msk [vmem:[#allocation2 + $0x68] sm:$0x1] %vm283_vm1, %v8799_v0  ;;  %311 = vst.msk [vmem:[#allocation2 + $0x74] sm:$0x1] %vm283_vm1, %v8799_v0  ;;  %v1134_v8 = vshll.u32 %v8299_v3, 16  ;;  %v1565_v11 = vrot.slane %v8301_v6, 1 }
  0x14   : > { %309 = vst.msk [vmem:[#allocation2 + $0x6c] sm:$0xf] %vm280_vm0, %v8799_v0  ;;  %310 = vst.msk [vmem:[#allocation2 + $0x70] sm:$0xf] %vm280_vm0, %v8799_v0  ;;  %v372_v12 = vshrl.u32 %v336_v1, 16  ;;  %v375_v13 = vshll.u32 %v336_v1, 16 }
  0x15   : > { %312 = vst.msk [vmem:[#allocation2 + $0x78] sm:$0xf] %vm280_vm0, %v8799_v0  ;;  %313 = vst.msk [vmem:[#allocation2 + $0x7c] sm:$0xf] %vm280_vm0, %v8799_v0  ;;  %v380_v14 = vshrl.u32 %v337_v2, 16  ;;  %v1136_v15 = vrot.slane %v1134_v8, 1 }
  0x16   : > { %314 = vst.msk [vmem:[#allocation2 + $0x80] sm:$0x1] %vm283_vm1, %v8799_v0  ;;  %317 = vst.msk [vmem:[#allocation2 + $0x8c] sm:$0x1] %vm283_vm1, %v8799_v0  ;;  %v383_v18 = vshll.u32 %v337_v2, 16  ;;  %v374_v21 = vrot.slane %v372_v12, 7 }
  0x17   : > { %315 = vst.msk [vmem:[#allocation2 + $0x84] sm:$0xf] %vm280_vm0, %v8799_v0  ;;  %316 = vst.msk [vmem:[#allocation2 + $0x88] sm:$0xf] %vm280_vm0, %v8799_v0  ;;  %v339_v19 = vld [vmem:[%s8978_s29 + $0xc] sm:$0xf]  ;;  %v1137_v25 = vor.u32 %v1136_v15, %v1132_v7 }
  0x18   : > { %318 = vst.msk [vmem:[#allocation2 + $0x90] sm:$0xf] %vm280_vm0, %v8799_v0  ;;  %319 = vst.msk [vmem:[#allocation2 + $0x94] sm:$0xf] %vm280_vm0, %v8799_v0  ;;  %v382_v22 = vrot.slane %v380_v14, 7  ;;  %v389_v23 = vshrl.u32 %v338_v5, 16  ;;  %v377_v32 = vor.u32 %v375_v13, %v374_v21 }
  0x19   : > { %320 = vst.msk [vmem:[#allocation2 + $0x98] sm:$0x1] %vm283_vm1, %v8799_v0  ;;  %323 = vst.msk [vmem:[#allocation2 + $0xa4] sm:$0x1] %vm283_vm1, %v8799_v0  ;;  %v392_v24 = vshll.u32 %v338_v5, 16  ;;  %v397_v29 = vshrl.u32 %v339_v19, 16 }
  0x1a   : > { %321 = vst.msk [vmem:[#allocation2 + $0x9c] sm:$0xf] %vm280_vm0, %v8799_v0  ;;  %322 = vst.msk [vmem:[#allocation2 + $0xa0] sm:$0xf] %vm280_vm0, %v8799_v0  ;;  %v695_v28 = vld [vmem:[#allocation2 + $0xc] sm:$0xf]  ;;  %v385_v34 = vor.u32 %v383_v18, %v382_v22 }
  0x1b   : > { %324 = vst.msk [vmem:[#allocation2 + $0xa8] sm:$0xf] %vm280_vm0, %v8799_v0  ;;  %325 = vst.msk [vmem:[#allocation2 + $0xac] sm:$0xf] %vm280_vm0, %v8799_v0  ;;  %v400_v30 = vshll.u32 %v339_v19, 16  ;;  %v378_v33 = vrot.slane %v374_v21, 4 }
  0x1c   : > { %326 = vst.msk [vmem:[#allocation2 + $0xb0] sm:$0x1] %vm283_vm1, %v8799_v0  ;;  %329 = vst.msk [vmem:[#allocation2 + $0xbc] sm:$0x1] %vm283_vm1, %v8799_v0  ;;  %v340_v31 = vld [vmem:[%s8978_s29 + $0x10] sm:$0xf] }
  0x1d   : > { %327 = vst.msk [vmem:[#allocation2 + $0xb4] sm:$0xf] %vm280_vm0, %v8799_v0  ;;  %328 = vst.msk [vmem:[#allocation2 + $0xb8] sm:$0xf] %vm280_vm0, %v8799_v0  ;;  %v391_v35 = vrot.slane %v389_v23, 7  ;;  %v399_v38 = vrot.slane %v397_v29, 7 }
  0x1e   : > { %330 = vst.msk [vmem:[#allocation2 + $0xc0] sm:$0xf] %vm280_vm0, %v8799_v0  ;;  %331 = vst.msk [vmem:[#allocation2 + $0xc4] sm:$0xf] %vm280_vm0, %v8799_v0  ;;  %v341_v36 = vld [vmem:[%s8978_s29 + $0x14] sm:$0xf] }
  0x1f   : > { %332 = vst.msk [vmem:[#allocation2 + $0xc8] sm:$0x1] %vm283_vm1, %v8799_v0  ;;  %335 = vst.msk [vmem:[#allocation2 + $0xd4] sm:$0x1] %vm283_vm1, %v8799_v0  ;;  %v704_v39 = vld [vmem:[#allocation2 + $0x18] sm:$0xf]  ;;  %v394_v44 = vor.u32 %v392_v24, %v391_v35  ;;  %v402_v49 = vor.u32 %v400_v30, %v399_v38 }
  0x20   : > { %333 = vst.msk [vmem:[#allocation2 + $0xcc] sm:$0xf] %vm280_vm0, %v8799_v0  ;;  %334 = vst.msk [vmem:[#allocation2 + $0xd0] sm:$0xf] %vm280_vm0, %v8799_v0  ;;  %v406_v40 = vshrl.u32 %v340_v31, 16  ;;  %v409_v41 = vshll.u32 %v340_v31, 16 }
  0x21   : > { %v8300_v4 = vld [vmem:[#allocation2 + $0x8] ss:$0 sps:$4 sm:$0x11]   ;;  %vm8986_vm7 = vmor %vm10655_vm2, %vm369_vm5  ;;  %v395_v45 = vrot.slane %v391_v35, 4  ;;  %v711_v46 = vld [vmem:[#allocation2 + $0x24] sm:$0xf] }
  0x22   : > { %v1139_v9 = vshll.u32 %v8300_v4, 16  ;;  %v8302_v10 = vld [vmem:[#allocation2 + $0x8] ss:$0 sps:$4 sm:$0x11]   ;;  %vm8993_vm8 = vmand %vm280_vm0, %vm10656_vm6  ;;  %v386_v42 = vsel %vm8986_vm7, %v378_v33, %v385_v34  ;;  %v701_v47 = vld [vmem:[#allocation2 + $0x14] sm:$0x1] }
  0x23   : > { %v1566_v17 = vrot.slane %v8302_v10, 1  ;;  %v696_v43 = vsel %vm8993_vm8, %v377_v32, %v695_v28  ;;  %v342_v48 = vld [vmem:[%s8978_s29 + $0x18] sm:$0xf]  ;;  %698 = vst.msk [vmem:[#allocation2 + $0x10] sm:$0xf] %vm280_vm0, %v386_v42  ;;  %v408_v50 = vrot.slane %v406_v40, 7  ;;  %vm9010_vm9 = vmand %vm283_vm1, %vm10655_vm2  ;;  %v705_v55 = vsel %vm8993_vm8, %v394_v44, %v704_v39 }
  0x24   : > { %v1141_v16 = vrot.slane %v1139_v9, 1  ;;  %697 = vst [vmem:[#allocation2 + $0xc] sm:$0xf] %v696_v43  ;;  %v414_v51 = vshrl.u32 %v341_v36, 16  ;;  %v417_v52 = vshll.u32 %v341_v36, 16  ;;  %v387_v56 = vrot.slane %v382_v22, 4 }
  0x25   : > { %v1567_v26 = vsel %vm10658_vm3, %v1565_v11, %v1566_v17  ;;  %v708_v54 = vld [vmem:[#allocation2 + $0x20] sm:$0x1]  ;;  %v404_v57 = vrot.slane %v399_v38, 4  ;;  %v343_v58 = vld [vmem:[%s8978_s29 + $0x1c] sm:$0xf]  ;;  %v423_v59 = vshrl.u32 %v342_v48, 16  ;;  %v403_v60 = vsel %vm8986_vm7, %v395_v45, %v402_v49 }
  0x26   : > { %1613 = vrot.lane.b32.xlu1 %v1567_v26, %s8800_s30  ;;  %v1142_v37 = vsel %vm1130_vm4, %v1137_v25, %v1141_v16  ;;  %706 = vst [vmem:[#allocation2 + $0x18] sm:$0xf] %v705_v55  ;;  %v411_v61 = vor.u32 %v409_v41, %v408_v50  ;;  %v412_v62 = vrot.slane %v408_v50, 4  ;;  %v416_v63 = vrot.slane %v414_v51, 7  ;;  %v344_v1 = vld [vmem:[%s8978_s29 + $0x20] sm:$0xf] }
  0x27   : > { %1323 = vrot.lane.b32.xlu0 %v1142_v37, %s8801_s8  ;;  %707 = vst.msk [vmem:[#allocation2 + $0x1c] sm:$0xf] %vm280_vm0, %v403_v60  ;;  %v702_v2 = vsel %vm9010_vm9, %v387_v56, %v701_v47  ;;  %v709_v3 = vsel %vm9010_vm9, %v404_v57, %v708_v54  ;;  %v715_v4 = vld [vmem:[#allocation2 + $0x2c] sm:$0x1]  ;;  %v425_v5 = vrot.slane %v423_v59, 7  ;;  %v426_v6 = vshll.u32 %v342_v48, 16 }
  0x28   : > { %v419_v7 = vor.u32 %v417_v52, %v416_v63  ;;  %v712_v8 = vsel %vm8993_vm8, %v411_v61, %v711_v46  ;;  %703 = vst [vmem:[#allocation2 + $0x14] sm:$0x1] %v702_v2  ;;  %710 = vst [vmem:[#allocation2 + $0x20] sm:$0x1] %v709_v3  ;;  %v421_v9 = vrot.slane %v416_v63, 4  ;;  %v431_v10 = vshrl.u32 %v343_v58, 16 }
  0x29   : > { %v718_v11 = vld [vmem:[#allocation2 + $0x30] sm:$0xf]  ;;  %713 = vst [vmem:[#allocation2 + $0x24] sm:$0xf] %v712_v8  ;;  %v428_v12 = vor.u32 %v426_v6, %v425_v5  ;;  %v429_v13 = vrot.slane %v425_v5, 4  ;;  %v434_v14 = vshll.u32 %v343_v58, 16 }
  0x2a   : > { %v440_v15 = vshrl.u32 %v344_v1, 16  ;;  %v420_v16 = vsel %vm8986_vm7, %v412_v62, %v419_v7  ;;  %v716_v17 = vsel %vm9010_vm9, %v421_v9, %v715_v4  ;;  %v433_v18 = vrot.slane %v431_v10, 7  ;;  %v725_v21 = vld [vmem:[#allocation2 + $0x3c] sm:$0xf]  ;;  %v722_v34 = vld [vmem:[#allocation2 + $0x38] sm:$0x1] }
  0x2b   : > { %v443_v19 = vshll.u32 %v344_v1, 16  ;;  %v8303_v22 = vld [vmem:[#allocation2 + $0xc] sm:$0xff]   ;;  %714 = vst.msk [vmem:[#allocation2 + $0x28] sm:$0xf] %vm280_vm0, %v420_v16  ;;  %717 = vst [vmem:[#allocation2 + $0x2c] sm:$0x1] %v716_v17  ;;  %v719_v23 = vsel %vm8993_vm8, %v428_v12, %v718_v11 }
  0x2c   : > { %v9034_v24 = vrot.slane %v440_v15, 7  ;;  %v8307_v25 = vld [vmem:[#allocation2 + $0xc] sm:$0xfe]   ;;  %v436_v26 = vor.u32 %v434_v14, %v433_v18  ;;  %720 = vst [vmem:[#allocation2 + $0x30] sm:$0xf] %v719_v23  ;;  %1790 = vrot.lane.b32.xlu0 %v8303_v22, %s8802_s9  ;;  %v438_v40 = vrot.slane %v433_v18, 4 }
  0x2d   : > { %v2464_v30 = vrot.slane %v8307_v25, 1  ;;  %v8309_v37 = vld [vmem:[#allocation2 + $0xc] sm:$0xfe]   ;;  %s8806_s13 = smov 16   ;;  %s8807_s14 = smov 28   ;;  %vm937_vm10 = vcmask 31744  }
  0x2e   : > { %v445_v28 = vor.u32 %v443_v19, %v9034_v24  ;;  %v8304_v29 = vld [vmem:[#allocation2 + $0x18] sm:$0xff]   ;;  %v437_v31 = vsel %vm8986_vm7, %v429_v13, %v436_v26  ;;  %v1568_v42 = vrot.slane %v8309_v37, 1  ;;  %v8315_v46 = vld [vmem:[#allocation2 + $0xc] sm:$0xff]   ;;  %v723_v47 = vsel %vm9010_vm9, %v438_v40, %v722_v34  ;;  %s8808_s27 = smov 48   ;;  %s8809_s28 = smov 40  }
  0x2f   : > { %v8305_v32 = vld [vmem:[#allocation2 + $0x18] sm:$0xff]   ;;  %v8308_v33 = vld [vmem:[#allocation2 + $0x14] ss:$0 sps:$4 sm:$0x11]   ;;  %721 = vst.msk [vmem:[#allocation2 + $0x34] sm:$0xf] %vm280_vm0, %v437_v31  ;;  %1792 = vrot.lane.b32.xlu1 %v8304_v29, %s8802_s9 }
  0x30   : > { %v726_v35 = vsel %vm8993_vm8, %v445_v28, %v725_v21  ;;  %2690 = vrot.lane.b32.xlu0 %v8305_v32, %s8803_s10  ;;  %v2465_v36 = vrot.slane %v8308_v33, 1  ;;  %v8310_v38 = vld [vmem:[#allocation2 + $0x14] ss:$0 sps:$4 sm:$0x11]   ;;  %v8311_v44 = vld [vmem:[#allocation2 + $0x18] sm:$0xfe]  }
  0x31   : > { %727 = vst [vmem:[#allocation2 + $0x3c] sm:$0xf] %v726_v35  ;;  %v1569_v43 = vrot.slane %v8310_v38, 1  ;;  %v8312_v45 = vld [vmem:[#allocation2 + $0x20] ss:$0 sps:$4 sm:$0x11]  }
  0x32   : > { %v8306_v39 = vld [vmem:[#allocation2 + $0x24] sm:$0xff]   ;;  %v2466_v41 = vsel %vm10658_vm3, %v2464_v30, %v2465_v36  ;;  %724 = vst [vmem:[#allocation2 + $0x38] sm:$0x1] %v723_v47  ;;  %v3364_v49 = vrot.slane %v8311_v44, 1  ;;  %v3365_v50 = vrot.slane %v8312_v45, 1  ;;  %v1144_v54 = vshrl.u32 %v8315_v46, 16 }
  0x33   : > { %2692 = vrot.lane.b32.xlu1 %v8306_v39, %s8803_s10  ;;  %v1570_v48 = vsel %vm10658_vm3, %v1568_v42, %v1569_v43  ;;  %v8313_v51 = vld [vmem:[#allocation2 + $0x18] sm:$0xfe]   ;;  %v8314_v52 = vld [vmem:[#allocation2 + $0x20] ss:$0 sps:$4 sm:$0x11]   ;;  %v1146_v59 = vshll.u32 %v8315_v46, 16 }
  0x34   : > { %2512 = vrot.lane.b32.xlu0 %v2466_v41, %s8804_s11  ;;  %v3366_v55 = vsel %vm10658_vm3, %v3364_v49, %v3365_v50  ;;  %v2467_v56 = vrot.slane %v8313_v51, 1  ;;  %v8316_v57 = vld [vmem:[#allocation2 + $0x14] ss:$0 sps:$4 sm:$0x11]   ;;  %v2468_v58 = vrot.slane %v8314_v52, 1  ;;  %v8317_v61 = vld [vmem:[#allocation2 + $0x18] sm:$0xff]  }
  0x35   : > { %v1151_v60 = vshll.u32 %v8316_v57, 16  ;;  %v1148_v63 = vrot.slane %v1146_v59, 1  ;;  %v8318_v1 = vld [vmem:[#allocation2 + $0x20] ss:$0 sps:$4 sm:$0x11]   ;;  %v2044_v3 = vshrl.u32 %v8317_v61, 16 }
  0x36   : > { %v2469_v62 = vsel %vm10658_vm3, %v2467_v56, %v2468_v58  ;;  %v2046_v4 = vshll.u32 %v8317_v61, 16  ;;  %v8319_v5 = vld [vmem:[#allocation2 + $0xc] sm:$0xff]   ;;  %v2051_v7 = vshll.u32 %v8318_v1, 16  ;;  %v8320_v8 = vld [vmem:[#allocation2 + $0x14] ss:$0 sps:$4 sm:$0x11]  }
  0x37   : > { %1615 = vrot.lane.b32.xlu1 %v1570_v48, %s8800_s30  ;;  %v1153_v2 = vrot.slane %v1151_v60, 1  ;;  %v1149_v6 = vor.u32 %v1148_v63, %v1144_v54  ;;  %v2032_v10 = vshrl.u32 %v8319_v5, 16  ;;  %v2034_v11 = vshll.u32 %v8319_v5, 16  ;;  %v8321_v12 = vld [vmem:[#allocation2 + $0x24] sm:$0xff]   ;;  %v8323_v23 = vld [vmem:[#allocation2 + $0x18] sm:$0xff]   ;;  %v9492_v53 = vld [vmem:[#allocation2 + $0xcc] sm:$0xff]  }
  0x38   : > { %3412 = vrot.lane.b32.xlu0 %v3366_v55, %s8805_s12  ;;  %v2048_v9 = vrot.slane %v2046_v4, 1  ;;  %v2053_v14 = vrot.slane %v2051_v7, 1  ;;  %v2039_v15 = vshll.u32 %v8320_v8, 16  ;;  %v8322_v18 = vld [vmem:[#allocation2 + $0x2c] ss:$0 sps:$4 sm:$0x11]  }
  0x39   : > { %v1154_v13 = vsel %vm1130_vm4, %v1149_v6, %v1153_v2  ;;  %v2036_v17 = vrot.slane %v2034_v11, 1  ;;  %v2944_v19 = vshrl.u32 %v8321_v12, 16  ;;  %v2946_v21 = vshll.u32 %v8321_v12, 16  ;;  %v8324_v30 = vld [vmem:[#allocation2 + $0x20] ss:$0 sps:$4 sm:$0x11]  }
  0x3a   : > { %v2049_v16 = vor.u32 %v2048_v9, %v2044_v3  ;;  %v2041_v22 = vrot.slane %v2039_v15, 1  ;;  %v2951_v29 = vshll.u32 %v8322_v18, 16  ;;  %v8325_v31 = vld [vmem:[#allocation2 + $0x18] sm:$0xff]   ;;  %v2932_v32 = vshrl.u32 %v8323_v23, 16  ;;  %v8329_v44 = vld [vmem:[#allocation2 + $0x24] sm:$0xff]   ;;  %v8339_v15 = vld [vmem:[#allocation2 + $0x30] sm:$0xff]  }
  0x3b   : > { %2514 = vrot.lane.b32.xlu1 %v2469_v62, %s8804_s11  ;;  %v2037_v26 = vor.u32 %v2036_v17, %v2032_v10  ;;  %v2948_v28 = vrot.slane %v2946_v21, 1  ;;  %v2934_v33 = vshll.u32 %v8323_v23, 16  ;;  %v2939_v37 = vshll.u32 %v8324_v30, 16  ;;  %v8326_v39 = vld [vmem:[#allocation2 + $0x20] ss:$0 sps:$4 sm:$0x11]  }
  0x3c   : > { %1325 = vrot.lane.b32.xlu0 %v1154_v13, %s8801_s8  ;;  %v2054_v25 = vsel %vm1130_vm4, %v2049_v16, %v2053_v14  ;;  %v2953_v36 = vrot.slane %v2951_v29, 1  ;;  %v1156_v40 = vshrl.u32 %v8325_v31, 16  ;;  %v1158_v41 = vshll.u32 %v8325_v31, 16  ;;  %v8327_v48 = vld [vmem:[#allocation2 + $0x24] sm:$0xfe]   ;;  %v8336_v21 = vld [vmem:[#allocation2 + $0x30] sm:$0xff]  }
  0x3d   : > { %v2042_v34 = vsel %vm1130_vm4, %v2037_v26, %v2041_v22  ;;  %v2949_v35 = vor.u32 %v2948_v28, %v2944_v19  ;;  %v2936_v38 = vrot.slane %v2934_v33, 1  ;;  %v2941_v43 = vrot.slane %v2939_v37, 1  ;;  %v8328_v49 = vld [vmem:[#allocation2 + $0x2c] ss:$0 sps:$4 sm:$0x11]   ;;  %v8337_v3 = vld [vmem:[#allocation2 + $0x24] sm:$0xff]  }
  0x3e   : > { %v1160_v46 = vrot.slane %v1158_v41, 1  ;;  %v1163_v47 = vshll.u32 %v8326_v39, 16  ;;  %v3367_v54 = vrot.slane %v8327_v48, 1  ;;  %v3368_v55 = vrot.slane %v8328_v49, 1  ;;  %v8331_v60 = vld [vmem:[#allocation2 + $0x18] sm:$0xfe]  }
  0x3f   : > { %2225 = vrot.lane.b32.xlu1 %v2054_v25, %s8806_s13  ;;  %v2954_v42 = vsel %vm1130_vm4, %v2949_v35, %v2953_v36  ;;  %v2937_v45 = vor.u32 %v2936_v38, %v2932_v32  ;;  %v8330_v56 = vld [vmem:[#allocation2 + $0x2c] ss:$0 sps:$4 sm:$0x11]   ;;  %v1168_v57 = vshrl.u32 %v8329_v44, 16  ;;  %v1170_v58 = vshll.u32 %v8329_v44, 16  ;;  %v8335_v17 = vld [vmem:[#allocation2 + $0x24] sm:$0xff]  }
  0x40   : > { %2223 = vrot.lane.b32.xlu0 %v2042_v34, %s8806_s13  ;;  %v1161_v51 = vor.u32 %v1160_v46, %v1156_v40  ;;  %v1165_v52 = vrot.slane %v1163_v47, 1  ;;  %v3369_v61 = vsel %vm10658_vm3, %v3367_v54, %v3368_v55  ;;  %v1175_v63 = vshll.u32 %v8330_v56, 16  ;;  %v8332_v1 = vld [vmem:[#allocation2 + $0x20] ss:$0 sps:$4 sm:$0x11]  }
  0x41   : > { %v2942_v50 = vsel %vm1130_vm4, %v2937_v45, %v2941_v43  ;;  %v1172_v62 = vrot.slane %v1170_v58, 1  ;;  %v1571_v2 = vrot.slane %v8331_v60, 1  ;;  %v1572_v6 = vrot.slane %v8332_v1, 1  ;;  %v8333_v7 = vld [vmem:[#allocation2 + $0x24] sm:$0xfe]  }
  0x42   : > { %v1166_v59 = vsel %vm1130_vm4, %v1161_v51, %v1165_v52  ;;  %v1177_v5 = vrot.slane %v1175_v63, 1  ;;  %v8334_v8 = vld [vmem:[#allocation2 + $0x2c] ss:$0 sps:$4 sm:$0x11]   ;;  %v2056_v9 = vshrl.u32 %v8337_v3, 16  ;;  %v1574_v12 = vrot.slane %v8333_v7, 1 }
  0x43   : > { %3125 = vrot.lane.b32.xlu1 %v2954_v42, %s8807_s14  ;;  %v1173_v4 = vor.u32 %v1172_v62, %v1168_v57  ;;  %v1573_v11 = vsel %vm10658_vm3, %v1571_v2, %v1572_v6  ;;  %v2058_v13 = vshll.u32 %v8337_v3, 16  ;;  %v1575_v14 = vrot.slane %v8334_v8, 1  ;;  %v345_v16 = vld [vmem:[%s8978_s29 + $0x24] sm:$0xf]  ;;  %v8343_v41 = vld [vmem:[#allocation2 + $0x30] sm:$0xfe]  }
  0x44   : > { %3123 = vrot.lane.b32.xlu0 %v2942_v50, %s8807_s14  ;;  %v8338_v22 = vld [vmem:[#allocation2 + $0x2c] ss:$0 sps:$4 sm:$0x11]   ;;  %v2068_v23 = vshrl.u32 %v8339_v15, 16  ;;  %v2070_v25 = vshll.u32 %v8339_v15, 16  ;;  %v446_v26 = vrot.slane %v9034_v24, 4 }
  0x45   : > { %v1178_v10 = vsel %vm1130_vm4, %v1173_v4, %v1177_v5  ;;  %v2060_v18 = vrot.slane %v2058_v13, 1  ;;  %v1576_v19 = vsel %vm10658_vm3, %v1574_v12, %v1575_v14  ;;  %v2063_v29 = vshll.u32 %v8338_v22, 16  ;;  %v8340_v30 = vld [vmem:[#allocation2 + $0x38] ss:$0 sps:$4 sm:$0x11]   ;;  %v8345_v50 = vld [vmem:[#allocation2 + $0x30] sm:$0xff]  }
  0x46   : > { %v2072_v31 = vrot.slane %v2070_v25, 1  ;;  %v448_v32 = vshrl.u32 %v345_v16, 16  ;;  %v2075_v34 = vshll.u32 %v8340_v30, 16  ;;  %v8341_v35 = vld [vmem:[#allocation2 + $0x24] sm:$0xfe]   ;;  %v2473_v46 = vrot.slane %v8343_v41, 1 }
  0x47   : > { %1327 = vrot.lane.b32.xlu1 %v1166_v59, %s8801_s8  ;;  %v2061_v28 = vor.u32 %v2060_v18, %v2056_v9  ;;  %v2065_v33 = vrot.slane %v2063_v29, 1  ;;  %v8342_v37 = vld [vmem:[#allocation2 + $0x2c] ss:$0 sps:$4 sm:$0x11]   ;;  %v2470_v40 = vrot.slane %v8341_v35, 1  ;;  %v451_v47 = vshll.u32 %v345_v16, 16 }
  0x48   : > { %3414 = vrot.lane.b32.xlu0 %v3369_v61, %s8805_s12  ;;  %v2073_v36 = vor.u32 %v2072_v31, %v2068_v23  ;;  %v450_v38 = vrot.slane %v448_v32, 7  ;;  %v2077_v24 = vrot.slane %v2075_v34, 1  ;;  %v2471_v42 = vrot.slane %v8342_v37, 1  ;;  %v8344_v43 = vld [vmem:[#allocation2 + $0x38] ss:$0 sps:$4 sm:$0x11]  }
  0x49   : > { %v2066_v39 = vsel %vm1130_vm4, %v2061_v28, %v2065_v33  ;;  %v729_v44 = vld [vmem:[#allocation2 + $0x44] sm:$0x1]  ;;  %v2474_v49 = vrot.slane %v8344_v43, 1  ;;  %v8347_v51 = vld [vmem:[#allocation2 + $0x30] sm:$0xff]   ;;  %v346_v59 = vld [vmem:[%s8978_s29 + $0x28] sm:$0xf] }
  0x4a   : > { %v2078_v45 = vsel %vm1130_vm4, %v2073_v36, %v2077_v24  ;;  %v2472_v48 = vsel %vm10658_vm3, %v2470_v40, %v2471_v42  ;;  %v453_v52 = vor.u32 %v451_v47, %v450_v38  ;;  %v8348_v54 = vld [vmem:[#allocation2 + $0x38] ss:$0 sps:$4 sm:$0x11]   ;;  %v455_v55 = vrot.slane %v450_v38, 4  ;;  %v8353_v63 = vld [vmem:[#allocation2 + $0x30] sm:$0xff]  }
  0x4b   : > { %1329 = vrot.lane.b32.xlu1 %v1178_v10, %s8801_s8  ;;  %v2475_v56 = vsel %vm10658_vm3, %v2473_v46, %v2474_v49  ;;  %v2956_v57 = vshrl.u32 %v8347_v51, 16  ;;  %v2958_v58 = vshll.u32 %v8347_v51, 16  ;;  %v2963_v61 = vshll.u32 %v8348_v54, 16  ;;  %v8351_v2 = vld [vmem:[#allocation2 + $0x30] sm:$0xfe]   ;;  %v8401_v46 = vld [vmem:[#allocation2] sm:$0xff]  }
  0x4c   : > { %1617 = vrot.lane.b32.xlu0 %v1573_v11, %s8800_s30  ;;  %v454_v60 = vsel %vm8986_vm7, %v446_v26, %v453_v52  ;;  %v730_v62 = vsel %vm9010_vm9, %v455_v55, %v729_v44  ;;  %v8352_v3 = vld [vmem:[#allocation2 + $0x38] ss:$0 sps:$4 sm:$0x11]   ;;  %v3370_v6 = vrot.slane %v8351_v2, 1  ;;  %v1182_v8 = vshll.u32 %v8353_v63, 16  ;;  %938 = vst.msk [vmem:[#allocation3] sm:$0xff] %vm937_vm10, %v8401_v46 }
  0x4d   : > { %728 = vst.msk [vmem:[#allocation2 + $0x40] sm:$0xf] %vm280_vm0, %v454_v60  ;;  %v2960_v1 = vrot.slane %v2958_v58, 1  ;;  %731 = vst [vmem:[#allocation2 + $0x44] sm:$0x1] %v730_v62  ;;  %v2965_v4 = vrot.slane %v2963_v61, 1 }
  0x4e   : > { %v3371_v7 = vrot.slane %v8352_v3, 1  ;;  %v9096_v9 = vld [vmem:[%s8978_s29 + $0x2c] sm:$0xf]  ;;  %v8354_v10 = vld [vmem:[#allocation2 + $0x38] ss:$0 sps:$4 sm:$0x11]  }
  0x4f   : > { %1619 = vrot.lane.b32.xlu1 %v1576_v19, %s8800_s30  ;;  %v2961_v5 = vor.u32 %v2960_v1, %v2956_v57  ;;  %v457_v11 = vshrl.u32 %v346_v59, 16  ;;  %v460_v13 = vshll.u32 %v346_v59, 16  ;;  %v1180_v15 = vshrl.u32 %v8353_v63, 16  ;;  %v732_v18 = vld [vmem:[#allocation2 + $0x48] sm:$0xf] }
  0x50   : > { %1794 = vrot.lane.b32.xlu0 %v8335_v17, %s8802_s9  ;;  %v1184_v16 = vrot.slane %v1182_v8, 1  ;;  %v1187_v17 = vshll.u32 %v8354_v10, 16  ;;  %v8359_v22 = vld [vmem:[#allocation2 + $0x30] sm:$0xfe]   ;;  %v465_v26 = vshrl.u32 %v9096_v9, 16  ;;  %v468_v3 = vshll.u32 %v9096_v9, 16 }
  0x51   : > { %v2966_v12 = vsel %vm1130_vm4, %v2961_v5, %v2965_v4  ;;  %v9099_v14 = vrot.slane %v457_v11, 7  ;;  %v8360_v23 = vld [vmem:[#allocation2 + $0x38] ss:$0 sps:$4 sm:$0x11]   ;;  %v1577_v44 = vrot.slane %v8359_v22, 1  ;;  %vm1371_vm11 = vcmask 64544  }
  0x52   : > { %v1185_v24 = vor.u32 %v1184_v16, %v1180_v15  ;;  %v1189_v42 = vrot.slane %v1187_v17, 1  ;;  %v467_v61 = vrot.slane %v465_v26, 7  ;;  %v736_v63 = vld [vmem:[#allocation2 + $0x50] sm:$0x1]  ;;  %vm1661_vm12 = vcmask 97344  }
  0x53   : > { %1796 = vrot.lane.b32.xlu1 %v8336_v21, %s8802_s9  ;;  %v3372_v21 = vsel %vm10658_vm3, %v3370_v6, %v3371_v7  ;;  %v462_v25 = vor.u32 %v460_v13, %v9099_v14  ;;  %v463_v60 = vrot.slane %v9099_v14, 4  ;;  %v348_v22 = vld [vmem:[%s8978_s29 + $0x30] sm:$0xf]  ;;  %vm1838_vm13 = vcmask 130144  }
  0x54   : > { %2227 = vrot.lane.b32.xlu0 %v2066_v39, %s8806_s13  ;;  %v8346_v19 = vld [vmem:[#allocation2 + $0x3c] sm:$0xff]   ;;  %v8350_v29 = vld [vmem:[#allocation2 + $0x44] ss:$0 sps:$4 sm:$0x11]   ;;  %v1190_v1 = vsel %vm1130_vm4, %v1185_v24, %v1189_v42  ;;  %v470_v6 = vor.u32 %v468_v3, %v467_v61  ;;  %v472_v8 = vrot.slane %v467_v61, 4  ;;  %v477_v26 = vshll.u32 %v348_v22, 16 }
  0x55   : > { %v8349_v28 = vld [vmem:[#allocation2 + $0x3c] sm:$0xff]   ;;  %v733_v31 = vsel %vm8993_vm8, %v462_v25, %v732_v18  ;;  %v2975_v34 = vshll.u32 %v8350_v29, 16  ;;  %v8356_v35 = vld [vmem:[#allocation2 + $0x44] ss:$0 sps:$4 sm:$0x11]   ;;  %v474_v25 = vshrl.u32 %v348_v22, 16 }
  0x56   : > { %v8355_v30 = vld [vmem:[#allocation2 + $0x3c] sm:$0xfe]   ;;  %v2968_v32 = vshrl.u32 %v8349_v28, 16  ;;  %v2970_v33 = vshll.u32 %v8349_v28, 16  ;;  %734 = vst [vmem:[#allocation2 + $0x48] sm:$0xf] %v733_v31  ;;  %v471_v9 = vsel %vm8986_vm7, %v463_v60, %v470_v6  ;;  %v737_v14 = vsel %vm9010_vm9, %v472_v8, %v736_v63 }
  0x57   : > { %2229 = vrot.lane.b32.xlu1 %v2078_v45, %s8806_s13  ;;  %v3373_v36 = vrot.slane %v8355_v30, 1  ;;  %v8357_v37 = vld [vmem:[#allocation2 + $0x3c] sm:$0xff]   ;;  %v2977_v39 = vrot.slane %v2975_v34, 1  ;;  %v3374_v40 = vrot.slane %v8356_v35, 1  ;;  %v1578_v45 = vrot.slane %v8360_v23, 1 }
  0x58   : > { %2516 = vrot.lane.b32.xlu0 %v2472_v48, %s8804_s11  ;;  %v2972_v38 = vrot.slane %v2970_v33, 1  ;;  %v8358_v41 = vld [vmem:[#allocation2 + $0x44] ss:$0 sps:$4 sm:$0x11]   ;;  %v1194_v43 = vshll.u32 %v8357_v37, 16  ;;  %v1192_v49 = vshrl.u32 %v8357_v37, 16 }
  0x59   : > { %v3375_v48 = vsel %vm10658_vm3, %v3373_v36, %v3374_v40  ;;  %v8361_v52 = vld [vmem:[#allocation2 + $0x3c] sm:$0xfe]   ;;  %v8362_v54 = vld [vmem:[#allocation2 + $0x44] ss:$0 sps:$4 sm:$0x11]   ;;  %v1579_v57 = vsel %vm10658_vm3, %v1577_v44, %v1578_v45  ;;  %vm2271_vm14 = vcmask 162944  }
  0x5a   : > { %v2973_v47 = vor.u32 %v2972_v38, %v2968_v32  ;;  %v1196_v51 = vrot.slane %v1194_v43, 1  ;;  %v1580_v58 = vrot.slane %v8361_v52, 1  ;;  %v8363_v59 = vld [vmem:[#allocation2 + $0x3c] sm:$0xff]   ;;  %v8366_v4 = vld [vmem:[#allocation2 + $0x44] ss:$0 sps:$4 sm:$0x11]  }
  0x5b   : > { %2518 = vrot.lane.b32.xlu1 %v2475_v56, %s8804_s11  ;;  %v8365_v62 = vld [vmem:[#allocation2 + $0x3c] sm:$0xff]   ;;  %v1581_v10 = vrot.slane %v8362_v54, 1  ;;  %v2087_v11 = vshll.u32 %v8366_v4, 16  ;;  %v8370_v16 = vld [vmem:[#allocation2 + $0x44] ss:$0 sps:$4 sm:$0x11]  }
  0x5c   : > { %2694 = vrot.lane.b32.xlu0 %v8345_v50, %s8803_s10  ;;  %v1199_v50 = vshll.u32 %v8358_v41, 16  ;;  %v2978_v55 = vsel %vm1130_vm4, %v2973_v47, %v2977_v39  ;;  %v1197_v2 = vor.u32 %v1196_v51, %v1192_v49  ;;  %v2080_v5 = vshrl.u32 %v8365_v62, 16  ;;  %v8369_v15 = vld [vmem:[#allocation2 + $0x3c] sm:$0xfe]   ;;  %735 = vst.msk [vmem:[#allocation2 + $0x4c] sm:$0xf] %vm280_vm0, %v471_v9 }
  0x5d   : > { %v2082_v7 = vshll.u32 %v8365_v62, 16  ;;  %v2089_v17 = vrot.slane %v2087_v11, 1  ;;  %738 = vst [vmem:[#allocation2 + $0x50] sm:$0x1] %v737_v14  ;;  %v349_v23 = vld [vmem:[%s8978_s29 + $0x34] sm:$0xf]  ;;  %v1582_v30 = vsel %vm10658_vm3, %v1580_v58, %v1581_v10 }
  0x5e   : > { %v1201_v56 = vrot.slane %v1199_v50, 1  ;;  %v482_v28 = vshrl.u32 %v349_v23, 16  ;;  %v485_v29 = vshll.u32 %v349_v23, 16  ;;  %v476_v32 = vrot.slane %v474_v25, 7  ;;  %v739_v35 = vld [vmem:[#allocation2 + $0x54] sm:$0xf] }
  0x5f   : > { %2696 = vrot.lane.b32.xlu1 %v8346_v19, %s8803_s10  ;;  %v2084_v13 = vrot.slane %v2082_v7, 1  ;;  %v2476_v19 = vrot.slane %v8369_v15, 1  ;;  %v743_v36 = vld [vmem:[#allocation2 + $0x5c] sm:$0x1]  ;;  %v9136_v40 = vld [vmem:[%s8978_s29 + $0x38] sm:$0xf] }
  0x60   : > { %3127 = vrot.lane.b32.xlu0 %v2966_v12, %s8807_s14  ;;  %v1202_v12 = vsel %vm1130_vm4, %v1197_v2, %v1201_v56  ;;  %v484_v33 = vrot.slane %v482_v28, 7  ;;  %v479_v37 = vor.u32 %v477_v26, %v476_v32  ;;  %v480_v38 = vrot.slane %v476_v32, 4 }
  0x61   : > { %v2085_v18 = vor.u32 %v2084_v13, %v2080_v5  ;;  %v491_v54 = vshrl.u32 %v9136_v40, 16  ;;  %vm2560_vm15 = vcmask 195744   ;;  %vm2738_vm1 = vcmask 228544  }
  0x62   : > { %v487_v39 = vor.u32 %v485_v29, %v484_v33  ;;  %v489_v24 = vrot.slane %v484_v33, 4  ;;  %v740_v45 = vsel %vm8993_vm8, %v479_v37, %v739_v35  ;;  %vm3171_vm5 = vcmask 261344  }
  0x63   : > { %3129 = vrot.lane.b32.xlu1 %v2978_v55, %s8807_s14  ;;  %v2090_v31 = vsel %vm1130_vm4, %v2085_v18, %v2089_v17  ;;  %v8364_v41 = vld [vmem:[#allocation2 + $0x48] sm:$0xff]   ;;  %741 = vst [vmem:[#allocation2 + $0x54] sm:$0xf] %v740_v45  ;;  %v493_v37 = vrot.slane %v491_v54, 7  ;;  %vm10657_vm2 = vcmask 294144   ;;  %vm3562_vm6 = vcmask 1041408  }
  0x64   : > { %3416 = vrot.lane.b32.xlu0 %v3372_v21, %s8805_s12  ;;  %v2477_v21 = vrot.slane %v8370_v16, 1  ;;  %v8367_v42 = vld [vmem:[#allocation2 + $0x48] sm:$0xff]   ;;  %v8368_v43 = vld [vmem:[#allocation2 + $0x50] ss:$0 sps:$4 sm:$0x11]   ;;  %v488_v44 = vsel %vm8986_vm7, %v480_v38, %v487_v39  ;;  %v744_v46 = vsel %vm9010_vm9, %v489_v24, %v743_v36 }
  0x65   : > { %v8371_v47 = vld [vmem:[#allocation2 + $0x48] sm:$0xfe]   ;;  %742 = vst.msk [vmem:[#allocation2 + $0x58] sm:$0xf] %vm280_vm0, %v488_v44  ;;  %745 = vst [vmem:[#allocation2 + $0x5c] sm:$0x1] %v744_v46 }
  0x66   : > { %v2478_v34 = vsel %vm10658_vm3, %v2476_v19, %v2477_v21  ;;  %v2094_v49 = vshll.u32 %v8367_v42, 16  ;;  %v2099_v50 = vshll.u32 %v8368_v43, 16  ;;  %v8372_v51 = vld [vmem:[#allocation2 + $0x50] ss:$0 sps:$4 sm:$0x11]   ;;  %v8373_v52 = vld [vmem:[#allocation2 + $0x48] sm:$0xff]  }
  0x67   : > { %1331 = vrot.lane.b32.xlu1 %v1190_v1, %s8801_s8  ;;  %v8375_v58 = vld [vmem:[#allocation2 + $0x48] sm:$0xff]   ;;  %v8376_v60 = vld [vmem:[#allocation2 + $0x50] ss:$0 sps:$4 sm:$0x11]   ;;  %v746_v43 = vld [vmem:[#allocation2 + $0x60] sm:$0xf] }
  0x68   : > { %3418 = vrot.lane.b32.xlu0 %v3375_v48, %s8805_s12  ;;  %v2092_v48 = vshrl.u32 %v8367_v42, 16  ;;  %v2096_v55 = vrot.slane %v2094_v49, 1  ;;  %v2101_v56 = vrot.slane %v2099_v50, 1  ;;  %v2980_v62 = vshrl.u32 %v8375_v58, 16  ;;  %v8379_v1 = vld [vmem:[#allocation2 + $0x48] sm:$0xfe]  }
  0x69   : > { %v2982_v63 = vshll.u32 %v8375_v58, 16  ;;  %v2987_v2 = vshll.u32 %v8376_v60, 16  ;;  %v8380_v3 = vld [vmem:[#allocation2 + $0x50] ss:$0 sps:$4 sm:$0x11]   ;;  %v8381_v6 = vld [vmem:[#allocation2 + $0x48] sm:$0xff]  }
  0x6a   : > { %v2097_v61 = vor.u32 %v2096_v55, %v2092_v48  ;;  %v3376_v9 = vrot.slane %v8379_v1, 1  ;;  %v3377_v15 = vrot.slane %v8380_v3, 1  ;;  %v1204_v16 = vshrl.u32 %v8381_v6, 16  ;;  %v8382_v19 = vld [vmem:[#allocation2 + $0x50] ss:$0 sps:$4 sm:$0x11]  }
  0x6b   : > { %1333 = vrot.lane.b32.xlu1 %v1202_v12, %s8801_s8  ;;  %v2984_v5 = vrot.slane %v2982_v63, 1  ;;  %v2989_v7 = vrot.slane %v2987_v2, 1  ;;  %v1206_v21 = vshll.u32 %v8381_v6, 16  ;;  %v351_v42 = vld [vmem:[%s8978_s29 + $0x3c] sm:$0xf]  ;;  %v494_v46 = vshll.u32 %v9136_v40, 16 }
  0x6c   : > { %1621 = vrot.lane.b32.xlu0 %v1579_v57, %s8800_s30  ;;  %v2479_v57 = vrot.slane %v8371_v47, 1  ;;  %v2102_v4 = vsel %vm1130_vm4, %v2097_v61, %v2101_v56  ;;  %v8377_v8 = vld [vmem:[#allocation2 + $0x54] sm:$0xff]   ;;  %v8378_v12 = vld [vmem:[#allocation2 + $0x5c] ss:$0 sps:$4 sm:$0x11]   ;;  %v3378_v28 = vsel %vm10658_vm3, %v3376_v9, %v3377_v15  ;;  %v497_v58 = vrot.slane %v493_v37, 4 }
  0x6d   : > { %v2985_v11 = vor.u32 %v2984_v5, %v2980_v62  ;;  %v2992_v13 = vshrl.u32 %v8377_v8, 16  ;;  %v2994_v14 = vshll.u32 %v8377_v8, 16  ;;  %v2999_v18 = vshll.u32 %v8378_v12, 16  ;;  %v8385_v22 = vld [vmem:[#allocation2 + $0x54] sm:$0xff]   ;;  %v8387_v48 = vld [vmem:[#allocation2 + $0x48] sm:$0xfe]  }
  0x6e   : > { %v8374_v23 = vld [vmem:[#allocation2 + $0x54] sm:$0xff]   ;;  %v1208_v29 = vrot.slane %v1206_v21, 1  ;;  %v8384_v33 = vld [vmem:[#allocation2 + $0x5c] ss:$0 sps:$4 sm:$0x11]   ;;  %v1216_v36 = vshrl.u32 %v8385_v22, 16 }
  0x6f   : > { %1623 = vrot.lane.b32.xlu1 %v1582_v30, %s8800_s30  ;;  %v2990_v17 = vsel %vm1130_vm4, %v2985_v11, %v2989_v7  ;;  %v2996_v25 = vrot.slane %v2994_v14, 1  ;;  %v3001_v26 = vrot.slane %v2999_v18, 1  ;;  %v1211_v30 = vshll.u32 %v8382_v19, 16  ;;  %v8383_v32 = vld [vmem:[#allocation2 + $0x54] sm:$0xfe]  }
  0x70   : > { %1798 = vrot.lane.b32.xlu0 %v8363_v59, %s8802_s9  ;;  %v2480_v59 = vrot.slane %v8372_v51, 1  ;;  %v1209_v35 = vor.u32 %v1208_v29, %v1204_v16  ;;  %v3379_v39 = vrot.slane %v8383_v32, 1  ;;  %v3380_v24 = vrot.slane %v8384_v33, 1  ;;  %v8386_v45 = vld [vmem:[#allocation2 + $0x5c] ss:$0 sps:$4 sm:$0x11]  }
  0x71   : > { %v1213_v38 = vrot.slane %v1211_v30, 1  ;;  %v1223_v49 = vshll.u32 %v8386_v45, 16  ;;  %v8388_v50 = vld [vmem:[#allocation2 + $0x50] ss:$0 sps:$4 sm:$0x11]   ;;  %v496_v51 = vor.u32 %v494_v46, %v493_v37  ;;  %v1583_v56 = vrot.slane %v8387_v48, 1 }
  0x72   : > { %v2481_v10 = vsel %vm10658_vm3, %v2479_v57, %v2480_v59  ;;  %v3381_v47 = vsel %vm10658_vm3, %v3379_v39, %v3380_v24  ;;  %v8389_v57 = vld [vmem:[#allocation2 + $0x54] sm:$0xfe]   ;;  %v1584_v40 = vrot.slane %v8388_v50, 1  ;;  %v8390_v61 = vld [vmem:[#allocation2 + $0x5c] ss:$0 sps:$4 sm:$0x11]  }
  0x73   : > { %1800 = vrot.lane.b32.xlu1 %v8364_v41, %s8802_s9  ;;  %v1214_v54 = vsel %vm1130_vm4, %v1209_v35, %v1213_v38  ;;  %v1225_v60 = vrot.slane %v1223_v49, 1  ;;  %v499_v62 = vshrl.u32 %v351_v42, 16  ;;  %v747_v63 = vsel %vm8993_vm8, %v496_v51, %v746_v43  ;;  %v8391_v3 = vld [vmem:[#allocation2 + $0x54] sm:$0xff]   ;;  %v750_v5 = vld [vmem:[#allocation2 + $0x68] sm:$0x1] }
  0x74   : > { %2231 = vrot.lane.b32.xlu0 %v2090_v31, %s8806_s13  ;;  %v2997_v31 = vor.u32 %v2996_v25, %v2992_v13  ;;  %v1586_v2 = vrot.slane %v8389_v57, 1  ;;  %748 = vst [vmem:[#allocation2 + $0x60] sm:$0xf] %v747_v63  ;;  %v1585_v6 = vsel %vm10658_vm3, %v1583_v56, %v1584_v40  ;;  %v1587_v7 = vrot.slane %v8390_v61, 1  ;;  %v8397_v16 = vld [vmem:[#allocation2 + $0x54] sm:$0xfe]  }
  0x75   : > { %v501_v8 = vrot.slane %v499_v62, 7  ;;  %v8398_v21 = vld [vmem:[#allocation2 + $0x5c] ss:$0 sps:$4 sm:$0x11]   ;;  %v352_v25 = vld [vmem:[%s8978_s29 + $0x40] sm:$0xf] }
  0x76   : > { %v3002_v44 = vsel %vm1130_vm4, %v2997_v31, %v3001_v26  ;;  %v353_v26 = vld [vmem:[%s8978_s29 + $0x44] sm:$0xf]  ;;  %v2483_v30 = vrot.slane %v8398_v21, 1  ;;  %v508_v31 = vshrl.u32 %v352_v25, 16  ;;  %v511_v32 = vshll.u32 %v352_v25, 16 }
  0x77   : > { %2233 = vrot.lane.b32.xlu1 %v2102_v4, %s8806_s13  ;;  %v502_v4 = vshll.u32 %v351_v42, 16  ;;  %v506_v14 = vrot.slane %v501_v8, 4  ;;  %v516_v33 = vshrl.u32 %v353_v26, 16  ;;  %v753_v37 = vld [vmem:[#allocation2 + $0x6c] sm:$0xf] }
  0x78   : > { %2520 = vrot.lane.b32.xlu0 %v2478_v34, %s8804_s11  ;;  %v1218_v34 = vshll.u32 %v8385_v22, 16  ;;  %v510_v35 = vrot.slane %v508_v31, 7  ;;  %v757_v24 = vld [vmem:[#allocation2 + $0x74] sm:$0x1] }
  0x79   : > { %v504_v9 = vor.u32 %v502_v4, %v501_v8  ;;  %v751_v19 = vsel %vm9010_vm9, %v506_v14, %v750_v5  ;;  %v518_v39 = vrot.slane %v516_v33, 7 }
  0x7a   : > { %v1220_v41 = vrot.slane %v1218_v34, 1  ;;  %752 = vst [vmem:[#allocation2 + $0x68] sm:$0x1] %v751_v19  ;;  %v513_v43 = vor.u32 %v511_v32, %v510_v35 }
  0x7b   : > { %2522 = vrot.lane.b32.xlu1 %v2481_v10, %s8804_s11  ;;  %v8394_v10 = vld [vmem:[#allocation2 + $0x5c] ss:$0 sps:$4 sm:$0x11]  }
  0x7c   : > { %2698 = vrot.lane.b32.xlu0 %v8373_v52, %s8803_s10  ;;  %v8393_v52 = vld [vmem:[#allocation2 + $0x54] sm:$0xff]   ;;  %v1221_v55 = vor.u32 %v1220_v41, %v1216_v36  ;;  %v2111_v15 = vshll.u32 %v8394_v10, 16  ;;  %v519_v36 = vshll.u32 %v353_v26, 16  ;;  %v8420_v41 = vld [vmem:[#allocation2 + $0xc] sm:$0xff]   ;;  %v754_v49 = vsel %vm8993_vm8, %v513_v43, %v753_v37 }
  0x7d   : > { %v2104_v11 = vshrl.u32 %v8393_v52, 16  ;;  %v2106_v13 = vshll.u32 %v8393_v52, 16  ;;  %939 = vst.msk [vmem:[#allocation3 + $0x8] sm:$0xff] %vm937_vm10, %v8420_v41  ;;  %755 = vst [vmem:[#allocation2 + $0x6c] sm:$0xf] %v754_v49 }
  0x7e   : > { %v1226_v12 = vsel %vm1130_vm4, %v1221_v55, %v1225_v60  ;;  %v2113_v22 = vrot.slane %v2111_v15, 1  ;;  %v521_v45 = vor.u32 %v519_v36, %v518_v39 }
  0x7f   : > { %2700 = vrot.lane.b32.xlu1 %v8374_v23, %s8803_s10  ;;  %v2108_v18 = vrot.slane %v2106_v13, 1  ;;  %v2482_v23 = vrot.slane %v8397_v16, 1 }
  0x80   : > { %3131 = vrot.lane.b32.xlu0 %v2990_v17, %s8807_s14  ;;  %v505_v17 = vsel %vm8986_vm7, %v497_v58, %v504_v9 }
  0x81   : > { %749 = vst.msk [vmem:[#allocation2 + $0x64] sm:$0xf] %vm280_vm0, %v505_v17  ;;  %v2109_v29 = vor.u32 %v2108_v18, %v2104_v11  ;;  %v2484_v42 = vsel %vm10658_vm3, %v2482_v23, %v2483_v30  ;;  %v8396_v52 = vld [vmem:[#allocation2 + $0x68] ss:$0 sps:$4 sm:$0x11]  }
  0x82   : > { %v8400_v60 = vld [vmem:[#allocation2 + $0x68] ss:$0 sps:$4 sm:$0x11]  }
  0x83   : > { %3133 = vrot.lane.b32.xlu1 %v3002_v44, %s8807_s14  ;;  %v2114_v34 = vsel %vm1130_vm4, %v2109_v29, %v2113_v22  ;;  %v514_v44 = vrot.slane %v510_v35, 4  ;;  %v8405_v5 = vld [vmem:[#allocation2 + $0x68] ss:$0 sps:$4 sm:$0x11]  }
  0x84   : > { %3420 = vrot.lane.b32.xlu0 %v3378_v28, %s8805_s12  ;;  %v1588_v28 = vsel %vm10658_vm3, %v1586_v2, %v1587_v7  ;;  %v3011_v9 = vshll.u32 %v8405_v5, 16  ;;  %v8409_v26 = vld [vmem:[#allocation2 + $0x68] ss:$0 sps:$4 sm:$0x11]  }
  0x85   : > { %v8411_v35 = vld [vmem:[#allocation2 + $0x68] ss:$0 sps:$4 sm:$0x11]  }
  0x86   : > { %v3013_v17 = vrot.slane %v3011_v9, 1  ;;  %v1235_v41 = vshll.u32 %v8411_v35, 16 }
  0x87   : > { %1335 = vrot.lane.b32.xlu1 %v1214_v54, %s8801_s8  ;;  %v522_v54 = vsel %vm8986_vm7, %v514_v44, %v521_v45 }
  0x88   : > { %3422 = vrot.lane.b32.xlu0 %v3381_v47, %s8805_s12  ;;  %v523_v47 = vrot.slane %v518_v39, 4  ;;  %v8392_v48 = vld [vmem:[#allocation2 + $0x60] sm:$0xff]   ;;  %756 = vst.msk [vmem:[#allocation2 + $0x70] sm:$0xf] %vm280_vm0, %v522_v54  ;;  %v1237_v49 = vrot.slane %v1235_v41, 1 }
  0x89   : > { %v8395_v51 = vld [vmem:[#allocation2 + $0x60] sm:$0xff]  }
  0x8a   : > { %v758_v55 = vsel %vm9010_vm9, %v523_v47, %v757_v24  ;;  %v8399_v56 = vld [vmem:[#allocation2 + $0x60] sm:$0xfe]   ;;  %v2116_v57 = vshrl.u32 %v8395_v51, 16  ;;  %v2118_v58 = vshll.u32 %v8395_v51, 16 }
  0x8b   : > { %1337 = vrot.lane.b32.xlu1 %v1226_v12, %s8801_s8  ;;  %759 = vst [vmem:[#allocation2 + $0x74] sm:$0x1] %v758_v55  ;;  %v2485_v61 = vrot.slane %v8399_v56, 1  ;;  %v8402_v62 = vld [vmem:[#allocation2 + $0x60] sm:$0xff]  }
  0x8c   : > { %1625 = vrot.lane.b32.xlu0 %v1585_v6, %s8800_s30  ;;  %v8404_v4 = vld [vmem:[#allocation2 + $0x60] sm:$0xff]  }
  0x8d   : > { %v8410_v6 = vld [vmem:[#allocation2 + $0x60] sm:$0xff]   ;;  %v3004_v8 = vshrl.u32 %v8404_v4, 16  ;;  %v3006_v10 = vshll.u32 %v8404_v4, 16 }
  0x8e   : > { %v8408_v11 = vld [vmem:[#allocation2 + $0x60] sm:$0xfe]   ;;  %v1228_v15 = vshrl.u32 %v8410_v6, 16  ;;  %v1230_v21 = vshll.u32 %v8410_v6, 16 }
  0x8f   : > { %1627 = vrot.lane.b32.xlu1 %v1588_v28, %s8800_s30  ;;  %v3008_v14 = vrot.slane %v3006_v10, 1  ;;  %v8406_v18 = vld [vmem:[#allocation2 + $0x6c] sm:$0xff]   ;;  %v3382_v19 = vrot.slane %v8408_v11, 1 }
  0x90   : > { %1802 = vrot.lane.b32.xlu0 %v8391_v3, %s8802_s9  ;;  %v2486_v3 = vrot.slane %v8400_v60, 1  ;;  %v8403_v28 = vld [vmem:[#allocation2 + $0x6c] sm:$0xff]   ;;  %v3016_v29 = vshrl.u32 %v8406_v18, 16  ;;  %v3018_v30 = vshll.u32 %v8406_v18, 16  ;;  %v1232_v36 = vrot.slane %v1230_v21, 1 }
  0x91   : > { %v3009_v23 = vor.u32 %v3008_v14, %v3004_v8  ;;  %v8418_v5 = vld [vmem:[#allocation2 + $0x6c] sm:$0xfe]  }
  0x92   : > { %v2487_v22 = vsel %vm10658_vm3, %v2485_v61, %v2486_v3  ;;  %v8407_v25 = vld [vmem:[#allocation2 + $0x74] ss:$0 sps:$4 sm:$0x11]   ;;  %v3020_v37 = vrot.slane %v3018_v30, 1  ;;  %v8421_v9 = vld [vmem:[#allocation2 + $0x6c] sm:$0xff]  }
  0x93   : > { %1804 = vrot.lane.b32.xlu1 %v8392_v48, %s8802_s9  ;;  %v3014_v32 = vsel %vm1130_vm4, %v3009_v23, %v3013_v17  ;;  %v3023_v33 = vshll.u32 %v8407_v25, 16  ;;  %v8413_v45 = vld [vmem:[#allocation2 + $0x74] ss:$0 sps:$4 sm:$0x11]   ;;  %v355_v17 = vld [vmem:[%s8978_s29 + $0x4c] sm:$0xf] }
  0x94   : > { %2235 = vrot.lane.b32.xlu0 %v2114_v34, %s8806_s13  ;;  %v3383_v34 = vrot.slane %v8409_v26, 1  ;;  %v3021_v44 = vor.u32 %v3020_v37, %v3016_v29  ;;  %v3386_v51 = vrot.slane %v8413_v45, 1  ;;  %v8419_v10 = vld [vmem:[#allocation2 + $0x74] ss:$0 sps:$4 sm:$0x11]   ;;  %v533_v21 = vshrl.u32 %v355_v17, 16 }
  0x95   : > { %v3025_v39 = vrot.slane %v3023_v33, 1  ;;  %v8424_v30 = vld [vmem:[#allocation2 + $0x74] ss:$0 sps:$4 sm:$0x11]  }
  0x96   : > { %v3384_v24 = vsel %vm10658_vm3, %v3382_v19, %v3383_v34  ;;  %v535_v29 = vrot.slane %v533_v21, 7  ;;  %v8427_v34 = vld [vmem:[%s10648_s1] sm:$0xff]  }
  0x97   : > { %v3026_v56 = vsel %vm1130_vm4, %v3021_v44, %v3025_v39  ;;  %8196 = vmatprep.subr.bf16.mxu0 %v8427_v34 }
  0x98   : > { %v1614_v59 = vpop.permute.xlu1 %1613  ;;  %2524 = vrot.lane.b32.xlu0 %v2484_v42, %s8804_s11  ;;  %v8412_v42 = vld [vmem:[#allocation2 + $0x6c] sm:$0xfe]   ;;  %v540_v39 = vrot.slane %v535_v29, 4  ;;  %8197 = vmatpush3.bf16.msra.mxu0 %v8427_v34 }
  0x99   : > { %v1324_v1 = vpop.permute.xlu0 %1323  ;;  %v3385_v47 = vrot.slane %v8412_v42, 1 }
  0x9a   : > { %1372 = vst.msk [vmem:[#allocation3] sm:$0xff] %vm1371_vm11, %v1324_v1  ;;  %v2120_v1 = vrot.slane %v2118_v58, 1  ;;  %v8416_v58 = vld [vmem:[#allocation2 + $0x60] sm:$0xfe]  }
  0x9b   : > { %1662 = vst.msk [vmem:[#allocation3] sm:$0xff] %vm1661_vm12, %v1614_v59  ;;  %v2123_v59 = vshll.u32 %v8396_v52, 16  ;;  %v8415_v52 = vld [vmem:[#allocation2 + $0x74] ss:$0 sps:$4 sm:$0x11]  }
  0x9c   : > { %2702 = vrot.lane.b32.xlu0 %v8402_v62, %s8803_s10  ;;  %v2121_v7 = vor.u32 %v2120_v1, %v2116_v57  ;;  %v1233_v57 = vor.u32 %v1232_v36, %v1228_v15  ;;  %v1247_v61 = vshll.u32 %v8415_v52, 16  ;;  %v8417_v62 = vld [vmem:[#allocation2 + $0x68] ss:$0 sps:$4 sm:$0x11]   ;;  %v1593_v15 = vrot.slane %v8419_v10, 1 }
  0x9d   : > { %v2125_v2 = vrot.slane %v2123_v59, 1  ;;  %v3387_v59 = vsel %vm10658_vm3, %v3385_v47, %v3386_v51  ;;  %v1590_v4 = vrot.slane %v8417_v62, 1  ;;  %v8434_v52 = vld [vmem:[#allocation2 + $0x24] sm:$0xff]  }
  0x9e   : > { %v1791_v38 = vpop.permute.xlu0 %1790  ;;  %v1249_v3 = vrot.slane %v1247_v61, 1  ;;  %941 = vst.msk [vmem:[#allocation3 + $0x18] sm:$0xff] %vm937_vm10, %v8434_v52 }
  0x9f   : > { %1839 = vst.msk [vmem:[#allocation3] sm:$0xff] %vm1838_vm13, %v1791_v38  ;;  %v2126_v13 = vsel %vm1130_vm4, %v2121_v7, %v2125_v2  ;;  %v8414_v38 = vld [vmem:[#allocation2 + $0x6c] sm:$0xff]   ;;  %v1589_v2 = vrot.slane %v8416_v58, 1  ;;  %v1238_v7 = vsel %vm1130_vm4, %v1233_v57, %v1237_v49  ;;  %v357_v58 = vld [vmem:[%s8978_s29 + $0x54] sm:$0xf] }
  0xa0   : > { %2237 = vrot.lane.b32.xlu1 %v2126_v13, %s8806_s13  ;;  %3135 = vrot.lane.b32.xlu0 %v3014_v32, %s8807_s14  ;;  %v1240_v48 = vshrl.u32 %v8414_v38, 16  ;;  %v1242_v54 = vshll.u32 %v8414_v38, 16  ;;  %v354_v13 = vld [vmem:[%s8978_s29 + $0x48] sm:$0xf]  ;;  %v2135_v38 = vshll.u32 %v8424_v30, 16  ;;  %v550_v62 = vshrl.u32 %v357_v58, 16 }
  0xa1   : > { %v9188_v46 = vpop.permute.xlu1 %1792  ;;  %v1591_v11 = vsel %vm10658_vm3, %v1589_v2, %v1590_v4  ;;  %v528_v18 = vshll.u32 %v354_v13, 16 }
  0xa2   : > { %v9193_v50 = vpop.permute.xlu0 %2690  ;;  %v1244_v60 = vrot.slane %v1242_v54, 1  ;;  %v2137_v45 = vrot.slane %v2135_v38, 1  ;;  %v356_v54 = vld [vmem:[%s8978_s29 + $0x50] sm:$0xf] }
  0xa4   : > { %2526 = vrot.lane.b32.xlu1 %v2487_v22, %s8804_s11  ;;  %3424 = vrot.lane.b32.xlu0 %v3384_v24, %s8805_s12  ;;  %v1245_v8 = vor.u32 %v1244_v60, %v1240_v48  ;;  %v536_v22 = vshll.u32 %v355_v17, 16  ;;  %v8433_v24 = vld [vmem:[%s10648_s1 + $0x8] sm:$0xff]   ;;  %v8430_v48 = vld [vmem:[#allocation2 + $0x74] ss:$0 sps:$4 sm:$0x11]   ;;  %v545_v60 = vshll.u32 %v356_v54, 16 }
  0xa5   : > { %v9202_v40 = vpop.permute.xlu1 %2692  ;;  %8198 = vmatprep.subr.bf16.mxu0 %v8433_v24  ;;  %v2489_v57 = vrot.slane %v8430_v48, 1 }
  0xa6   : > { %v9204_v63 = vpop.permute.xlu0 %2512  ;;  %v1250_v23 = vsel %vm1130_vm4, %v1245_v8, %v1249_v3  ;;  %v538_v36 = vor.u32 %v536_v22, %v535_v29  ;;  %8199 = vmatpush3.bf16.msra.mxu0 %v8433_v24  ;;  %v8437_v3 = vld [vmem:[%s10648_s1 + $0x10] ss:$0 sps:$4 sm:$0x33]  }
  0xa7   : > { %8276 = vmatprep.subr.msk.bf16.mxu0 %vm3562_vm6, %v8437_v3 }
  0xa8   : > { %2704 = vrot.lane.b32.xlu1 %v8403_v28, %s8803_s10  ;;  %3426 = vrot.lane.b32.xlu0 %v3387_v59, %s8805_s12  ;;  %v542_v59 = vshrl.u32 %v356_v54, 16 }
  0xa9   : > { %v1616_v12 = vpop.permute.xlu1 %1615 }
  0xaa   : > { %v9208_v16 = vpop.permute.xlu0 %3412 }
  0xac   : > { %3137 = vrot.lane.b32.xlu1 %v3026_v56, %s8807_s14  ;;  %1629 = vrot.lane.b32.xlu0 %v1591_v11, %s8800_s30  ;;  %v771_v11 = vld [vmem:[#allocation2 + $0x8c] sm:$0x1] }
  0xad   : > { %v2515_v31 = vpop.permute.xlu1 %2514 }
  0xae   : > { %v1326_v43 = vpop.permute.xlu0 %1325 }
  0xaf   : > { %1373 = vst.msk [vmem:[#allocation3 + $0x8] sm:$0xff] %vm1371_vm11, %v1326_v43  ;;  %v8429_v43 = vld [vmem:[#allocation2 + $0x6c] sm:$0xfe]  }
  0xb0   : > { %1663 = vst.msk [vmem:[#allocation3 + $0x8] sm:$0xff] %vm1661_vm12, %v1616_v12  ;;  %v1592_v12 = vrot.slane %v8418_v5, 1  ;;  %1339 = vrot.lane.b32.xlu1 %v1238_v7, %s8801_s8  ;;  %1806 = vrot.lane.b32.xlu0 %v8421_v9, %s8802_s9  ;;  %v2488_v51 = vrot.slane %v8429_v43, 1  ;;  %v552_v5 = vrot.slane %v550_v62, 7  ;;  %v8460_v9 = vld [vmem:[#allocation2 + $0x30] sm:$0xff]  }
  0xb1   : > { %1840 = vst.msk [vmem:[#allocation3 + $0x8] sm:$0xff] %vm1838_vm13, %v9188_v46  ;;  %v2226_v55 = vpop.permute.xlu1 %2225  ;;  %v8423_v46 = vld [vmem:[#allocation2 + $0x6c] sm:$0xff]  }
  0xb2   : > { %2273 = vst.msk [vmem:[#allocation3 + $0x8] sm:$0xff] %vm2271_vm14, %v2226_v55  ;;  %v2224_v1 = vpop.permute.xlu0 %2223  ;;  %v2130_v14 = vshll.u32 %v8423_v46, 16  ;;  %v1594_v41 = vsel %vm10658_vm3, %v1592_v12, %v1593_v15  ;;  %v2490_v2 = vsel %vm10658_vm3, %v2488_v51, %v2489_v57  ;;  %v557_v17 = vrot.slane %v552_v5, 4 }
  0xb3   : > { %2562 = vst.msk [vmem:[#allocation3 + $0x8] sm:$0xff] %vm2560_vm15, %v2515_v31  ;;  %v764_v31 = vld [vmem:[#allocation2 + $0x80] sm:$0x1] }
  0xb4   : > { %2272 = vst.msk [vmem:[#allocation3] sm:$0xff] %vm2271_vm14, %v2224_v1  ;;  %v2132_v26 = vrot.slane %v2130_v14, 1  ;;  %1341 = vrot.lane.b32.xlu1 %v1250_v23, %s8801_s8  ;;  %v765_v47 = vsel %vm9010_vm9, %v540_v39, %v764_v31  ;;  %v553_v1 = vshll.u32 %v357_v58, 16  ;;  %v772_v23 = vsel %vm9010_vm9, %v557_v17, %v771_v11 }
  0xb5   : > { %2740 = vst.msk [vmem:[#allocation3 + $0x8] sm:$0xff] %vm2738_vm1, %v9202_v40  ;;  %v3126_v6 = vpop.permute.xlu1 %3125  ;;  %v2128_v40 = vshrl.u32 %v8423_v46, 16  ;;  %766 = vst [vmem:[#allocation2 + $0x80] sm:$0x1] %v765_v47  ;;  %v544_v46 = vrot.slane %v542_v59, 7 }
  0xb6   : > { %2561 = vst.msk [vmem:[#allocation3] sm:$0xff] %vm2560_vm15, %v9204_v63  ;;  %v525_v63 = vshrl.u32 %v354_v13, 16  ;;  %v3124_v19 = vpop.permute.xlu0 %3123  ;;  %v555_v13 = vor.u32 %v553_v1, %v552_v5  ;;  %773 = vst [vmem:[#allocation2 + $0x8c] sm:$0x1] %v772_v23 }
  0xb7   : > { %3173 = vst.msk [vmem:[#allocation3 + $0x8] sm:$0xff] %vm3171_vm5, %v3126_v6  ;;  %v2133_v37 = vor.u32 %v2132_v26, %v2128_v40  ;;  %v767_v6 = vld [vmem:[#allocation2 + $0x84] sm:$0xf]  ;;  %v547_v8 = vor.u32 %v545_v60, %v544_v46  ;;  %v548_v10 = vrot.slane %v544_v46, 4  ;;  %v3564_v40 = vsel %vm3562_vm6, %v8437_v3, 0 }
  0xb8   : > { %2739 = vst.msk [vmem:[#allocation3] sm:$0xff] %vm2738_vm1, %v9193_v50  ;;  %v760_v50 = vld [vmem:[#allocation2 + $0x78] sm:$0xf]  ;;  %v527_v25 = vrot.slane %v525_v63, 7  ;;  %1631 = vrot.lane.b32.xlu1 %v1594_v41, %s8800_s30  ;;  %8201 = vmatpush3.bf16.msra.mxu0 %v3564_v40  ;;  %vm10667_vm6 = vcmask 294144  }
  0xb9   : > { %3172 = vst.msk [vmem:[#allocation3] sm:$0xff] %vm3171_vm5, %v3124_v19  ;;  %v1328_v28 = vpop.permute.xlu1 %1327  ;;  %v2138_v56 = vsel %vm1130_vm4, %v2133_v37, %v2137_v45  ;;  %v768_v15 = vsel %vm8993_vm8, %v547_v8, %v767_v6  ;;  %v556_v21 = vsel %vm8986_vm7, %v548_v10, %v555_v13 }
  0xba   : > { %3461 = vst.msk [vmem:[#allocation3] sm:$0xff] %vm10657_vm2, %v9208_v16  ;;  %v530_v32 = vor.u32 %v528_v18, %v527_v25  ;;  %v531_v33 = vrot.slane %v527_v25, 4  ;;  %v3415_v35 = vpop.permute.xlu0 %3414  ;;  %v8428_v16 = vld [vmem:[#allocation2 + $0x18] sm:$0xff]   ;;  %2239 = vrot.lane.b32.xlu0 %v2138_v56, %s8806_s13  ;;  %769 = vst [vmem:[#allocation2 + $0x84] sm:$0xf] %v768_v15 }
  0xbb   : > { %3462 = vst.msk [vmem:[#allocation3 + $0x8] sm:$0xff] %vm10657_vm2, %v3415_v35  ;;  %vm3513_vm2 = vcmask 293888   ;;  %v9295_v25 = vld [vmem:[%s8978_s29 + $0x58] sm:$0xf] }
  0xbc   : > { %v761_v42 = vsel %vm8993_vm8, %v530_v32, %v760_v50  ;;  %v539_v44 = vsel %vm8986_vm7, %v531_v33, %v538_v36  ;;  %940 = vst.msk [vmem:[#allocation3 + $0x10] sm:$0xff] %vm937_vm10, %v8428_v16  ;;  %942 = vst.msk [vmem:[#allocation3 + $0x20] sm:$0xff] %vm937_vm10, %v8460_v9  ;;  %v8426_v19 = vld [vmem:[#allocation2 + $0x80] ss:$0 sps:$4 sm:$0x11]  }
  0xbd   : > { %762 = vst [vmem:[#allocation2 + $0x78] sm:$0xf] %v761_v42  ;;  %v1330_v49 = vpop.permute.xlu1 %1329  ;;  %763 = vst.msk [vmem:[#allocation2 + $0x7c] sm:$0xf] %vm280_vm0, %v539_v44  ;;  %v2147_v29 = vshll.u32 %v8426_v19, 16  ;;  %v559_v42 = vshrl.u32 %v9295_v25, 16 }
  0xbe   : > { %1374 = vst.msk [vmem:[#allocation3 + $0x10] sm:$0xff] %vm1371_vm11, %v1328_v28  ;;  %v1618_v55 = vpop.permute.xlu0 %1617  ;;  %1375 = vst.msk [vmem:[#allocation3 + $0x18] sm:$0xff] %vm1371_vm11, %v1330_v49  ;;  %2528 = vrot.lane.b32.xlu0 %v2490_v2, %s8804_s11  ;;  %v8432_v30 = vld [vmem:[#allocation2 + $0x80] ss:$0 sps:$4 sm:$0x11]  }
  0xbf   : > { %1664 = vst.msk [vmem:[#allocation3 + $0x10] sm:$0xff] %vm1661_vm12, %v1618_v55  ;;  %v2149_v35 = vrot.slane %v2147_v29, 1  ;;  %v2492_v36 = vrot.slane %v8432_v30, 1  ;;  %v8439_v16 = vld [vmem:[#allocation2 + $0x80] ss:$0 sps:$4 sm:$0x11]  }
  0xc0   : > { %770 = vst.msk [vmem:[#allocation2 + $0x88] sm:$0xf] %vm280_vm0, %v556_v21  ;;  %v3035_v47 = vshll.u32 %v8439_v16, 16  ;;  %v8441_v56 = vld [vmem:[#allocation2 + $0x8c] ss:$0 sps:$4 sm:$0x11]  }
  0xc1   : > { %v3477_v61 = vld [vmem:[#allocation3] sm:$0xff]  ;;  %v1620_v4 = vpop.permute.xlu1 %1619  ;;  %v3047_v2 = vshll.u32 %v8441_v56, 16  ;;  %v8445_v10 = vld [vmem:[#allocation2 + $0x80] ss:$0 sps:$4 sm:$0x11]  }
  0xc2   : > { %8202 = vmatprep.mubr.msk.bf16.mxu0 %vm3513_vm2, %v3477_v61  ;;  %1665 = vst.msk [vmem:[#allocation3 + $0x18] sm:$0xff] %vm1661_vm12, %v1620_v4  ;;  %v1795_v7 = vpop.permute.xlu0 %1794  ;;  %v3478_v12 = vld [vmem:[#allocation3 + $0x8] sm:$0xff]  ;;  %v3037_v55 = vrot.slane %v3035_v47, 1  ;;  %v1259_v13 = vshll.u32 %v8445_v10, 16 }
  0xc3   : > { %1841 = vst.msk [vmem:[#allocation3 + $0x10] sm:$0xff] %vm1838_vm13, %v1795_v7  ;;  %8203 = vmatmul.mubr.msk.bf16.vlgmr.msra.gmra.mrb[0].mxu0 %vm3513_vm2, %v3478_v12  ;;  %v8443_v61 = vld [vmem:[#allocation2 + $0x80] ss:$0 sps:$4 sm:$0x11]   ;;  %v3049_v8 = vrot.slane %v3047_v2, 1 }
  0xc4   : > { %v8422_v14 = vld [vmem:[#allocation2 + $0x78] sm:$0xff]   ;;  %v3389_v4 = vrot.slane %v8443_v61, 1  ;;  %v8447_v15 = vld [vmem:[#allocation2 + $0x8c] ss:$0 sps:$4 sm:$0x11]   ;;  %v1261_v19 = vrot.slane %v1259_v13, 1 }
  0xc5   : > { %v1797_v63 = vpop.permute.xlu1 %1796  ;;  %v8425_v18 = vld [vmem:[#allocation2 + $0x78] sm:$0xff]   ;;  %1808 = vrot.lane.b32.xlu1 %v8422_v14, %s8802_s9  ;;  %v8462_v13 = vld [vmem:[#allocation2 + $0x8c] ss:$0 sps:$4 sm:$0x11]  }
  0xc6   : > { %1842 = vst.msk [vmem:[#allocation3 + $0x18] sm:$0xff] %vm1838_vm13, %v1797_v63  ;;  %v2228_v22 = vpop.permute.xlu0 %2227  ;;  %v8431_v50 = vld [vmem:[#allocation2 + $0x78] sm:$0xfe]   ;;  %v2140_v26 = vshrl.u32 %v8425_v18, 16  ;;  %v2142_v28 = vshll.u32 %v8425_v18, 16 }
  0xc7   : > { %2274 = vst.msk [vmem:[#allocation3 + $0x10] sm:$0xff] %vm2271_vm14, %v2228_v22  ;;  %v2491_v31 = vrot.slane %v8431_v50, 1  ;;  %v8435_v32 = vld [vmem:[#allocation2 + $0x78] sm:$0xff]   ;;  %v8440_v48 = vld [vmem:[#allocation2 + $0x84] sm:$0xff]   ;;  %v3392_v22 = vrot.slane %v8447_v15, 1 }
  0xc8   : > { %v2144_v34 = vrot.slane %v2142_v28, 1  ;;  %v8438_v37 = vld [vmem:[#allocation2 + $0x78] sm:$0xff]   ;;  %2706 = vrot.lane.b32.xlu0 %v8435_v32, %s8803_s10  ;;  %v3040_v57 = vshrl.u32 %v8440_v48, 16  ;;  %v3042_v58 = vshll.u32 %v8440_v48, 16  ;;  %v8436_v59 = vld [vmem:[#allocation2 + $0x84] sm:$0xff]  }
  0xc9   : > { %v2230_v33 = vpop.permute.xlu1 %2229  ;;  %v3028_v24 = vshrl.u32 %v8438_v37, 16  ;;  %v3030_v41 = vshll.u32 %v8438_v37, 16  ;;  %v8444_v49 = vld [vmem:[#allocation2 + $0x78] sm:$0xff]   ;;  %v2493_v52 = vsel %vm10658_vm3, %v2491_v31, %v2492_v36  ;;  %v8448_v12 = vld [vmem:[#allocation2 + $0x84] sm:$0xff]   ;;  %v9318_v31 = vrot.slane %v559_v42, 7 }
  0xca   : > { %2275 = vst.msk [vmem:[#allocation3 + $0x18] sm:$0xff] %vm2271_vm14, %v2230_v33  ;;  %v2517_v38 = vpop.permute.xlu0 %2516  ;;  %v2145_v39 = vor.u32 %v2144_v34, %v2140_v26  ;;  %v8442_v60 = vld [vmem:[#allocation2 + $0x78] sm:$0xfe]   ;;  %v3044_v1 = vrot.slane %v3042_v58, 1  ;;  %v1252_v5 = vshrl.u32 %v8444_v49, 16  ;;  %v1254_v6 = vshll.u32 %v8444_v49, 16 }
  0xcb   : > { %2563 = vst.msk [vmem:[#allocation3 + $0x10] sm:$0xff] %vm2560_vm15, %v2517_v38  ;;  %v3032_v45 = vrot.slane %v3030_v41, 1  ;;  %v3388_v3 = vrot.slane %v8442_v60, 1  ;;  %v8446_v14 = vld [vmem:[#allocation2 + $0x84] sm:$0xfe]   ;;  %v1264_v23 = vshrl.u32 %v8448_v12, 16 }
  0xcc   : > { %v2150_v44 = vsel %vm1130_vm4, %v2145_v39, %v2149_v35  ;;  %v3045_v7 = vor.u32 %v3044_v1, %v3040_v57  ;;  %v1256_v11 = vrot.slane %v1254_v6, 1  ;;  %v3391_v21 = vrot.slane %v8446_v14, 1  ;;  %v8449_v50 = vld [vmem:[#allocation2 + $0x8c] ss:$0 sps:$4 sm:$0x11]   ;;  %v8454_v42 = vld [vmem:[#allocation2 + $0x84] sm:$0xff]  }
  0xcd   : > { %v2519_v43 = vpop.permute.xlu1 %2518  ;;  %2241 = vrot.lane.b32.xlu1 %v2150_v44, %s8806_s13  ;;  %v3033_v54 = vor.u32 %v3032_v45, %v3028_v24  ;;  %v3390_v40 = vsel %vm10658_vm3, %v3388_v3, %v3389_v4  ;;  %v1266_v26 = vshll.u32 %v8448_v12, 16  ;;  %v1271_v29 = vshll.u32 %v8449_v50, 16  ;;  %v8450_v30 = vld [vmem:[#allocation2 + $0x78] sm:$0xfe]   ;;  %v8452_v24 = vld [vmem:[#allocation2 + $0x84] sm:$0xfe]  }
  0xce   : > { %2564 = vst.msk [vmem:[#allocation3 + $0x18] sm:$0xff] %vm2560_vm15, %v2519_v43  ;;  %v2695_v51 = vpop.permute.xlu0 %2694  ;;  %v3050_v63 = vsel %vm1130_vm4, %v3045_v7, %v3049_v8  ;;  %v1257_v18 = vor.u32 %v1256_v11, %v1252_v5  ;;  %v3393_v28 = vsel %vm10658_vm3, %v3391_v21, %v3392_v22  ;;  %v8451_v33 = vld [vmem:[#allocation2 + $0x80] ss:$0 sps:$4 sm:$0x11]   ;;  %v359_v34 = vld [vmem:[%s8978_s29 + $0x5c] sm:$0xf] }
  0xcf   : > { %2741 = vst.msk [vmem:[#allocation3 + $0x10] sm:$0xff] %vm2738_vm1, %v2695_v51  ;;  %v3038_v62 = vsel %vm1130_vm4, %v3033_v54, %v3037_v55  ;;  %v1268_v32 = vrot.slane %v1266_v26, 1  ;;  %v1273_v37 = vrot.slane %v1271_v29, 1  ;;  %v1595_v38 = vrot.slane %v8450_v30, 1  ;;  %v774_v43 = vld [vmem:[#allocation2 + $0x90] sm:$0xf] }
  0xd0   : > { %3139 = vrot.lane.b32.xlu0 %v3038_v62, %s8807_s14  ;;  %v1262_v36 = vsel %vm1130_vm4, %v1257_v18, %v1261_v19  ;;  %v1596_v16 = vrot.slane %v8451_v33, 1  ;;  %v8453_v41 = vld [vmem:[#allocation2 + $0x8c] ss:$0 sps:$4 sm:$0x11]   ;;  %v562_v45 = vshll.u32 %v9295_v25, 16  ;;  %v565_v47 = vrot.slane %v9318_v31, 4 }
  0xd1   : > { %2530 = vrot.lane.b32.xlu1 %v2493_v52, %s8804_s11  ;;  %v2697_v9 = vpop.permute.xlu1 %2696  ;;  %v1269_v39 = vor.u32 %v1268_v32, %v1264_v23  ;;  %v1598_v49 = vrot.slane %v8452_v24, 1  ;;  %v1599_v51 = vrot.slane %v8453_v41, 1  ;;  %v567_v25 = vshrl.u32 %v359_v34, 16  ;;  %v8456_v57 = vld [vmem:[#allocation2 + $0x84] sm:$0xff]   ;;  %v8465_v58 = vld [vmem:[#allocation2 + $0x3c] sm:$0xff]   ;;  %v8495_v7 = vld [vmem:[#allocation2 + $0x54] sm:$0xff]  }
  0xd2   : > { %v3128_v46 = vpop.permute.xlu0 %3127  ;;  %2742 = vst.msk [vmem:[#allocation3 + $0x18] sm:$0xff] %vm2738_vm1, %v2697_v9  ;;  %v1597_v48 = vsel %vm10658_vm3, %v1595_v38, %v1596_v16  ;;  %v564_v55 = vor.u32 %v562_v45, %v9318_v31  ;;  %v570_v56 = vshll.u32 %v359_v34, 16  ;;  %v778_v60 = vld [vmem:[#allocation2 + $0x98] sm:$0x1]  ;;  %v2154_v3 = vshll.u32 %v8456_v57, 16  ;;  %v8490_v4 = vld [vmem:[#allocation2 + $0x48] sm:$0xff]  }
  0xd3   : > { %3174 = vst.msk [vmem:[#allocation3 + $0x10] sm:$0xff] %vm3171_vm5, %v3128_v46  ;;  %v1274_v54 = vsel %vm1130_vm4, %v1269_v39, %v1273_v37  ;;  %v569_v1 = vrot.slane %v567_v25, 7  ;;  %v2152_v46 = vshrl.u32 %v8456_v57, 16  ;;  %v1600_v8 = vsel %vm10658_vm3, %v1598_v49, %v1599_v51  ;;  %v8461_v9 = vld [vmem:[#allocation2 + $0x84] sm:$0xfe]  }
  0xd4   : > { %3428 = vrot.lane.b32.xlu0 %v3390_v40, %s8805_s12  ;;  %v775_v2 = vsel %vm8993_vm8, %v564_v55, %v774_v43  ;;  %943 = vst.msk [vmem:[#allocation3 + $0x28] sm:$0xff] %vm937_vm10, %v8465_v58  ;;  %v2156_v40 = vrot.slane %v2154_v3, 1  ;;  %944 = vst.msk [vmem:[#allocation3 + $0x30] sm:$0xff] %vm937_vm10, %v8490_v4  ;;  %v360_v18 = vld [vmem:[%s8978_s29 + $0x60] sm:$0xf]  ;;  %v2494_v19 = vrot.slane %v8461_v9, 1 }
  0xd5   : > { %2708 = vrot.lane.b32.xlu1 %v8436_v59, %s8803_s10  ;;  %v3130_v44 = vpop.permute.xlu1 %3129  ;;  %v8457_v59 = vld [vmem:[#allocation2 + $0x8c] ss:$0 sps:$4 sm:$0x11]   ;;  %776 = vst [vmem:[#allocation2 + $0x90] sm:$0xf] %v775_v2  ;;  %v572_v10 = vor.u32 %v570_v56, %v569_v1  ;;  %v574_v11 = vrot.slane %v569_v1, 4 }
  0xd6   : > { %v3417_v17 = vpop.permute.xlu0 %3416  ;;  %3175 = vst.msk [vmem:[#allocation3 + $0x18] sm:$0xff] %vm3171_vm5, %v3130_v44  ;;  %v2159_v5 = vshll.u32 %v8457_v59, 16  ;;  %v2495_v21 = vrot.slane %v8462_v13, 1  ;;  %v361_v22 = vld [vmem:[%s8978_s29 + $0x64] sm:$0xf]  ;;  %v576_v50 = vshrl.u32 %v360_v18, 16 }
  0xd7   : > { %3463 = vst.msk [vmem:[#allocation3 + $0x10] sm:$0xff] %vm10667_vm6, %v3417_v17  ;;  %v573_v15 = vsel %vm8986_vm7, %v565_v47, %v572_v10  ;;  %v2157_v17 = vor.u32 %v2156_v40, %v2152_v46  ;;  %v579_v23 = vshll.u32 %v360_v18, 16  ;;  %v584_v29 = vshrl.u32 %v361_v22, 16  ;;  %v781_v32 = vld [vmem:[#allocation2 + $0x9c] sm:$0xf] }
  0xd8   : > { %3430 = vrot.lane.b32.xlu0 %v3393_v28, %s8805_s12  ;;  %v2161_v12 = vrot.slane %v2159_v5, 1  ;;  %945 = vst.msk [vmem:[#allocation3 + $0x38] sm:$0xff] %vm937_vm10, %v8495_v7  ;;  %v578_v30 = vrot.slane %v576_v50, 7  ;;  %v587_v31 = vshll.u32 %v361_v22, 16  ;;  %v9373_v57 = vld [vmem:[%s8978_s29 + $0x68] sm:$0xf] }
  0xd9   : > { %3141 = vrot.lane.b32.xlu1 %v3050_v63, %s8807_s14  ;;  %v1332_v61 = vpop.permute.xlu1 %1331  ;;  %v779_v63 = vsel %vm9010_vm9, %v574_v11, %v778_v60  ;;  %777 = vst.msk [vmem:[#allocation2 + $0x94] sm:$0xf] %vm280_vm0, %v573_v15  ;;  %v586_v39 = vrot.slane %v584_v29, 7  ;;  %v593_v10 = vshrl.u32 %v9373_v57, 16 }
  0xda   : > { %v3419_v35 = vpop.permute.xlu0 %3418  ;;  %1376 = vst.msk [vmem:[#allocation3 + $0x20] sm:$0xff] %vm1371_vm11, %v1332_v61  ;;  %780 = vst [vmem:[#allocation2 + $0x98] sm:$0x1] %v779_v63  ;;  %v2162_v28 = vsel %vm1130_vm4, %v2157_v17, %v2161_v12  ;;  %v581_v37 = vor.u32 %v579_v23, %v578_v30  ;;  %v582_v38 = vrot.slane %v578_v30, 4 }
  0xdb   : > { %3464 = vst.msk [vmem:[#allocation3 + $0x18] sm:$0xff] %vm10667_vm6, %v3419_v35  ;;  %v2496_v35 = vsel %vm10658_vm3, %v2494_v19, %v2495_v21  ;;  %v589_v24 = vor.u32 %v587_v31, %v586_v39  ;;  %v591_v43 = vrot.slane %v586_v39, 4 }
  0xdc   : > { %1633 = vrot.lane.b32.xlu0 %v1597_v48, %s8800_s30  ;;  %v782_v41 = vsel %vm8993_vm8, %v581_v37, %v781_v32 }
  0xdd   : > { %1343 = vrot.lane.b32.xlu1 %v1262_v36, %s8801_s8  ;;  %v1334_v14 = vpop.permute.xlu1 %1333  ;;  %v785_v36 = vld [vmem:[#allocation2 + $0xa4] sm:$0x1]  ;;  %783 = vst [vmem:[#allocation2 + $0x9c] sm:$0xf] %v782_v41  ;;  %v590_v48 = vsel %vm8986_vm7, %v582_v38, %v589_v24 }
  0xde   : > { %v1622_v52 = vpop.permute.xlu0 %1621  ;;  %v3479_v62 = vld [vmem:[#allocation3 + $0x10] sm:$0xff]  ;;  %1377 = vst.msk [vmem:[#allocation3 + $0x28] sm:$0xff] %vm1371_vm11, %v1334_v14  ;;  %v786_v49 = vsel %vm9010_vm9, %v591_v43, %v785_v36 }
  0xdf   : > { %8206 = vmatprep.mubr.msk.bf16.mxu0 %vm3513_vm2, %v3479_v62  ;;  %1666 = vst.msk [vmem:[#allocation3 + $0x20] sm:$0xff] %vm1661_vm12, %v1622_v52  ;;  %787 = vst [vmem:[#allocation2 + $0xa4] sm:$0x1] %v786_v49  ;;  %v363_v43 = vld [vmem:[%s8978_s29 + $0x6c] sm:$0xf] }
  0xe0   : > { %1810 = vrot.lane.b32.xlu0 %v8454_v42, %s8802_s9  ;;  %v8455_v42 = vld [vmem:[#allocation2 + $0x90] sm:$0xff]   ;;  %784 = vst.msk [vmem:[#allocation2 + $0xa0] sm:$0xf] %vm280_vm0, %v590_v48 }
  0xe1   : > { %1345 = vrot.lane.b32.xlu1 %v1274_v54, %s8801_s8  ;;  %v1624_v33 = vpop.permute.xlu1 %1623  ;;  %v8458_v45 = vld [vmem:[#allocation2 + $0x90] sm:$0xff]   ;;  %v8459_v47 = vld [vmem:[#allocation2 + $0x98] ss:$0 sps:$4 sm:$0x11]  }
  0xe2   : > { %v1799_v6 = vpop.permute.xlu0 %1798  ;;  %v3480_v34 = vld [vmem:[#allocation3 + $0x18] sm:$0xff]  ;;  %1667 = vst.msk [vmem:[#allocation3 + $0x28] sm:$0xff] %vm1661_vm12, %v1624_v33  ;;  %v2164_v54 = vshrl.u32 %v8458_v45, 16  ;;  %v2166_v55 = vshll.u32 %v8458_v45, 16  ;;  %v2171_v25 = vshll.u32 %v8459_v47, 16 }
  0xe3   : > { %1843 = vst.msk [vmem:[#allocation3 + $0x20] sm:$0xff] %vm1838_vm13, %v1799_v6  ;;  %8207 = vmatmul.mubr.msk.bf16.gmra.mrb[4].mxu0 %vm3513_vm2, %v3480_v34  ;;  %v8463_v51 = vld [vmem:[#allocation2 + $0x90] sm:$0xfe]   ;;  %v8464_v56 = vld [vmem:[#allocation2 + $0x98] ss:$0 sps:$4 sm:$0x11]  }
  0xe4   : > { %2243 = vrot.lane.b32.xlu0 %v2162_v28, %s8806_s13  ;;  %v2497_v58 = vrot.slane %v8463_v51, 1  ;;  %v8466_v59 = vld [vmem:[#allocation2 + $0x90] sm:$0xff]   ;;  %v2168_v60 = vrot.slane %v2166_v55, 1  ;;  %v2173_v61 = vrot.slane %v2171_v25, 1  ;;  %v2498_v62 = vrot.slane %v8464_v56, 1 }
  0xe5   : > { %1635 = vrot.lane.b32.xlu1 %v1600_v8, %s8800_s30  ;;  %v1801_v44 = vpop.permute.xlu1 %1800  ;;  %v8468_v1 = vld [vmem:[#allocation2 + $0x90] sm:$0xff]   ;;  %v8469_v2 = vld [vmem:[#allocation2 + $0x98] ss:$0 sps:$4 sm:$0x11]  }
  0xe6   : > { %v2232_v26 = vpop.permute.xlu0 %2231  ;;  %1844 = vst.msk [vmem:[#allocation3 + $0x28] sm:$0xff] %vm1838_vm13, %v1801_v44  ;;  %v8474_v46 = vld [vmem:[#allocation2 + $0x90] sm:$0xff]   ;;  %v2169_v4 = vor.u32 %v2168_v60, %v2164_v54  ;;  %v3052_v5 = vshrl.u32 %v8468_v1, 16  ;;  %v3054_v6 = vshll.u32 %v8468_v1, 16  ;;  %v3059_v7 = vshll.u32 %v8469_v2, 16 }
  0xe7   : > { %2276 = vst.msk [vmem:[#allocation3 + $0x20] sm:$0xff] %vm2271_vm14, %v2232_v26  ;;  %v8472_v8 = vld [vmem:[#allocation2 + $0x90] sm:$0xfe]   ;;  %v1276_v12 = vshrl.u32 %v8474_v46, 16  ;;  %v8470_v13 = vld [vmem:[#allocation2 + $0x9c] sm:$0xff]   ;;  %v1278_v15 = vshll.u32 %v8474_v46, 16  ;;  %v2499_v18 = vsel %vm10658_vm3, %v2497_v58, %v2498_v62 }
  0xe8   : > { %2532 = vrot.lane.b32.xlu0 %v2496_v35, %s8804_s11  ;;  %v2174_v40 = vsel %vm1130_vm4, %v2169_v4, %v2173_v61  ;;  %v3056_v11 = vrot.slane %v3054_v6, 1  ;;  %v3061_v9 = vrot.slane %v3059_v7, 1  ;;  %v3394_v14 = vrot.slane %v8472_v8, 1  ;;  %v8471_v21 = vld [vmem:[#allocation2 + $0xa4] ss:$0 sps:$4 sm:$0x11]  }
  0xe9   : > { %1812 = vrot.lane.b32.xlu1 %v8455_v42, %s8802_s9  ;;  %v2234_v3 = vpop.permute.xlu1 %2233  ;;  %v8473_v22 = vld [vmem:[#allocation2 + $0x98] ss:$0 sps:$4 sm:$0x11]   ;;  %v8467_v50 = vld [vmem:[#allocation2 + $0x9c] sm:$0xff]   ;;  %v3064_v23 = vshrl.u32 %v8470_v13, 16  ;;  %v3066_v26 = vshll.u32 %v8470_v13, 16 }
  0xea   : > { %v2521_v16 = vpop.permute.xlu0 %2520  ;;  %2277 = vst.msk [vmem:[#allocation3 + $0x28] sm:$0xff] %vm2271_vm14, %v2234_v3  ;;  %v3057_v19 = vor.u32 %v3056_v11, %v3052_v5  ;;  %v3071_v29 = vshll.u32 %v8471_v21, 16  ;;  %v3395_v30 = vrot.slane %v8473_v22, 1  ;;  %v8475_v31 = vld [vmem:[#allocation2 + $0x98] ss:$0 sps:$4 sm:$0x11]  }
  0xeb   : > { %2565 = vst.msk [vmem:[#allocation3 + $0x20] sm:$0xff] %vm2560_vm15, %v2521_v16  ;;  %v1280_v32 = vrot.slane %v1278_v15, 1  ;;  %v3068_v33 = vrot.slane %v3066_v26, 1  ;;  %v8478_v34 = vld [vmem:[#allocation2 + $0x9c] sm:$0xff]   ;;  %v1283_v39 = vshll.u32 %v8475_v31, 16  ;;  %v596_v44 = vshll.u32 %v9373_v57, 16 }
  0xec   : > { %2710 = vrot.lane.b32.xlu0 %v8466_v59, %s8803_s10  ;;  %v3062_v28 = vsel %vm1130_vm4, %v3057_v19, %v3061_v9  ;;  %v3073_v37 = vrot.slane %v3071_v29, 1  ;;  %v3396_v38 = vsel %vm10658_vm3, %v3394_v14, %v3395_v30  ;;  %v8476_v16 = vld [vmem:[#allocation2 + $0x9c] sm:$0xfe]   ;;  %v8477_v41 = vld [vmem:[#allocation2 + $0xa4] ss:$0 sps:$4 sm:$0x11]  }
  0xed   : > { %2245 = vrot.lane.b32.xlu1 %v2174_v40, %s8806_s13  ;;  %v2523_v17 = vpop.permute.xlu1 %2522  ;;  %v3069_v24 = vor.u32 %v3068_v33, %v3064_v23  ;;  %v3397_v42 = vrot.slane %v8476_v16, 1  ;;  %v1288_v45 = vshrl.u32 %v8478_v34, 16  ;;  %v1285_v47 = vrot.slane %v1283_v39, 1  ;;  %v8479_v49 = vld [vmem:[#allocation2 + $0xa4] ss:$0 sps:$4 sm:$0x11]  }
  0xee   : > { %v2699_v52 = vpop.permute.xlu0 %2698  ;;  %2566 = vst.msk [vmem:[#allocation3 + $0x28] sm:$0xff] %vm2560_vm15, %v2523_v17  ;;  %v3398_v48 = vrot.slane %v8477_v41, 1  ;;  %v1290_v51 = vshll.u32 %v8478_v34, 16  ;;  %v1281_v25 = vor.u32 %v1280_v32, %v1276_v12  ;;  %v8480_v56 = vld [vmem:[#allocation2 + $0x90] sm:$0xfe]   ;;  %v1295_v59 = vshll.u32 %v8479_v49, 16 }
  0xef   : > { %2743 = vst.msk [vmem:[#allocation3 + $0x20] sm:$0xff] %vm2738_vm1, %v2699_v52  ;;  %v3074_v55 = vsel %vm1130_vm4, %v3069_v24, %v3073_v37  ;;  %v8481_v60 = vld [vmem:[#allocation2 + $0x98] ss:$0 sps:$4 sm:$0x11]   ;;  %v595_v61 = vrot.slane %v593_v10, 7  ;;  %v1601_v1 = vrot.slane %v8480_v56, 1 }
  0xf0   : > { %3143 = vrot.lane.b32.xlu0 %v3062_v28, %s8807_s14  ;;  %v3399_v57 = vsel %vm10658_vm3, %v3397_v42, %v3398_v48  ;;  %v1292_v58 = vrot.slane %v1290_v51, 1  ;;  %v788_v62 = vld [vmem:[#allocation2 + $0xa8] sm:$0xf]  ;;  %v601_v2 = vshrl.u32 %v363_v43, 16  ;;  %v1297_v46 = vrot.slane %v1295_v59, 1  ;;  %v8484_v14 = vld [vmem:[#allocation2 + $0x9c] sm:$0xff]  }
  0xf1   : > { %2534 = vrot.lane.b32.xlu1 %v2499_v18, %s8804_s11  ;;  %v2701_v35 = vpop.permute.xlu1 %2700  ;;  %v1602_v3 = vrot.slane %v8481_v60, 1  ;;  %v8482_v4 = vld [vmem:[#allocation2 + $0x9c] sm:$0xfe]   ;;  %v598_v5 = vor.u32 %v596_v44, %v595_v61  ;;  %v1286_v8 = vsel %vm1130_vm4, %v1281_v25, %v1285_v47  ;;  %v8483_v11 = vld [vmem:[#allocation2 + $0xa4] ss:$0 sps:$4 sm:$0x11]  }
  0xf2   : > { %v3132_v63 = vpop.permute.xlu0 %3131  ;;  %2744 = vst.msk [vmem:[#allocation3 + $0x28] sm:$0xff] %vm2738_vm1, %v2701_v35  ;;  %v1293_v40 = vor.u32 %v1292_v58, %v1288_v45  ;;  %v599_v10 = vrot.slane %v595_v61, 4  ;;  %v792_v12 = vld [vmem:[#allocation2 + $0xb0] sm:$0x1]  ;;  %v1604_v13 = vrot.slane %v8482_v4, 1  ;;  %v603_v15 = vrot.slane %v601_v2, 7 }
  0xf3   : > { %3176 = vst.msk [vmem:[#allocation3 + $0x20] sm:$0xff] %vm3171_vm5, %v3132_v63  ;;  %v1603_v9 = vsel %vm10658_vm3, %v1601_v1, %v1602_v3  ;;  %v1605_v17 = vrot.slane %v8483_v11, 1  ;;  %v604_v63 = vshll.u32 %v363_v43, 16  ;;  %v789_v18 = vsel %vm8993_vm8, %v598_v5, %v788_v62  ;;  %v8486_v19 = vld [vmem:[#allocation2 + $0x9c] sm:$0xff]   ;;  %v364_v42 = vld [vmem:[%s8978_s29 + $0x70] sm:$0xf] }
  0xf4   : > { %3432 = vrot.lane.b32.xlu0 %v3396_v38, %s8805_s12  ;;  %790 = vst [vmem:[#allocation2 + $0xa8] sm:$0xf] %v789_v18  ;;  %v8487_v21 = vld [vmem:[#allocation2 + $0xa4] ss:$0 sps:$4 sm:$0x11]   ;;  %v608_v22 = vrot.slane %v603_v15, 4  ;;  %v1298_v28 = vsel %vm1130_vm4, %v1293_v40, %v1297_v46 }
  0xf5   : > { %2712 = vrot.lane.b32.xlu1 %v8467_v50, %s8803_s10  ;;  %v3134_v52 = vpop.permute.xlu1 %3133  ;;  %v606_v29 = vor.u32 %v604_v63, %v603_v15  ;;  %v2176_v30 = vshrl.u32 %v8486_v19, 16  ;;  %v2178_v31 = vshll.u32 %v8486_v19, 16  ;;  %v2183_v32 = vshll.u32 %v8487_v21, 16  ;;  %v8492_v39 = vld [vmem:[#allocation2 + $0xa4] ss:$0 sps:$4 sm:$0x11]  }
  0xf6   : > { %v3421_v36 = vpop.permute.xlu0 %3420  ;;  %3177 = vst.msk [vmem:[#allocation3 + $0x28] sm:$0xff] %vm3171_vm5, %v3134_v52  ;;  %v793_v33 = vsel %vm9010_vm9, %v608_v22, %v792_v12  ;;  %v8520_v41 = vld [vmem:[#allocation2 + $0x60] sm:$0xff]   ;;  %v1606_v43 = vsel %vm10658_vm3, %v1604_v13, %v1605_v17  ;;  %v8525_v45 = vld [vmem:[#allocation2 + $0x6c] sm:$0xff]   ;;  %v2501_v48 = vrot.slane %v8492_v39, 1  ;;  %v365_v49 = vld [vmem:[%s8978_s29 + $0x74] sm:$0xf] }
  0xf7   : > { %3465 = vst.msk [vmem:[#allocation3 + $0x20] sm:$0xff] %vm10667_vm6, %v3421_v36  ;;  %v607_v35 = vsel %vm8986_vm7, %v599_v10, %v606_v29  ;;  %794 = vst [vmem:[#allocation2 + $0xb0] sm:$0x1] %v793_v33  ;;  %v8491_v36 = vld [vmem:[#allocation2 + $0x9c] sm:$0xfe]   ;;  %v2180_v37 = vrot.slane %v2178_v31, 1 }
  0xf8   : > { %3434 = vrot.lane.b32.xlu0 %v3399_v57, %s8805_s12  ;;  %791 = vst.msk [vmem:[#allocation2 + $0xac] sm:$0xf] %vm280_vm0, %v607_v35  ;;  %v2185_v38 = vrot.slane %v2183_v32, 1  ;;  %v2500_v44 = vrot.slane %v8491_v36, 1  ;;  %v610_v51 = vshrl.u32 %v364_v42, 16  ;;  %v613_v52 = vshll.u32 %v364_v42, 16 }
  0xf9   : > { %3145 = vrot.lane.b32.xlu1 %v3074_v55, %s8807_s14  ;;  %v1336_v6 = vpop.permute.xlu1 %1335  ;;  %v2181_v47 = vor.u32 %v2180_v37, %v2176_v30  ;;  %946 = vst.msk [vmem:[#allocation3 + $0x40] sm:$0xff] %vm937_vm10, %v8520_v41  ;;  %947 = vst.msk [vmem:[#allocation3 + $0x48] sm:$0xff] %vm937_vm10, %v8525_v45  ;;  %v618_v25 = vshrl.u32 %v365_v49, 16  ;;  %v621_v57 = vshll.u32 %v365_v49, 16  ;;  %v795_v58 = vld [vmem:[#allocation2 + $0xb4] sm:$0xf] }
  0xfa   : > { %v3423_v54 = vpop.permute.xlu0 %3422  ;;  %1378 = vst.msk [vmem:[#allocation3 + $0x30] sm:$0xff] %vm1371_vm11, %v1336_v6  ;;  %v612_v55 = vrot.slane %v610_v51, 7  ;;  %v2502_v61 = vsel %vm10658_vm3, %v2500_v44, %v2501_v48 }
  0xfb   : > { %3466 = vst.msk [vmem:[#allocation3 + $0x28] sm:$0xff] %vm10667_vm6, %v3423_v54  ;;  %v2186_v54 = vsel %vm1130_vm4, %v2181_v47, %v2185_v38  ;;  %v620_v46 = vrot.slane %v618_v25, 7 }
  0xfc   : > { %1637 = vrot.lane.b32.xlu0 %v1603_v9, %s8800_s30  ;;  %v615_v62 = vor.u32 %v613_v52, %v612_v55  ;;  %v616_v1 = vrot.slane %v612_v55, 4 }
  0xfd   : > { %1347 = vrot.lane.b32.xlu1 %v1286_v8, %s8801_s8  ;;  %v1338_v50 = vpop.permute.xlu1 %1337  ;;  %v623_v40 = vor.u32 %v621_v57, %v620_v46 }
  0xfe   : > { %v1626_v7 = vpop.permute.xlu0 %1625  ;;  %v3481_v23 = vld [vmem:[#allocation3 + $0x20] sm:$0xff]  ;;  %1379 = vst.msk [vmem:[#allocation3 + $0x38] sm:$0xff] %vm1371_vm11, %v1338_v50  ;;  %v8489_v60 = vld [vmem:[#allocation2 + $0xb0] ss:$0 sps:$4 sm:$0x11]   ;;  %v796_v5 = vsel %vm8993_vm8, %v615_v62, %v795_v58  ;;  %v625_v50 = vrot.slane %v620_v46, 4 }
  0xff   : > { %1668 = vst.msk [vmem:[#allocation3 + $0x30] sm:$0xff] %vm1661_vm12, %v1626_v7  ;;  %8210 = vmatprep.mubr.msk.bf16.mxu0 %vm3513_vm2, %v3481_v23  ;;  %v8485_v2 = vld [vmem:[#allocation2 + $0xa8] sm:$0xff]   ;;  %v2195_v4 = vshll.u32 %v8489_v60, 16  ;;  %v8494_v7 = vld [vmem:[#allocation2 + $0xb0] ss:$0 sps:$4 sm:$0x11]   ;;  %v624_v63 = vsel %vm8986_vm7, %v616_v1, %v623_v40 }
 0x100   : > { %1814 = vrot.lane.b32.xlu0 %v8484_v14, %s8802_s9  ;;  %v8488_v3 = vld [vmem:[#allocation2 + $0xa8] sm:$0xff]   ;;  %797 = vst [vmem:[#allocation2 + $0xb4] sm:$0xf] %v796_v5  ;;  %v799_v14 = vld [vmem:[#allocation2 + $0xbc] sm:$0x1]  ;;  %v2504_v17 = vrot.slane %v8494_v7, 1 }
 0x101   : > { %1349 = vrot.lane.b32.xlu1 %v1298_v28, %s8801_s8  ;;  %v1628_v16 = vpop.permute.xlu1 %1627  ;;  %v8493_v6 = vld [vmem:[#allocation2 + $0xa8] sm:$0xfe]   ;;  %v2188_v10 = vshrl.u32 %v8488_v3, 16  ;;  %v2190_v12 = vshll.u32 %v8488_v3, 16  ;;  %v2197_v9 = vrot.slane %v2195_v4, 1  ;;  %v800_v32 = vsel %vm9010_vm9, %v625_v50, %v799_v14 }
 0x102   : > { %v1803_v26 = vpop.permute.xlu0 %1802  ;;  %v3482_v34 = vld [vmem:[#allocation3 + $0x28] sm:$0xff]  ;;  %1669 = vst.msk [vmem:[#allocation3 + $0x38] sm:$0xff] %vm1661_vm12, %v1628_v16  ;;  %v8496_v8 = vld [vmem:[#allocation2 + $0xa8] sm:$0xff]   ;;  %v2503_v15 = vrot.slane %v8493_v6, 1  ;;  %801 = vst [vmem:[#allocation2 + $0xbc] sm:$0x1] %v800_v32 }
 0x103   : > { %1845 = vst.msk [vmem:[#allocation3 + $0x30] sm:$0xff] %vm1838_vm13, %v1803_v26  ;;  %8211 = vmatmul.mubr.msk.bf16.gmra.mrb[8].mxu0 %vm3513_vm2, %v3482_v34  ;;  %v8498_v13 = vld [vmem:[#allocation2 + $0xa8] sm:$0xff]   ;;  %v2192_v18 = vrot.slane %v2190_v12, 1  ;;  %v8499_v19 = vld [vmem:[#allocation2 + $0xb0] ss:$0 sps:$4 sm:$0x11]  }
 0x104   : > { %2247 = vrot.lane.b32.xlu0 %v2186_v54, %s8806_s13  ;;  %798 = vst.msk [vmem:[#allocation2 + $0xb8] sm:$0xf] %vm280_vm0, %v624_v63  ;;  %v3076_v21 = vshrl.u32 %v8498_v13, 16  ;;  %v3078_v22 = vshll.u32 %v8498_v13, 16  ;;  %v8504_v23 = vld [vmem:[#allocation2 + $0xa8] sm:$0xff]   ;;  %v3083_v30 = vshll.u32 %v8499_v19, 16  ;;  %v2505_v41 = vsel %vm10658_vm3, %v2503_v15, %v2504_v17 }
 0x105   : > { %1639 = vrot.lane.b32.xlu1 %v1606_v43, %s8800_s30  ;;  %v1805_v59 = vpop.permute.xlu1 %1804  ;;  %v2193_v28 = vor.u32 %v2192_v18, %v2188_v10  ;;  %v8502_v31 = vld [vmem:[#allocation2 + $0xa8] sm:$0xfe]   ;;  %v8503_v33 = vld [vmem:[#allocation2 + $0xb0] ss:$0 sps:$4 sm:$0x11]   ;;  %v1302_v39 = vshll.u32 %v8504_v23, 16 }
 0x106   : > { %v2236_v24 = vpop.permute.xlu0 %2235  ;;  %1846 = vst.msk [vmem:[#allocation3 + $0x38] sm:$0xff] %vm1838_vm13, %v1805_v59  ;;  %v3080_v29 = vrot.slane %v3078_v22, 1  ;;  %v3085_v36 = vrot.slane %v3083_v30, 1  ;;  %v3400_v37 = vrot.slane %v8502_v31, 1  ;;  %v3401_v38 = vrot.slane %v8503_v33, 1 }
 0x107   : > { %2278 = vst.msk [vmem:[#allocation3 + $0x30] sm:$0xff] %vm2271_vm14, %v2236_v24  ;;  %v2198_v34 = vsel %vm1130_vm4, %v2193_v28, %v2197_v9  ;;  %v8505_v44 = vld [vmem:[#allocation2 + $0xb0] ss:$0 sps:$4 sm:$0x11]   ;;  %v1300_v45 = vshrl.u32 %v8504_v23, 16  ;;  %v1304_v52 = vrot.slane %v1302_v39, 1 }
 0x108   : > { %2536 = vrot.lane.b32.xlu0 %v2502_v61, %s8804_s11  ;;  %v3081_v35 = vor.u32 %v3080_v29, %v3076_v21  ;;  %v3402_v48 = vsel %vm10658_vm3, %v3400_v37, %v3401_v38  ;;  %v1307_v49 = vshll.u32 %v8505_v44, 16  ;;  %v8510_v10 = vld [vmem:[#allocation2 + $0xa8] sm:$0xfe]   ;;  %v8511_v13 = vld [vmem:[#allocation2 + $0xb0] ss:$0 sps:$4 sm:$0x11]  }
 0x109   : > { %1816 = vrot.lane.b32.xlu1 %v8485_v2, %s8802_s9  ;;  %v8501_v60 = vld [vmem:[#allocation2 + $0xbc] ss:$0 sps:$4 sm:$0x11]   ;;  %v1305_v40 = vor.u32 %v1304_v52, %v1300_v45  ;;  %v1607_v15 = vrot.slane %v8510_v10, 1  ;;  %v1608_v19 = vrot.slane %v8511_v13, 1 }
 0x10a   : > { %v2525_v56 = vpop.permute.xlu0 %2524  ;;  %v3086_v43 = vsel %vm1130_vm4, %v3081_v35, %v3085_v36  ;;  %v1309_v58 = vrot.slane %v1307_v49, 1  ;;  %v8507_v1 = vld [vmem:[#allocation2 + $0xbc] ss:$0 sps:$4 sm:$0x11]   ;;  %v3095_v2 = vshll.u32 %v8501_v60, 16 }
 0x10b   : > { %2567 = vst.msk [vmem:[#allocation3 + $0x30] sm:$0xff] %vm2560_vm15, %v2525_v56  ;;  %v8497_v42 = vld [vmem:[#allocation2 + $0xb4] sm:$0xff]   ;;  %v8509_v46 = vld [vmem:[#allocation2 + $0xbc] ss:$0 sps:$4 sm:$0x11]   ;;  %v3404_v6 = vrot.slane %v8507_v1, 1  ;;  %v1609_v28 = vsel %vm10658_vm3, %v1607_v15, %v1608_v19 }
 0x10c   : > { %2714 = vrot.lane.b32.xlu0 %v8496_v8, %s8803_s10  ;;  %v8500_v47 = vld [vmem:[#allocation2 + $0xb4] sm:$0xff]   ;;  %v3097_v8 = vrot.slane %v3095_v2, 1  ;;  %v8513_v21 = vld [vmem:[#allocation2 + $0xbc] ss:$0 sps:$4 sm:$0x11]   ;;  %v1310_v22 = vsel %vm1130_vm4, %v1305_v40, %v1309_v58  ;;  %v3112_v40 = vshrl.u32 %v9492_v53, 16 }
 0x10d   : > { %2249 = vrot.lane.b32.xlu1 %v2198_v34, %s8806_s13  ;;  %v8506_v51 = vld [vmem:[#allocation2 + $0xb4] sm:$0xfe]   ;;  %v3088_v56 = vshrl.u32 %v8500_v47, 16  ;;  %v3090_v57 = vshll.u32 %v8500_v47, 16  ;;  %v1611_v30 = vrot.slane %v8513_v21, 1 }
 0x10e   : > { %v2703_v11 = vpop.permute.xlu0 %2702  ;;  %v8508_v54 = vld [vmem:[#allocation2 + $0xb4] sm:$0xff]   ;;  %v3403_v59 = vrot.slane %v8506_v51, 1  ;;  %v367_v32 = vld [vmem:[%s8978_s29 + $0x7c] sm:$0xf]  ;;  %v802_v37 = vld [vmem:[#allocation2 + $0xc0] sm:$0xf] }
 0x10f   : > { %2745 = vst.msk [vmem:[#allocation3 + $0x30] sm:$0xff] %vm2738_vm1, %v2703_v11  ;;  %v1312_v61 = vshrl.u32 %v8508_v54, 16  ;;  %v3092_v62 = vrot.slane %v3090_v57, 1  ;;  %v1314_v7 = vshll.u32 %v8508_v54, 16  ;;  %v1319_v11 = vshll.u32 %v8509_v46, 16  ;;  %v8514_v31 = vld [vmem:[#allocation2 + $0xb4] sm:$0xff]  }
 0x110   : > { %3147 = vrot.lane.b32.xlu0 %v3086_v43, %s8807_s14  ;;  %v3405_v12 = vsel %vm10658_vm3, %v3403_v59, %v3404_v6  ;;  %v8512_v17 = vld [vmem:[#allocation2 + $0xb4] sm:$0xfe]   ;;  %v635_v35 = vshrl.u32 %v367_v32, 16  ;;  %v638_v36 = vshll.u32 %v367_v32, 16  ;;  %v806_v51 = vld [vmem:[#allocation2 + $0xc8] sm:$0x1] }
 0x111   : > { %2538 = vrot.lane.b32.xlu1 %v2505_v41, %s8804_s11  ;;  %v3093_v5 = vor.u32 %v3092_v62, %v3088_v56  ;;  %v1316_v9 = vrot.slane %v1314_v7, 1  ;;  %v1321_v23 = vrot.slane %v1319_v11, 1  ;;  %v1610_v29 = vrot.slane %v8512_v17, 1  ;;  %v8516_v38 = vld [vmem:[#allocation2 + $0xb4] sm:$0xff]  }
 0x112   : > { %v2238_v26 = vpop.permute.xlu1 %2237  ;;  %v3136_v24 = vpop.permute.xlu0 %3135  ;;  %v637_v44 = vrot.slane %v635_v35, 7  ;;  %v2200_v45 = vshrl.u32 %v8516_v38, 16  ;;  %v2202_v47 = vshll.u32 %v8516_v38, 16  ;;  %v8521_v46 = vld [vmem:[#allocation2 + $0xb4] sm:$0xfe]   ;;  %v8537_v35 = vld [vmem:[#allocation2 + $0x84] sm:$0xff]  }
 0x113   : > { %2279 = vst.msk [vmem:[#allocation3 + $0x38] sm:$0xff] %vm2271_vm14, %v2238_v26  ;;  %v3098_v14 = vsel %vm1130_vm4, %v3093_v5, %v3097_v8  ;;  %v1317_v50 = vor.u32 %v1316_v9, %v1312_v61  ;;  %v366_v26 = vld [vmem:[%s8978_s29 + $0x78] sm:$0xf]  ;;  %v1612_v58 = vsel %vm10658_vm3, %v1610_v29, %v1611_v30  ;;  %s8810_s29 = smov 64  }
 0x114   : > { %3178 = vst.msk [vmem:[#allocation3 + $0x30] sm:$0xff] %vm3171_vm5, %v3136_v24  ;;  %3436 = vrot.lane.b32.xlu0 %v3402_v48, %s8805_s12  ;;  %v627_v33 = vshrl.u32 %v366_v26, 16  ;;  %v630_v34 = vshll.u32 %v366_v26, 16  ;;  %v640_v52 = vor.u32 %v638_v36, %v637_v44  ;;  %v2204_v54 = vrot.slane %v2202_v47, 1  ;;  %v8536_v8 = vld [vmem:[#allocation2 + $0x78] sm:$0xff]  }
 0x115   : > { %2716 = vrot.lane.b32.xlu1 %v8497_v42, %s8803_s10  ;;  %v1322_v43 = vsel %vm1130_vm4, %v1317_v50, %v1321_v23  ;;  %v8517_v42 = vld [vmem:[#allocation2 + $0xbc] ss:$0 sps:$4 sm:$0x11]   ;;  %948 = vst.msk [vmem:[#allocation3 + $0x50] sm:$0xff] %vm937_vm10, %v8536_v8  ;;  %949 = vst.msk [vmem:[#allocation3 + $0x58] sm:$0xff] %vm937_vm10, %v8537_v35 }
 0x116   : > { %v2527_v16 = vpop.permute.xlu1 %2526  ;;  %v3425_v25 = vpop.permute.xlu0 %3424  ;;  %v629_v24 = vrot.slane %v627_v33, 7  ;;  %v2205_v62 = vor.u32 %v2204_v54, %v2200_v45  ;;  %v9502_v50 = vld [vmem:[#allocation2 + $0xd4] ss:$0 sps:$4 sm:$0x11]  }
 0x117   : > { %2568 = vst.msk [vmem:[#allocation3 + $0x38] sm:$0xff] %vm2560_vm15, %v2527_v16 }
 0x118   : > { %3467 = vst.msk [vmem:[#allocation3 + $0x30] sm:$0xff] %vm10667_vm6, %v3425_v25  ;;  %3438 = vrot.lane.b32.xlu0 %v3405_v12, %s8805_s12  ;;  %v632_v48 = vor.u32 %v630_v34, %v629_v24  ;;  %v633_v49 = vrot.slane %v629_v24, 4  ;;  %v642_v25 = vrot.slane %v637_v44, 4  ;;  %v3114_v12 = vshll.u32 %v9492_v53, 16 }
 0x119   : > { %3149 = vrot.lane.b32.xlu1 %v3098_v14, %s8807_s14 }
 0x11a   : > { %v2705_v55 = vpop.permute.xlu1 %2704  ;;  %v3427_v4 = vpop.permute.xlu0 %3426  ;;  %v803_v59 = vsel %vm8993_vm8, %v632_v48, %v802_v37  ;;  %v641_v61 = vsel %vm8986_vm7, %v633_v49, %v640_v52  ;;  %v807_v2 = vsel %vm9010_vm9, %v642_v25, %v806_v51  ;;  %v9521_v51 = vld [vmem:[#allocation2 + $0xcc] sm:$0xff]   ;;  %v9526_v25 = vld [vmem:[#allocation2 + $0x9c] sm:$0xff]   ;;  %vm3840_vm8 = vcmask 57344   ;;  %vm10668_vm9 = vmmov %vm10667_vm6 }
 0x11b   : > { %2746 = vst.msk [vmem:[#allocation3 + $0x38] sm:$0xff] %vm2738_vm1, %v2705_v55  ;;  %v2207_v55 = vshll.u32 %v8517_v42, 16  ;;  %804 = vst [vmem:[#allocation2 + $0xc0] sm:$0xf] %v803_v59  ;;  %v8538_v52 = vld [vmem:[#allocation2 + $0x90] sm:$0xff]  }
 0x11c   : > { %1641 = vrot.lane.b32.xlu0 %v1609_v28, %s8800_s30  ;;  %805 = vst.msk [vmem:[#allocation2 + $0xc4] sm:$0xf] %vm280_vm0, %v641_v61  ;;  %808 = vst [vmem:[#allocation2 + $0xc8] sm:$0x1] %v807_v2  ;;  %vm3837_vm0 = vcmask 60416  }
 0x11d   : > { %1351 = vrot.lane.b32.xlu1 %v1310_v22, %s8801_s8  ;;  %v2209_v1 = vrot.slane %v2207_v55, 1  ;;  %v9524_v55 = vld [vmem:[#allocation2 + $0xcc] sm:$0xfe]   ;;  %3845 = vst.msk [vmem:[#allocation4 + $0x18] sm:$0xf] %vm3837_vm0, %v8799_v0 }
 0x11e   : > { %v3138_v3 = vpop.permute.xlu1 %3137  ;;  %v1630_v18 = vpop.permute.xlu0 %1629  ;;  %3838 = vst.msk [vmem:[#allocation4] sm:$0xf] %vm3837_vm0, %v8799_v0  ;;  %3839 = vst.msk [vmem:[#allocation4 + $0x4] sm:$0xf] %vm3837_vm0, %v8799_v0 }
 0x11f   : > { %3179 = vst.msk [vmem:[#allocation3 + $0x38] sm:$0xff] %vm3171_vm5, %v3138_v3  ;;  %v3483_v41 = vld [vmem:[#allocation3 + $0x30] sm:$0xff]  ;;  %v8522_v3 = vld [vmem:[#allocation2 + $0xbc] ss:$0 sps:$4 sm:$0x11]   ;;  %v2210_v27 = vsel %vm1130_vm4, %v2205_v62, %v2209_v1 }
 0x120   : > { %3468 = vst.msk [vmem:[#allocation3 + $0x38] sm:$0xff] %vm10667_vm6, %v3427_v4  ;;  %8214 = vmatprep.mubr.msk.bf16.mxu0 %vm3513_vm2, %v3483_v41  ;;  %1818 = vrot.lane.b32.xlu0 %v8514_v31, %s8802_s9  ;;  %v2506_v4 = vrot.slane %v8521_v46, 1  ;;  %v2507_v5 = vrot.slane %v8522_v3, 1  ;;  %v3119_v41 = vshll.u32 %v9502_v50, 16  ;;  %v3409_v3 = vrot.slane %v9524_v55, 1 }
 0x121   : > { %1353 = vrot.lane.b32.xlu1 %v1322_v43, %s8801_s8  ;;  %3842 = vst.msk [vmem:[#allocation4 + $0xc] sm:$0xf] %vm3837_vm0, %v8799_v0  ;;  %3843 = vst.msk [vmem:[#allocation4 + $0x10] sm:$0xf] %vm3837_vm0, %v8799_v0  ;;  %s8811_s8 = smov 56  }
 0x122   : > { %v1340_v63 = vpop.permute.xlu1 %1339  ;;  %v1807_v16 = vpop.permute.xlu0 %1806  ;;  %v2508_v7 = vsel %vm10658_vm3, %v2506_v4, %v2507_v5  ;;  %3846 = vst.msk [vmem:[#allocation4 + $0x1c] sm:$0xf] %vm3837_vm0, %v8799_v0  ;;  %3848 = vst.msk [vmem:[#allocation4 + $0x24] sm:$0xf] %vm3837_vm0, %v8799_v0 }
 0x123   : > { %1380 = vst.msk [vmem:[#allocation3 + $0x40] sm:$0xff] %vm1371_vm11, %v1340_v63  ;;  %v8515_v10 = vld [vmem:[#allocation2 + $0xc0] sm:$0xff]   ;;  %v8519_v13 = vld [vmem:[#allocation2 + $0xc8] ss:$0 sps:$4 sm:$0x11]  }
 0x124   : > { %1670 = vst.msk [vmem:[#allocation3 + $0x40] sm:$0xff] %vm1661_vm12, %v1630_v18  ;;  %2251 = vrot.lane.b32.xlu0 %v2210_v27, %s8806_s13  ;;  %v8518_v9 = vld [vmem:[#allocation2 + $0xc0] sm:$0xff]   ;;  %v2219_v18 = vshll.u32 %v8519_v13, 16  ;;  %v8524_v19 = vld [vmem:[#allocation2 + $0xc8] ss:$0 sps:$4 sm:$0x11]  }
 0x125   : > { %1847 = vst.msk [vmem:[#allocation3 + $0x40] sm:$0xff] %vm1838_vm13, %v1807_v16  ;;  %1643 = vrot.lane.b32.xlu1 %v1612_v58, %s8800_s30  ;;  %v8523_v14 = vld [vmem:[#allocation2 + $0xc0] sm:$0xfe]   ;;  %v2212_v17 = vshrl.u32 %v8518_v9, 16  ;;  %v2214_v63 = vshll.u32 %v8518_v9, 16  ;;  %v2510_v28 = vrot.slane %v8524_v19, 1 }
 0x126   : > { %v1342_v39 = vpop.permute.xlu1 %1341  ;;  %v2509_v21 = vrot.slane %v8523_v14, 1  ;;  %v8526_v22 = vld [vmem:[#allocation2 + $0xc0] sm:$0xff]   ;;  %v2221_v26 = vrot.slane %v2219_v18, 1  ;;  %v8529_v32 = vld [vmem:[#allocation2 + $0xc8] ss:$0 sps:$4 sm:$0x11]  }
 0x127   : > { %1381 = vst.msk [vmem:[#allocation3 + $0x48] sm:$0xff] %vm1371_vm11, %v1342_v39  ;;  %v3484_v57 = vld [vmem:[#allocation3 + $0x38] sm:$0xff]  ;;  %v2216_v23 = vrot.slane %v2214_v63, 1  ;;  %v8528_v29 = vld [vmem:[#allocation2 + $0xc0] sm:$0xff]   ;;  %v3107_v39 = vshll.u32 %v8529_v32, 16  ;;  %v9509_v16 = vrot.slane %v3114_v12, 1 }
 0x128   : > { %8215 = vmatmul.mubr.msk.bf16.gmra.mrb[12].mxu0 %vm3513_vm2, %v3484_v57  ;;  %2540 = vrot.lane.b32.xlu0 %v2508_v7, %s8804_s11  ;;  %v3100_v33 = vshrl.u32 %v8528_v29, 16  ;;  %v3102_v34 = vshll.u32 %v8528_v29, 16  ;;  %v9506_v36 = vld [vmem:[#allocation2 + $0xc0] sm:$0xfe]   ;;  %v2511_v45 = vsel %vm10658_vm3, %v2509_v21, %v2510_v28  ;;  %3849 = vst.msk [vmem:[#allocation4 + $0x28] sm:$0xf] %vm3837_vm0, %v8799_v0 }
 0x129   : > { %1820 = vrot.lane.b32.xlu1 %v8515_v10, %s8802_s9  ;;  %v2217_v31 = vor.u32 %v2216_v23, %v2212_v17  ;;  %v9511_v24 = vld [vmem:[#allocation2 + $0xc8] ss:$0 sps:$4 sm:$0x11]   ;;  %v3406_v43 = vrot.slane %v9506_v36, 1  ;;  %v3109_v48 = vrot.slane %v3107_v39, 1  ;;  %950 = vst.msk [vmem:[#allocation3 + $0x60] sm:$0xff] %vm937_vm10, %v8538_v52  ;;  %v3117_v59 = vor.u32 %v9509_v16, %v3112_v40 }
 0x12a   : > { %v1632_v56 = vpop.permute.xlu1 %1631  ;;  %v3104_v38 = vrot.slane %v3102_v34, 1  ;;  %v3407_v49 = vrot.slane %v9511_v24, 1  ;;  %3851 = vst.msk [vmem:[#allocation4 + $0x30] sm:$0xf] %vm3837_vm0, %v8799_v0  ;;  %3852 = vst.msk [vmem:[#allocation4 + $0x34] sm:$0xf] %vm3837_vm0, %v8799_v0 }
 0x12b   : > { %1671 = vst.msk [vmem:[#allocation3 + $0x48] sm:$0xff] %vm1661_vm12, %v1632_v56  ;;  %v2222_v37 = vsel %vm1130_vm4, %v2217_v31, %v2221_v26  ;;  %v8540_v58 = vld [vmem:[#allocation2 + $0xa8] sm:$0xff]   ;;  %v8535_v62 = vld [vmem:[#allocation2 + $0xd4] ss:$0 sps:$4 sm:$0x11]  }
 0x12c   : > { %v2240_v60 = vpop.permute.xlu0 %2239  ;;  %2718 = vrot.lane.b32.xlu0 %v8526_v22, %s8803_s10  ;;  %v3105_v47 = vor.u32 %v3104_v38, %v3100_v33  ;;  %3854 = vst.msk [vmem:[#allocation4 + $0x3c] sm:$0xf] %vm3837_vm0, %v8799_v0  ;;  %3855 = vst.msk [vmem:[#allocation4 + $0x40] sm:$0xf] %vm3837_vm0, %v8799_v0  ;;  %v3408_v61 = vsel %vm10658_vm3, %v3406_v43, %v3407_v49  ;;  %v3410_v27 = vrot.slane %v8535_v62, 1 }
 0x12d   : > { %2280 = vst.msk [vmem:[#allocation3 + $0x40] sm:$0xff] %vm2271_vm14, %v2240_v60  ;;  %2253 = vrot.lane.b32.xlu1 %v2222_v37, %s8806_s13  ;;  %v3121_v60 = vrot.slane %v3119_v41, 1  ;;  %v8544_v12 = vld [vmem:[#allocation4] sm:$0xfe]  }
 0x12e   : > { %v3110_v54 = vsel %vm1130_vm4, %v3105_v47, %v3109_v48  ;;  %3857 = vst.msk [vmem:[#allocation4 + $0x48] sm:$0xf] %vm3837_vm0, %v8799_v0  ;;  %3858 = vst.msk [vmem:[#allocation4 + $0x4c] sm:$0xf] %vm3837_vm0, %v8799_v0  ;;  %v3411_v7 = vsel %vm10658_vm3, %v3409_v3, %v3410_v27  ;;  %v5180_v19 = vrot.slane %v8544_v12, 1 }
 0x12f   : > { %3860 = vst.msk [vmem:[#allocation4 + $0x54] sm:$0xf] %vm3837_vm0, %v8799_v0  ;;  %3861 = vst.msk [vmem:[#allocation4 + $0x58] sm:$0xf] %vm3837_vm0, %v8799_v0  ;;  %v3122_v46 = vsel %vm1130_vm4, %v3117_v59, %v3121_v60 }
 0x130   : > { %v2529_v6 = vpop.permute.xlu0 %2528  ;;  %3863 = vst.msk [vmem:[#allocation4 + $0x60] sm:$0xf] %vm3837_vm0, %v8799_v0  ;;  %3864 = vst.msk [vmem:[#allocation4 + $0x64] sm:$0xf] %vm3837_vm0, %v8799_v0  ;;  %3151 = vrot.lane.b32.xlu0 %v3110_v54, %s8807_s14 }
 0x131   : > { %2569 = vst.msk [vmem:[#allocation3 + $0x40] sm:$0xff] %vm2560_vm15, %v2529_v6  ;;  %2542 = vrot.lane.b32.xlu1 %v2511_v45, %s8804_s11  ;;  %v8542_v6 = vld [vmem:[#allocation4] sm:$0xff]  }
 0x132   : > { %3866 = vst.msk [vmem:[#allocation4 + $0x6c] sm:$0xf] %vm3837_vm0, %v8799_v0  ;;  %3867 = vst.msk [vmem:[#allocation4 + $0x70] sm:$0xf] %vm3837_vm0, %v8799_v0  ;;  %v4748_v40 = vshrl.u32 %v8542_v6, 16 }
 0x133   : > { %3869 = vst.msk [vmem:[#allocation4 + $0x78] sm:$0xf] %vm3837_vm0, %v8799_v0  ;;  %3870 = vst.msk [vmem:[#allocation4 + $0x7c] sm:$0xf] %vm3837_vm0, %v8799_v0 }
 0x134   : > { %3872 = vst.msk [vmem:[#allocation4 + $0x84] sm:$0xf] %vm3837_vm0, %v8799_v0  ;;  %3873 = vst.msk [vmem:[#allocation4 + $0x88] sm:$0xf] %vm3837_vm0, %v8799_v0  ;;  %3440 = vrot.lane.b32.xlu0 %v3408_v61, %s8805_s12 }
 0x135   : > { %3875 = vst.msk [vmem:[#allocation4 + $0x90] sm:$0xf] %vm3837_vm0, %v8799_v0  ;;  %3876 = vst.msk [vmem:[#allocation4 + $0x94] sm:$0xf] %vm3837_vm0, %v8799_v0  ;;  %2720 = vrot.lane.b32.xlu1 %v9521_v51, %s8803_s10 }
 0x136   : > { %3878 = vst.msk [vmem:[#allocation4 + $0x9c] sm:$0xf] %vm3837_vm0, %v8799_v0  ;;  %3879 = vst.msk [vmem:[#allocation4 + $0xa0] sm:$0xf] %vm3837_vm0, %v8799_v0 }
 0x137   : > { %v1809_v11 = vpop.permute.xlu1 %1808  ;;  %3881 = vst.msk [vmem:[#allocation4 + $0xa8] sm:$0xf] %vm3837_vm0, %v8799_v0  ;;  %3882 = vst.msk [vmem:[#allocation4 + $0xac] sm:$0xf] %vm3837_vm0, %v8799_v0 }
 0x138   : > { %1848 = vst.msk [vmem:[#allocation3 + $0x48] sm:$0xff] %vm1838_vm13, %v1809_v11  ;;  %v4750_v11 = vshll.u32 %v8542_v6, 16 }
 0x139   : > { %3884 = vst.msk [vmem:[#allocation4 + $0xb4] sm:$0xf] %vm3837_vm0, %v8799_v0  ;;  %3885 = vst.msk [vmem:[#allocation4 + $0xb8] sm:$0xf] %vm3837_vm0, %v8799_v0  ;;  %3153 = vrot.lane.b32.xlu1 %v3122_v46, %s8807_s14 }
 0x13a   : > { %v2707_v15 = vpop.permute.xlu0 %2706  ;;  %3887 = vst.msk [vmem:[#allocation4 + $0xc0] sm:$0xf] %vm3837_vm0, %v8799_v0  ;;  %3888 = vst.msk [vmem:[#allocation4 + $0xc4] sm:$0xf] %vm3837_vm0, %v8799_v0  ;;  %v4752_v14 = vrot.slane %v4750_v11, 1 }
 0x13b   : > { %2747 = vst.msk [vmem:[#allocation3 + $0x40] sm:$0xff] %vm2738_vm1, %v2707_v15 }
 0x13c   : > { %3890 = vst.msk [vmem:[#allocation4 + $0xcc] sm:$0xf] %vm3837_vm0, %v8799_v0  ;;  %3891 = vst.msk [vmem:[#allocation4 + $0xd0] sm:$0xf] %vm3837_vm0, %v8799_v0  ;;  %v4753_v18 = vor.u32 %v4752_v14, %v4748_v40 }
 0x13d   : > { %3847 = vst.msk [vmem:[#allocation4 + $0x20] sm:$0x1] %vm3840_vm8, %v8799_v0  ;;  %3841 = vst.msk [vmem:[#allocation4 + $0x8] sm:$0x1] %vm3840_vm8, %v8799_v0  ;;  %3442 = vrot.lane.b32.xlu1 %v3411_v7, %s8805_s12 }
 0x13e   : > { %3844 = vst.msk [vmem:[#allocation4 + $0x14] sm:$0x1] %vm3840_vm8, %v8799_v0  ;;  %3850 = vst.msk [vmem:[#allocation4 + $0x2c] sm:$0x1] %vm3840_vm8, %v8799_v0 }
 0x13f   : > { %v2242_v30 = vpop.permute.xlu1 %2241  ;;  %3853 = vst.msk [vmem:[#allocation4 + $0x38] sm:$0x1] %vm3840_vm8, %v8799_v0  ;;  %3856 = vst.msk [vmem:[#allocation4 + $0x44] sm:$0x1] %vm3840_vm8, %v8799_v0 }
 0x140   : > { %2281 = vst.msk [vmem:[#allocation3 + $0x48] sm:$0xff] %vm2271_vm14, %v2242_v30 }
 0x141   : > { %3859 = vst.msk [vmem:[#allocation4 + $0x50] sm:$0x1] %vm3840_vm8, %v8799_v0  ;;  %3862 = vst.msk [vmem:[#allocation4 + $0x5c] sm:$0x1] %vm3840_vm8, %v8799_v0 }
 0x142   : > { %v3140_v42 = vpop.permute.xlu0 %3139  ;;  %3865 = vst.msk [vmem:[#allocation4 + $0x68] sm:$0x1] %vm3840_vm8, %v8799_v0  ;;  %3868 = vst.msk [vmem:[#allocation4 + $0x74] sm:$0x1] %vm3840_vm8, %v8799_v0 }
 0x143   : > { %v2531_v44 = vpop.permute.xlu1 %2530  ;;  %3180 = vst.msk [vmem:[#allocation3 + $0x40] sm:$0xff] %vm3171_vm5, %v3140_v42 }
 0x144   : > { %2570 = vst.msk [vmem:[#allocation3 + $0x48] sm:$0xff] %vm2560_vm15, %v2531_v44  ;;  %v8543_v8 = vld [vmem:[#allocation4 + $0x8] ss:$0 sps:$4 sm:$0x11]  }
 0x145   : > { %3871 = vst.msk [vmem:[#allocation4 + $0x80] sm:$0x1] %vm3840_vm8, %v8799_v0  ;;  %3874 = vst.msk [vmem:[#allocation4 + $0x8c] sm:$0x1] %vm3840_vm8, %v8799_v0  ;;  %v4755_v10 = vshll.u32 %v8543_v8, 16 }
 0x146   : > { %v3429_v57 = vpop.permute.xlu0 %3428  ;;  %3877 = vst.msk [vmem:[#allocation4 + $0x98] sm:$0x1] %vm3840_vm8, %v8799_v0  ;;  %3880 = vst.msk [vmem:[#allocation4 + $0xa4] sm:$0x1] %vm3840_vm8, %v8799_v0 }
 0x147   : > { %v2709_v56 = vpop.permute.xlu1 %2708  ;;  %3883 = vst.msk [vmem:[#allocation4 + $0xb0] sm:$0x1] %vm3840_vm8, %v8799_v0  ;;  %3886 = vst.msk [vmem:[#allocation4 + $0xbc] sm:$0x1] %vm3840_vm8, %v8799_v0  ;;  %v4757_v63 = vrot.slane %v4755_v10, 1 }
 0x148   : > { %3889 = vst.msk [vmem:[#allocation4 + $0xc8] sm:$0x1] %vm3840_vm8, %v8799_v0  ;;  %3892 = vst.msk [vmem:[#allocation4 + $0xd4] sm:$0x1] %vm3840_vm8, %v8799_v0  ;;  %v8541_v0 = vld [vmem:[#allocation2 + $0xb4] sm:$0xff]  }
 0x149   : > { %2748 = vst.msk [vmem:[#allocation3 + $0x48] sm:$0xff] %vm2738_vm1, %v2709_v56  ;;  %v8545_v9 = vld [vmem:[#allocation4 + $0x8] ss:$0 sps:$4 sm:$0x11]   ;;  %v4758_v50 = vsel %vm1130_vm4, %v4753_v18, %v4757_v63 }
 0x14a   : > { %3469 = vst.msk [vmem:[#allocation3 + $0x40] sm:$0xff] %vm10668_vm9, %v3429_v57  ;;  %v3431_v2 = vpop.permute.xlu0 %3430  ;;  %v5181_v21 = vrot.slane %v8545_v9, 1  ;;  %4939 = vrot.lane.b32.xlu0 %v4758_v50, %s8800_s30  ;;  %vm10670_vm9 = vmmov %vm10667_vm6 }
 0x14b   : > { %951 = vst.msk [vmem:[#allocation3 + $0x68] sm:$0xff] %vm937_vm10, %v9526_v25  ;;  %952 = vst.msk [vmem:[#allocation3 + $0x70] sm:$0xff] %vm937_vm10, %v8540_v58  ;;  %v3142_v1 = vpop.permute.xlu1 %3141  ;;  %v9706_v25 = vld [vmem:[%s10649_s2] ss:$0 sm:$0xff] }
 0x14c   : > { %953 = vst.msk [vmem:[#allocation3 + $0x78] sm:$0xff] %vm937_vm10, %v8541_v0  ;;  %v5182_v26 = vsel %vm10658_vm3, %v5180_v19, %v5181_v21  ;;  %vm10669_vm10 = vmmov %vm10667_vm6  ;;  %v9711_v58 = vld [vmem:[%s10650_s3] ss:$0 sm:$0xff] }
 0x14d   : > { %3181 = vst.msk [vmem:[#allocation3 + $0x48] sm:$0xff] %vm3171_vm5, %v3142_v1 }
 0x14e   : > { %3470 = vst.msk [vmem:[#allocation3 + $0x48] sm:$0xff] %vm10667_vm6, %v3431_v2  ;;  %v1634_v53 = vpop.permute.xlu0 %1633  ;;  %5228 = vrot.lane.b32.xlu0 %v5182_v26, %s8806_s13  ;;  %v4321_v26 = vld [vmem:[#allocation4 + $0x18] sm:$0xf] }
 0x14f   : > { %v1344_v4 = vpop.permute.xlu1 %1343 }
 0x150   : > { %1382 = vst.msk [vmem:[#allocation3 + $0x50] sm:$0xff] %vm1371_vm11, %v1344_v4 }
 0x151   : > { %v3485_v5 = vld [vmem:[#allocation3 + $0x40] sm:$0xff]  ;;  %1672 = vst.msk [vmem:[#allocation3 + $0x50] sm:$0xff] %vm1661_vm12, %v1634_v53 }
 0x152   : > { %8218 = vmatprep.mubr.msk.bf16.mxu0 %vm3513_vm2, %v3485_v5  ;;  %v1811_v15 = vpop.permute.xlu0 %1810 }
 0x153   : > { %v1346_v13 = vpop.permute.xlu1 %1345  ;;  %1849 = vst.msk [vmem:[#allocation3 + $0x50] sm:$0xff] %vm1838_vm13, %v1811_v15 }
 0x154   : > { %1383 = vst.msk [vmem:[#allocation3 + $0x58] sm:$0xff] %vm1371_vm11, %v1346_v13 }
 0x155   : > { %v3486_v17 = vld [vmem:[#allocation3 + $0x48] sm:$0xff] }
 0x156   : > { %8219 = vmatmul.mubr.msk.bf16.gmra.mrb[16].mxu0 %vm3513_vm2, %v3486_v17  ;;  %v2244_v23 = vpop.permute.xlu0 %2243 }
 0x157   : > { %v1636_v22 = vpop.permute.xlu1 %1635  ;;  %2282 = vst.msk [vmem:[#allocation3 + $0x50] sm:$0xff] %vm2271_vm14, %v2244_v23 }
 0x158   : > { %1673 = vst.msk [vmem:[#allocation3 + $0x58] sm:$0xff] %vm1661_vm12, %v1636_v22 }
 0x15a   : > { %v2533_v28 = vpop.permute.xlu0 %2532 }
 0x15b   : > { %2571 = vst.msk [vmem:[#allocation3 + $0x50] sm:$0xff] %vm2560_vm15, %v2533_v28  ;;  %v1813_v29 = vpop.permute.xlu1 %1812 }
 0x15c   : > { %1850 = vst.msk [vmem:[#allocation3 + $0x58] sm:$0xff] %vm1838_vm13, %v1813_v29 }
 0x15e   : > { %v2711_v30 = vpop.permute.xlu0 %2710 }
 0x15f   : > { %2749 = vst.msk [vmem:[#allocation3 + $0x50] sm:$0xff] %vm2738_vm1, %v2711_v30  ;;  %v2246_v31 = vpop.permute.xlu1 %2245 }
 0x160   : > { %2283 = vst.msk [vmem:[#allocation3 + $0x58] sm:$0xff] %vm2271_vm14, %v2246_v31 }
 0x162   : > { %v3144_v33 = vpop.permute.xlu0 %3143 }
 0x163   : > { %v2535_v32 = vpop.permute.xlu1 %2534  ;;  %3182 = vst.msk [vmem:[#allocation3 + $0x50] sm:$0xff] %vm3171_vm5, %v3144_v33 }
 0x164   : > { %2572 = vst.msk [vmem:[#allocation3 + $0x58] sm:$0xff] %vm2560_vm15, %v2535_v32 }
 0x166   : > { %v3433_v35 = vpop.permute.xlu0 %3432 }
 0x167   : > { %v2713_v34 = vpop.permute.xlu1 %2712  ;;  %3471 = vst.msk [vmem:[#allocation3 + $0x50] sm:$0xff] %vm10669_vm10, %v3433_v35  ;;  %vm10671_vm10 = vmmov %vm10667_vm6 }
 0x168   : > { %2750 = vst.msk [vmem:[#allocation3 + $0x58] sm:$0xff] %vm2738_vm1, %v2713_v34  ;;  %v4312_v34 = vld [vmem:[#allocation4 + $0xc] sm:$0xf] }
 0x16a   : > { %v3435_v37 = vpop.permute.xlu0 %3434 }
 0x16b   : > { %v3146_v36 = vpop.permute.xlu1 %3145 }
 0x16c   : > { %3183 = vst.msk [vmem:[#allocation3 + $0x58] sm:$0xff] %vm3171_vm5, %v3146_v36 }
 0x16d   : > { %3472 = vst.msk [vmem:[#allocation3 + $0x58] sm:$0xff] %vm10670_vm9, %v3435_v37  ;;  %vm10672_vm9 = vsmask.f32 7938 }
 0x16e   : > { %v1638_v39 = vpop.permute.xlu0 %1637  ;;  %v3487_v16 = vld [vmem:[#allocation3 + $0x50] sm:$0xff] }
 0x16f   : > { %v1348_v38 = vpop.permute.xlu1 %1347  ;;  %8222 = vmatprep.mubr.msk.bf16.mxu0 %vm3513_vm2, %v3487_v16 }
 0x170   : > { %1384 = vst.msk [vmem:[#allocation3 + $0x60] sm:$0xff] %vm1371_vm11, %v1348_v38 }
 0x171   : > { %1674 = vst.msk [vmem:[#allocation3 + $0x60] sm:$0xff] %vm1661_vm12, %v1638_v39  ;;  %v4325_v39 = vld [vmem:[#allocation4 + $0x20] sm:$0x1] }
 0x172   : > { %v1815_v41 = vpop.permute.xlu0 %1814 }
 0x173   : > { %v1350_v24 = vpop.permute.xlu1 %1349  ;;  %1851 = vst.msk [vmem:[#allocation3 + $0x60] sm:$0xff] %vm1838_vm13, %v1815_v41 }
 0x174   : > { %1385 = vst.msk [vmem:[#allocation3 + $0x68] sm:$0xff] %vm1371_vm11, %v1350_v24  ;;  %v3488_v43 = vld [vmem:[#allocation3 + $0x58] sm:$0xff] }
 0x175   : > { %8223 = vmatmul.mubr.msk.bf16.gmra.mrb[20].mxu0 %vm3513_vm2, %v3488_v43 }
 0x176   : > { %v2248_v42 = vpop.permute.xlu0 %2247 }
 0x177   : > { %v1640_v44 = vpop.permute.xlu1 %1639  ;;  %2284 = vst.msk [vmem:[#allocation3 + $0x60] sm:$0xff] %vm2271_vm14, %v2248_v42 }
 0x178   : > { %1675 = vst.msk [vmem:[#allocation3 + $0x68] sm:$0xff] %vm1661_vm12, %v1640_v44 }
 0x17a   : > { %v2537_v47 = vpop.permute.xlu0 %2536 }
 0x17b   : > { %v1817_v45 = vpop.permute.xlu1 %1816  ;;  %2573 = vst.msk [vmem:[#allocation3 + $0x60] sm:$0xff] %vm2560_vm15, %v2537_v47 }
 0x17c   : > { %1852 = vst.msk [vmem:[#allocation3 + $0x68] sm:$0xff] %vm1838_vm13, %v1817_v45  ;;  %v4318_v45 = vld [vmem:[#allocation4 + $0x14] sm:$0x1] }
 0x17e   : > { %v2715_v48 = vpop.permute.xlu0 %2714 }
 0x17f   : > { %2751 = vst.msk [vmem:[#allocation3 + $0x60] sm:$0xff] %vm2738_vm1, %v2715_v48  ;;  %v2250_v49 = vpop.permute.xlu1 %2249 }
 0x180   : > { %2285 = vst.msk [vmem:[#allocation3 + $0x68] sm:$0xff] %vm2271_vm14, %v2250_v49 }
 0x182   : > { %v3148_v51 = vpop.permute.xlu0 %3147 }
 0x183   : > { %3184 = vst.msk [vmem:[#allocation3 + $0x60] sm:$0xff] %vm3171_vm5, %v3148_v51  ;;  %v2539_v52 = vpop.permute.xlu1 %2538 }
 0x184   : > { %2574 = vst.msk [vmem:[#allocation3 + $0x68] sm:$0xff] %vm2560_vm15, %v2539_v52 }
 0x186   : > { %v3437_v54 = vpop.permute.xlu0 %3436 }
 0x187   : > { %3473 = vst.msk [vmem:[#allocation3 + $0x60] sm:$0xff] %vm10667_vm6, %v3437_v54  ;;  %v2717_v55 = vpop.permute.xlu1 %2716  ;;  %vm9731_vm6 = vmand %vm3837_vm0, %vm10672_vm9  ;;  %vm10660_vm9 = vcmask 458112  }
 0x188   : > { %2752 = vst.msk [vmem:[#allocation3 + $0x68] sm:$0xff] %vm2738_vm1, %v2717_v55 }
 0x18a   : > { %v3439_v56 = vpop.permute.xlu0 %3438 }
 0x18b   : > { %v3150_v59 = vpop.permute.xlu1 %3149 }
 0x18c   : > { %3185 = vst.msk [vmem:[#allocation3 + $0x68] sm:$0xff] %vm3171_vm5, %v3150_v59 }
 0x18d   : > { %3474 = vst.msk [vmem:[#allocation3 + $0x68] sm:$0xff] %vm10671_vm10, %v3439_v56 }
 0x18e   : > { %v3489_v62 = vld [vmem:[#allocation3 + $0x60] sm:$0xff]  ;;  %v1642_v27 = vpop.permute.xlu0 %1641 }
 0x18f   : > { %8226 = vmatprep.mubr.msk.bf16.mxu0 %vm3513_vm2, %v3489_v62  ;;  %v1352_v6 = vpop.permute.xlu1 %1351 }
 0x190   : > { %1386 = vst.msk [vmem:[#allocation3 + $0x70] sm:$0xff] %vm1371_vm11, %v1352_v6 }
 0x191   : > { %1676 = vst.msk [vmem:[#allocation3 + $0x70] sm:$0xff] %vm1661_vm12, %v1642_v27 }
 0x192   : > { %v1819_v12 = vpop.permute.xlu0 %1818 }
 0x193   : > { %v1354_v14 = vpop.permute.xlu1 %1353  ;;  %1853 = vst.msk [vmem:[#allocation3 + $0x70] sm:$0xff] %vm1838_vm13, %v1819_v12 }
 0x194   : > { %1387 = vst.msk [vmem:[#allocation3 + $0x78] sm:$0xff] %vm1371_vm11, %v1354_v14  ;;  %v3490_v63 = vld [vmem:[#allocation3 + $0x68] sm:$0xff]  ;;  %vm10675_vm11 = vsmask.f32 256 }
 0x195   : > { %8227 = vmatmul.mubr.msk.bf16.gmra.mrb[24].mxu0 %vm3513_vm2, %v3490_v63  ;;  %vm9739_vm10 = vmand %vm3840_vm8, %vm10675_vm11  ;;  %vm6175_vm8 = vcmask 392512   ;;  %vm6786_vm11 = vcmask 523712  }
 0x196   : > { %v8204_v57 = vpop.f32.mrb[0].mxu0  ;;  %v2252_v32 = vpop.permute.xlu0 %2251 }
 0x197   : > { %v3736_v60 = vmul.f32 %v8204_v57, %v9706_v25  ;;  %v3600_v61 = vpop.f32.mrb[1].mxu0  ;;  %v1644_v31 = vpop.permute.xlu1 %1643  ;;  %2286 = vst.msk [vmem:[#allocation3 + $0x70] sm:$0xff] %vm2271_vm14, %v2252_v32 }
 0x198   : > { %v3734_v0 = vmul.f32 %v9706_v25, %v3600_v61  ;;  %v8205_v1 = vpop.f32.mrb[2].mxu0  ;;  %1677 = vst.msk [vmem:[#allocation3 + $0x78] sm:$0xff] %vm1661_vm12, %v1644_v31  ;;  %vm10678_vm12 = vcmask 294144  }
 0x199   : > { %v3775_v2 = vadd.f32 %v9711_v58, %v3736_v60  ;;  %v3737_v46 = vmul.f32 %v8205_v1, %v9706_v25  ;;  %v3603_v3 = vpop.f32.mrb[3].mxu0 }
 0x19a   : > { %v3773_v4 = vadd.f32 %v9711_v58, %v3734_v0  ;;  %v3735_v5 = vmul.f32 %v9706_v25, %v3603_v3  ;;  %v2541_v52 = vpop.permute.xlu0 %2540 }
 0x19b   : > { %v3807_v7 = vmax.f32 %v3775_v2, 0.0  ;;  %v3776_v53 = vadd.f32 %v9711_v58, %v3737_v46  ;;  %2575 = vst.msk [vmem:[#allocation3 + $0x70] sm:$0xff] %vm2560_vm15, %v2541_v52  ;;  %v1821_v59 = vpop.permute.xlu1 %1820 }
 0x19c   : > { %v3805_v8 = vmax.f32 %v3773_v4, 0.0  ;;  %v3774_v40 = vadd.f32 %v9711_v58, %v3735_v5  ;;  %1854 = vst.msk [vmem:[#allocation3 + $0x78] sm:$0xff] %vm1838_vm13, %v1821_v59  ;;  %vm4554_vm13 = vcmask 64512  }
 0x19d   : > { %v8126_v11 = vpack.c.bf16 %v3807_v7, %v3807_v7  ;;  %v3808_v10 = vmax.f32 %v3776_v53, 0.0 }
 0x19e   : > { %v8124_v9 = vpack.c.bf16 %v3805_v8, %v3805_v8  ;;  %v3806_v13 = vmax.f32 %v3774_v40, 0.0  ;;  %v2719_v60 = vpop.permute.xlu0 %2718 }
 0x19f   : > { %v4007_v15 = vshrl.u32 %v8126_v11, 16  ;;  %v8127_v17 = vpack.c.bf16 %v3808_v10, %v3808_v10  ;;  %v4010_v22 = vshll.u32 %v8126_v11, 16  ;;  %2753 = vst.msk [vmem:[#allocation3 + $0x70] sm:$0xff] %vm2738_vm1, %v2719_v60  ;;  %v2254_v46 = vpop.permute.xlu1 %2253 }
 0x1a0   : > { %v3990_v18 = vshrl.u32 %v8124_v9, 16  ;;  %v8125_v19 = vpack.c.bf16 %v3806_v13, %v3806_v13  ;;  %v3993_v29 = vshll.u32 %v8124_v9, 16  ;;  %2287 = vst.msk [vmem:[#allocation3 + $0x78] sm:$0xff] %vm2271_vm14, %v2254_v46  ;;  %vm10679_vm14 = vmmov %vm10678_vm12 }
 0x1a1   : > { %v4009_v21 = vrot.slane %v4007_v15, 7  ;;  %v4015_v50 = vshrl.u32 %v8127_v17, 16  ;;  %v4018_v36 = vshll.u32 %v8127_v17, 16 }
 0x1a2   : > { %v3992_v28 = vrot.slane %v3990_v18, 7  ;;  %v3998_v30 = vshrl.u32 %v8125_v19, 16  ;;  %v4001_v24 = vshll.u32 %v8125_v19, 16  ;;  %v3152_v10 = vpop.permute.xlu0 %3151 }
 0x1a3   : > { %v4012_v33 = vor.u32 %v4010_v22, %v4009_v21  ;;  %v4017_v35 = vrot.slane %v4015_v50, 7  ;;  %v4013_v41 = vrot.slane %v4009_v21, 4  ;;  %v2543_v11 = vpop.permute.xlu1 %2542  ;;  %3186 = vst.msk [vmem:[#allocation3 + $0x70] sm:$0xff] %vm3171_vm5, %v3152_v10 }
 0x1a4   : > { %v3995_v37 = vor.u32 %v3993_v29, %v3992_v28  ;;  %v4000_v16 = vrot.slane %v3998_v30, 7  ;;  %v3996_v47 = vrot.slane %v3992_v28, 4  ;;  %2576 = vst.msk [vmem:[#allocation3 + $0x78] sm:$0xff] %vm2560_vm15, %v2543_v11  ;;  %vm5276_vm15 = vcmask 195712  }
 0x1a5   : > { %v4322_v43 = vsel %vm9731_vm6, %v4012_v33, %v4321_v26  ;;  %v4020_v44 = vor.u32 %v4018_v36, %v4017_v35  ;;  %v4022_v42 = vrot.slane %v4017_v35, 4 }
 0x1a6   : > { %4323 = vst [vmem:[#allocation4 + $0x18] sm:$0xf] %v4322_v43  ;;  %v4313_v48 = vsel %vm9731_vm6, %v3995_v37, %v4312_v34  ;;  %v4003_v49 = vor.u32 %v4001_v24, %v4000_v16  ;;  %v4005_v51 = vrot.slane %v4000_v16, 4  ;;  %v3441_v28 = vpop.permute.xlu0 %3440 }
 0x1a7   : > { %4314 = vst [vmem:[#allocation4 + $0xc] sm:$0xf] %v4313_v48  ;;  %v4021_v54 = vsel %vm8986_vm7, %v4013_v41, %v4020_v44  ;;  %v4326_v55 = vsel %vm9739_vm10, %v4022_v42, %v4325_v39  ;;  %v2721_v26 = vpop.permute.xlu1 %2720  ;;  %3475 = vst.msk [vmem:[#allocation3 + $0x70] sm:$0xff] %vm10678_vm12, %v3441_v28  ;;  %vm7075_vm12 = vcmask 589312  }
 0x1a8   : > { %4324 = vst.msk [vmem:[#allocation4 + $0x1c] sm:$0xf] %vm3837_vm0, %v4021_v54  ;;  %4327 = vst [vmem:[#allocation4 + $0x20] sm:$0x1] %v4326_v55  ;;  %v4004_v56 = vsel %vm8986_vm7, %v3996_v47, %v4003_v49  ;;  %v4319_v57 = vsel %vm9739_vm10, %v4005_v51, %v4318_v45 }
 0x1a9   : > { %4315 = vst.msk [vmem:[#allocation4 + $0x10] sm:$0xf] %vm3837_vm0, %v4004_v56  ;;  %4320 = vst [vmem:[#allocation4 + $0x14] sm:$0x1] %v4319_v57 }
 0x1aa   : > { %2754 = vst.msk [vmem:[#allocation3 + $0x78] sm:$0xff] %vm2738_vm1, %v2721_v26  ;;  %vm10659_vm1 = vcmask 261312  }
 0x1ab   : > { %v3154_v49 = vpop.permute.xlu1 %3153 }
 0x1ac   : > { %3187 = vst.msk [vmem:[#allocation3 + $0x78] sm:$0xff] %vm3171_vm5, %v3154_v49  ;;  %vm5886_vm5 = vcmask 326912  }
 0x1af   : > { %v8546_v61 = vld [vmem:[#allocation4 + $0x18] sm:$0xff]   ;;  %v8549_v1 = vld [vmem:[#allocation4 + $0x20] ss:$0 sps:$4 sm:$0x11]  }
 0x1b0   : > { %v8547_v62 = vld [vmem:[#allocation4 + $0x18] sm:$0xff]   ;;  %6305 = vrot.lane.b32.xlu0 %v8546_v61, %s8808_s27  ;;  %v8550_v2 = vld [vmem:[#allocation4 + $0xc] sm:$0xff]   ;;  %v6083_v27 = vrot.slane %v8549_v1, 1  ;;  %v8552_v5 = vld [vmem:[#allocation4 + $0x20] ss:$0 sps:$4 sm:$0x11]  }
 0x1b1   : > { %v8548_v0 = vld [vmem:[#allocation4 + $0x18] sm:$0xfe]   ;;  %5407 = vrot.lane.b32.xlu1 %v8547_v62, %s8803_s10  ;;  %v8553_v8 = vld [vmem:[#allocation4 + $0xc] sm:$0xfe]   ;;  %v6980_v12 = vrot.slane %v8552_v5, 1  ;;  %v3443_v5 = vpop.permute.xlu1 %3442 }
 0x1b2   : > { %v6082_v3 = vrot.slane %v8548_v0, 1  ;;  %v8551_v4 = vld [vmem:[#allocation4 + $0x18] sm:$0xfe]   ;;  %v8554_v40 = vld [vmem:[#allocation4 + $0x14] ss:$0 sps:$4 sm:$0x11]  }
 0x1b3   : > { %v8557_v6 = vld [vmem:[#allocation4 + $0x18] sm:$0xff]   ;;  %v6979_v53 = vrot.slane %v8551_v4, 1  ;;  %v5183_v13 = vrot.slane %v8553_v8, 1  ;;  %v5184_v14 = vrot.slane %v8554_v40, 1  ;;  %v8559_v43 = vld [vmem:[#allocation4 + $0xc] sm:$0xfe]  }
 0x1b4   : > { %v6084_v7 = vsel %vm10658_vm3, %v6082_v3, %v6083_v27  ;;  %5405 = vrot.lane.b32.xlu0 %v8550_v2, %s8803_s10  ;;  %v5659_v9 = vshrl.u32 %v8557_v6, 16  ;;  %v8555_v15 = vld [vmem:[#allocation4 + $0x18] sm:$0xfe]   ;;  %v8556_v18 = vld [vmem:[#allocation4 + $0x20] ss:$0 sps:$4 sm:$0x11]  }
 0x1b5   : > { %6129 = vrot.lane.b32.xlu1 %v6084_v7, %s8809_s28  ;;  %v6981_v63 = vsel %vm10658_vm3, %v6979_v53, %v6980_v12  ;;  %v5185_v22 = vsel %vm10658_vm3, %v5183_v13, %v5184_v14  ;;  %v5186_v50 = vrot.slane %v8555_v15, 1  ;;  %v5187_v30 = vrot.slane %v8556_v18, 1  ;;  %v8558_v31 = vld [vmem:[#allocation4 + $0x20] ss:$0 sps:$4 sm:$0x11]   ;;  %v9774_v33 = vld [vmem:[#allocation4 + $0x18] sm:$0xff]  }
 0x1b6   : > { %v8208_v17 = vpop.f32.mrb[4].mxu0  ;;  %v5661_v32 = vshll.u32 %v8557_v6, 16  ;;  %v9779_v36 = vld [vmem:[#allocation4 + $0x18] sm:$0xff]   ;;  %v5666_v45 = vshll.u32 %v8558_v31, 16  ;;  %v4772_v48 = vshrl.u32 %v9774_v33, 16  ;;  %v6079_v55 = vrot.slane %v8559_v43, 1 }
 0x1b7   : > { %v3740_v19 = vmul.f32 %v8208_v17, %v9706_v25  ;;  %v3616_v21 = vpop.f32.mrb[5].mxu0  ;;  %v5188_v24 = vsel %vm10658_vm3, %v5186_v50, %v5187_v30  ;;  %v8560_v47 = vld [vmem:[#allocation4 + $0x14] ss:$0 sps:$4 sm:$0x11]   ;;  %v4774_v1 = vshll.u32 %v9774_v33, 16  ;;  %v6547_v2 = vshrl.u32 %v9779_v36, 16 }
 0x1b8   : > { %7027 = vrot.lane.b32.xlu0 %v6981_v63, %s8810_s29  ;;  %v3738_v29 = vmul.f32 %v9706_v25, %v3616_v21  ;;  %v8209_v35 = vpop.f32.mrb[6].mxu0  ;;  %v5663_v41 = vrot.slane %v5661_v32, 1  ;;  %v5668_v59 = vrot.slane %v5666_v45, 1  ;;  %v6080_v60 = vrot.slane %v8560_v47, 1  ;;  %v3491_v6 = vld [vmem:[#allocation3 + $0x70] sm:$0xff]  ;;  %3476 = vst.msk [vmem:[#allocation3 + $0x78] sm:$0xff] %vm10679_vm14, %v3443_v5 }
 0x1b9   : > { %5230 = vrot.lane.b32.xlu1 %v5185_v22, %s8806_s13  ;;  %v3779_v34 = vadd.f32 %v9711_v58, %v3740_v19  ;;  %v3741_v39 = vmul.f32 %v8209_v35, %v9706_v25  ;;  %v3619_v16 = vpop.f32.mrb[7].mxu0  ;;  %v8562_v0 = vld [vmem:[#allocation4 + $0x20] ss:$0 sps:$4 sm:$0x11]   ;;  %v4335_v7 = vld [vmem:[#allocation4 + $0x30] sm:$0xf]  ;;  %8230 = vmatprep.mubr.msk.bf16.mxu0 %vm3513_vm2, %v3491_v6 }
 0x1ba   : > { %v3777_v37 = vadd.f32 %v9711_v58, %v3738_v29  ;;  %v3739_v42 = vmul.f32 %v9706_v25, %v3619_v16  ;;  %v5664_v54 = vor.u32 %v5663_v41, %v5659_v9  ;;  %v6081_v11 = vsel %vm10658_vm3, %v6079_v55, %v6080_v60  ;;  %v4328_v12 = vld [vmem:[#allocation4 + $0x24] sm:$0xf]  ;;  %v8564_v15 = vld [vmem:[#allocation4 + $0x20] ss:$0 sps:$4 sm:$0x11]   ;;  %v8565_v29 = vld [vmem:[#allocation4 + $0xc] sm:$0xff]  }
 0x1bb   : > { %v3811_v44 = vmax.f32 %v3779_v34, 0.0  ;;  %v3780_v52 = vadd.f32 %v9711_v58, %v3741_v39  ;;  %v4776_v13 = vrot.slane %v4774_v1, 1  ;;  %v4779_v14 = vshll.u32 %v8562_v0, 16  ;;  %v4339_v50 = vld [vmem:[#allocation4 + $0x38] sm:$0x1]  ;;  %v8633_v30 = vld [vmem:[#allocation4] sm:$0xff]  }
 0x1bc   : > { %5232 = vrot.lane.b32.xlu0 %v5188_v24, %s8806_s13  ;;  %v3809_v51 = vmax.f32 %v3777_v37, 0.0  ;;  %v3778_v57 = vadd.f32 %v9711_v58, %v3739_v42  ;;  %v5669_v4 = vsel %vm1130_vm4, %v5664_v54, %v5668_v59  ;;  %v6549_v19 = vshll.u32 %v9779_v36, 16  ;;  %v4332_v34 = vld [vmem:[#allocation4 + $0x2c] sm:$0x1]  ;;  %4555 = vst.msk [vmem:[#allocation5] sm:$0xff] %vm4554_vm13, %v8633_v30  ;;  %v4940_v47 = vpop.permute.xlu0 %4939  ;;  %v8656_v60 = vld [vmem:[#allocation4 + $0x18] sm:$0xff]  }
 0x1bd   : > { %v8130_v56 = vpack.c.bf16 %v3811_v44, %v3811_v44  ;;  %v3812_v62 = vmax.f32 %v3780_v52, 0.0  ;;  %5840 = vrot.lane.b32.xlu1 %v5669_v4, %s8805_s12  ;;  %v4777_v35 = vor.u32 %v4776_v13, %v4772_v48  ;;  %v8567_v37 = vld [vmem:[#allocation4 + $0xc] sm:$0xff]   ;;  %v4781_v24 = vrot.slane %v4779_v14, 1  ;;  %v8566_v36 = vld [vmem:[#allocation4 + $0x14] ss:$0 sps:$4 sm:$0x11]  }
 0x1be   : > { %v8128_v61 = vpack.c.bf16 %v3809_v51, %v3809_v51  ;;  %v3810_v27 = vmax.f32 %v3778_v57, 0.0  ;;  %v6551_v41 = vrot.slane %v6549_v19, 1  ;;  %v6554_v45 = vshll.u32 %v8564_v15, 16  ;;  %v8568_v54 = vld [vmem:[#allocation4 + $0x14] ss:$0 sps:$4 sm:$0x11]  }
 0x1bf   : > { %v4041_v46 = vshrl.u32 %v8130_v56, 16  ;;  %v4044_v3 = vshll.u32 %v8130_v56, 16  ;;  %v8131_v40 = vpack.c.bf16 %v3812_v62, %v3812_v62  ;;  %v4782_v51 = vsel %vm1130_vm4, %v4777_v35, %v4781_v24  ;;  %v3492_v55 = vld [vmem:[#allocation3 + $0x78] sm:$0xff]  ;;  %4557 = vst.msk [vmem:[#allocation5 + $0x10] sm:$0xff] %vm4554_vm13, %v8656_v60 }
 0x1c0   : > { %v4024_v53 = vshrl.u32 %v8128_v61, 16  ;;  %v4027_v8 = vshll.u32 %v8128_v61, 16  ;;  %v8129_v9 = vpack.c.bf16 %v3810_v27, %v3810_v27  ;;  %6127 = vrot.lane.b32.xlu0 %v6081_v11, %s8809_s28  ;;  %v6552_v52 = vor.u32 %v6551_v41, %v6547_v2  ;;  %8231 = vmatmul.mubr.msk.bf16.gmra.mrb[28].mxu0 %vm3513_vm2, %v3492_v55  ;;  %v8659_v27 = vld [vmem:[#allocation4 + $0xc] sm:$0xff]  }
 0x1c1   : > { %v4043_v10 = vrot.slane %v4041_v46, 7  ;;  %v4049_v63 = vshrl.u32 %v8131_v40, 16  ;;  %v4052_v18 = vshll.u32 %v8131_v40, 16  ;;  %4943 = vrot.lane.b32.xlu1 %v4782_v51, %s8800_s30  ;;  %v6556_v59 = vrot.slane %v6554_v45, 1  ;;  %v5229_v40 = vpop.permute.xlu0 %5228  ;;  %4556 = vst.msk [vmem:[#allocation5 + $0x8] sm:$0xff] %vm4554_vm13, %v8659_v27 }
 0x1c2   : > { %v4026_v17 = vrot.slane %v4024_v53, 7  ;;  %v4032_v26 = vshrl.u32 %v8129_v9, 16  ;;  %v4035_v28 = vshll.u32 %v8129_v9, 16  ;;  %v4762_v0 = vshll.u32 %v8565_v29, 16 }
 0x1c3   : > { %v4046_v21 = vor.u32 %v4044_v3, %v4043_v10  ;;  %v4047_v22 = vrot.slane %v4043_v10, 4  ;;  %v4051_v33 = vrot.slane %v4049_v63, 7  ;;  %v4767_v1 = vshll.u32 %v8566_v36, 16 }
 0x1c4   : > { %v4029_v31 = vor.u32 %v4027_v8, %v4026_v17  ;;  %v4030_v32 = vrot.slane %v4026_v17, 4  ;;  %v4034_v16 = vrot.slane %v4032_v26, 7  ;;  %v6557_v2 = vsel %vm1130_vm4, %v6552_v52, %v6556_v59 }
 0x1c5   : > { %v4336_v39 = vsel %vm9731_vm6, %v4046_v21, %v4335_v7  ;;  %v4054_v44 = vor.u32 %v4052_v18, %v4051_v33  ;;  %v4056_v42 = vrot.slane %v4051_v33, 4  ;;  %v5649_v46 = vshll.u32 %v8567_v37, 16  ;;  %6738 = vrot.lane.b32.xlu0 %v6557_v2, %s8811_s8 }
 0x1c6   : > { %4337 = vst [vmem:[#allocation4 + $0x30] sm:$0xf] %v4336_v39  ;;  %v4329_v43 = vsel %vm9731_vm6, %v4029_v31, %v4328_v12  ;;  %v4037_v48 = vor.u32 %v4035_v28, %v4034_v16  ;;  %v4039_v49 = vrot.slane %v4034_v16, 4  ;;  %v5654_v3 = vshll.u32 %v8568_v54, 16 }
 0x1c7   : > { %4330 = vst [vmem:[#allocation4 + $0x24] sm:$0xf] %v4329_v43  ;;  %v4055_v56 = vsel %vm8986_vm7, %v4047_v22, %v4054_v44  ;;  %v4340_v57 = vsel %vm9739_vm10, %v4056_v42, %v4339_v50  ;;  %v4760_v4 = vshrl.u32 %v8565_v29, 16  ;;  %v4764_v5 = vrot.slane %v4762_v0, 1 }
 0x1c8   : > { %4338 = vst.msk [vmem:[#allocation4 + $0x34] sm:$0xf] %vm3837_vm0, %v4055_v56  ;;  %4341 = vst [vmem:[#allocation4 + $0x38] sm:$0x1] %v4340_v57  ;;  %v4038_v61 = vsel %vm8986_vm7, %v4030_v32, %v4037_v48  ;;  %v4333_v62 = vsel %vm9739_vm10, %v4039_v49, %v4332_v34  ;;  %vm4987_vm2 = vcmask 130112   ;;  %v4769_v6 = vrot.slane %v4767_v1, 1 }
 0x1c9   : > { %4331 = vst.msk [vmem:[#allocation4 + $0x28] sm:$0xf] %vm3837_vm0, %v4038_v61  ;;  %4334 = vst [vmem:[#allocation4 + $0x2c] sm:$0x1] %v4333_v62  ;;  %v5647_v7 = vshrl.u32 %v8567_v37, 16  ;;  %v5651_v53 = vrot.slane %v5649_v46, 1  ;;  %v4765_v11 = vor.u32 %v4764_v5, %v4760_v4 }
 0x1ca   : > { %v5656_v8 = vrot.slane %v5654_v3, 1  ;;  %4988 = vst.msk [vmem:[#allocation5] sm:$0xff] %vm4987_vm2, %v4940_v47  ;;  %vm7144_vm14 = vcmask 588800  }
 0x1cb   : > { %5277 = vst.msk [vmem:[#allocation5] sm:$0xff] %vm5276_vm15, %v5229_v40  ;;  %v5652_v10 = vor.u32 %v5651_v53, %v5647_v7  ;;  %v4770_v12 = vsel %vm1130_vm4, %v4765_v11, %v4769_v6 }
 0x1cc   : > { %4941 = vrot.lane.b32.xlu1 %v4770_v12, %s8800_s30 }
 0x1cd   : > { %v5657_v9 = vsel %vm1130_vm4, %v5652_v10, %v5656_v8 }
 0x1ce   : > { %5838 = vrot.lane.b32.xlu0 %v5657_v9, %s8805_s12 }
 0x1cf   : > { %v8569_v13 = vld [vmem:[#allocation4 + $0x30] sm:$0xff]   ;;  %v8574_v63 = vld [vmem:[#allocation4 + $0x38] ss:$0 sps:$4 sm:$0x11]  }
 0x1d0   : > { %v8570_v14 = vld [vmem:[#allocation4 + $0x30] sm:$0xff]   ;;  %v8571_v17 = vld [vmem:[#allocation4 + $0x24] sm:$0xff]   ;;  %v8576_v50 = vld [vmem:[#allocation4 + $0x38] ss:$0 sps:$4 sm:$0x11]   ;;  %v6089_v26 = vrot.slane %v8574_v63, 1 }
 0x1d1   : > { %v8573_v15 = vld [vmem:[#allocation4 + $0x30] sm:$0xfe]   ;;  %5411 = vrot.lane.b32.xlu1 %v8570_v14, %s8803_s10  ;;  %v8572_v19 = vld [vmem:[#allocation4 + $0x24] sm:$0xff]   ;;  %v6986_v31 = vrot.slane %v8576_v50, 1 }
 0x1d2   : > { %v9828_v18 = vld [vmem:[#allocation4 + $0x30] sm:$0xff]   ;;  %6309 = vrot.lane.b32.xlu0 %v8569_v13, %s8808_s27  ;;  %v6088_v21 = vrot.slane %v8573_v15, 1  ;;  %v8578_v37 = vld [vmem:[#allocation4 + $0x38] ss:$0 sps:$4 sm:$0x11]  }
 0x1d3   : > { %v8575_v22 = vld [vmem:[#allocation4 + $0x30] sm:$0xfe]   ;;  %v5683_v28 = vshrl.u32 %v9828_v18, 16  ;;  %v5685_v33 = vshll.u32 %v9828_v18, 16  ;;  %v8579_v41 = vld [vmem:[#allocation4 + $0x24] sm:$0xfe]  }
 0x1d4   : > { %v6985_v30 = vrot.slane %v8575_v22, 1  ;;  %v8577_v32 = vld [vmem:[#allocation4 + $0x30] sm:$0xfe]   ;;  %v5193_v42 = vrot.slane %v8578_v37, 1  ;;  %v6090_v51 = vsel %vm10658_vm3, %v6088_v21, %v6089_v26  ;;  %v5189_v52 = vrot.slane %v8579_v41, 1 }
 0x1d5   : > { %6307 = vrot.lane.b32.xlu1 %v8571_v17, %s8808_s27  ;;  %v5192_v24 = vrot.slane %v8577_v32, 1  ;;  %v8580_v45 = vld [vmem:[#allocation4 + $0x2c] ss:$0 sps:$4 sm:$0x11]   ;;  %v5687_v47 = vrot.slane %v5685_v33, 1  ;;  %v9842_v54 = vld [vmem:[#allocation4 + $0x30] sm:$0xff]  }
 0x1d6   : > { %v8212_v29 = vpop.f32.mrb[8].mxu0  ;;  %5409 = vrot.lane.b32.xlu0 %v8572_v19, %s8803_s10  ;;  %v6987_v57 = vsel %vm10658_vm3, %v6985_v30, %v6986_v31  ;;  %v5190_v59 = vrot.slane %v8580_v45, 1  ;;  %v8581_v60 = vld [vmem:[#allocation4 + $0x24] sm:$0xfe]   ;;  %v4796_v6 = vshrl.u32 %v9842_v54, 16 }
 0x1d7   : > { %v3744_v34 = vmul.f32 %v8212_v29, %v9706_v25  ;;  %v3632_v35 = vpop.f32.mrb[9].mxu0  ;;  %v6982_v46 = vrot.slane %v8581_v60, 1  ;;  %v8584_v5 = vld [vmem:[#allocation4 + $0x38] ss:$0 sps:$4 sm:$0x11]   ;;  %v5194_v40 = vsel %vm10658_vm3, %v5192_v24, %v5193_v42  ;;  %v5688_v9 = vor.u32 %v5687_v47, %v5683_v28  ;;  %v8591_v42 = vld [vmem:[#allocation4 + $0x24] sm:$0xff]  }
 0x1d8   : > { %v3742_v39 = vmul.f32 %v9706_v25, %v3632_v35  ;;  %v8213_v16 = vpop.f32.mrb[10].mxu0  ;;  %v5191_v2 = vsel %vm10658_vm3, %v5189_v52, %v5190_v59  ;;  %v8585_v13 = vld [vmem:[#allocation4 + $0x24] sm:$0xfe]   ;;  %v4342_v15 = vld [vmem:[#allocation4 + $0x3c] sm:$0xf]  ;;  %v5690_v18 = vshll.u32 %v8584_v5, 16 }
 0x1d9   : > { %v3783_v36 = vadd.f32 %v9711_v58, %v3744_v34  ;;  %v3745_v43 = vmul.f32 %v8213_v16, %v9706_v25  ;;  %v3635_v44 = vpop.f32.mrb[11].mxu0  ;;  %6133 = vrot.lane.b32.xlu1 %v6090_v51, %s8809_s28  ;;  %v4353_v21 = vld [vmem:[#allocation4 + $0x50] sm:$0x1]  ;;  %v8586_v29 = vld [vmem:[#allocation4 + $0x2c] ss:$0 sps:$4 sm:$0x11]  }
 0x1da   : > { %v3781_v48 = vadd.f32 %v9711_v58, %v3742_v39  ;;  %v3743_v49 = vmul.f32 %v9706_v25, %v3635_v44  ;;  %7031 = vrot.lane.b32.xlu0 %v6987_v57, %s8810_s29  ;;  %v8582_v25 = vld [vmem:[#allocation4 + $0x2c] ss:$0 sps:$4 sm:$0x11]   ;;  %v4346_v33 = vld [vmem:[#allocation4 + $0x44] sm:$0x1]  ;;  %v5692_v34 = vrot.slane %v5690_v18, 1 }
 0x1db   : > { %v3815_v55 = vmax.f32 %v3783_v36, 0.0  ;;  %v3784_v56 = vadd.f32 %v9711_v58, %v3745_v43  ;;  %v6983_v4 = vrot.slane %v8582_v25, 1  ;;  %v8589_v35 = vld [vmem:[#allocation4 + $0x30] sm:$0xff]   ;;  %v6085_v16 = vrot.slane %v8585_v13, 1  ;;  %v8593_v25 = vld [vmem:[#allocation4 + $0x24] sm:$0xff]  }
 0x1dc   : > { %v3813_v61 = vmax.f32 %v3781_v48, 0.0  ;;  %v3782_v62 = vadd.f32 %v9711_v58, %v3743_v49  ;;  %v4349_v58 = vld [vmem:[#allocation4 + $0x48] sm:$0xf]  ;;  %v8588_v24 = vld [vmem:[#allocation4 + $0x38] ss:$0 sps:$4 sm:$0x11]   ;;  %v5693_v44 = vsel %vm1130_vm4, %v5688_v9, %v5692_v34 }
 0x1dd   : > { %v8134_v0 = vpack.c.bf16 %v3815_v55, %v3815_v55  ;;  %v3816_v1 = vmax.f32 %v3784_v56, 0.0  ;;  %5234 = vrot.lane.b32.xlu1 %v5191_v2, %s8806_s13  ;;  %v6984_v26 = vsel %vm10658_vm3, %v6982_v46, %v6983_v4  ;;  %v6086_v49 = vrot.slane %v8586_v29, 1  ;;  %v8590_v57 = vld [vmem:[#allocation4 + $0x38] ss:$0 sps:$4 sm:$0x11]   ;;  %v8595_v46 = vld [vmem:[#allocation4 + $0x24] sm:$0xff]  }
 0x1de   : > { %v8132_v3 = vpack.c.bf16 %v3813_v61, %v3813_v61  ;;  %v3814_v27 = vmax.f32 %v3782_v62, 0.0  ;;  %5236 = vrot.lane.b32.xlu0 %v5194_v40, %s8806_s13  ;;  %v4798_v55 = vshll.u32 %v9842_v54, 16  ;;  %v4803_v56 = vshll.u32 %v8588_v24, 16 }
 0x1df   : > { %v4075_v7 = vshrl.u32 %v8134_v0, 16  ;;  %v4078_v53 = vshll.u32 %v8134_v0, 16  ;;  %v8135_v8 = vpack.c.bf16 %v3816_v1, %v3816_v1  ;;  %v6087_v61 = vsel %vm10658_vm3, %v6085_v16, %v6086_v49 }
 0x1e0   : > { %v4058_v11 = vshrl.u32 %v8132_v3, 16  ;;  %v4061_v10 = vshll.u32 %v8132_v3, 16  ;;  %v8133_v12 = vpack.c.bf16 %v3814_v27, %v3814_v27  ;;  %v6571_v62 = vshrl.u32 %v8589_v35, 16  ;;  %v8592_v27 = vld [vmem:[#allocation4 + $0x2c] ss:$0 sps:$4 sm:$0x11]  }
 0x1e1   : > { %v4077_v14 = vrot.slane %v4075_v7, 7  ;;  %v4083_v17 = vshrl.u32 %v8135_v8, 16  ;;  %v4086_v63 = vshll.u32 %v8135_v8, 16  ;;  %5844 = vrot.lane.b32.xlu1 %v5693_v44, %s8805_s12  ;;  %v4800_v0 = vrot.slane %v4798_v55, 1 }
 0x1e2   : > { %v4060_v19 = vrot.slane %v4058_v11, 7  ;;  %v4066_v22 = vshrl.u32 %v8133_v12, 16  ;;  %v4069_v50 = vshll.u32 %v8133_v12, 16  ;;  %7029 = vrot.lane.b32.xlu0 %v6984_v26, %s8810_s29  ;;  %v6573_v1 = vshll.u32 %v8589_v35, 16 }
 0x1e3   : > { %v4080_v30 = vor.u32 %v4078_v53, %v4077_v14  ;;  %v4081_v31 = vrot.slane %v4077_v14, 4  ;;  %v4085_v32 = vrot.slane %v4083_v17, 7  ;;  %v6578_v2 = vshll.u32 %v8590_v57, 16  ;;  %v8594_v11 = vld [vmem:[#allocation4 + $0x2c] ss:$0 sps:$4 sm:$0x11]  }
 0x1e4   : > { %v4063_v28 = vor.u32 %v4061_v10, %v4060_v19  ;;  %v4064_v37 = vrot.slane %v4060_v19, 4  ;;  %v4068_v39 = vrot.slane %v4066_v22, 7  ;;  %v4805_v3 = vrot.slane %v4803_v56, 1 }
 0x1e5   : > { %v4350_v41 = vsel %vm9731_vm6, %v4080_v30, %v4349_v58  ;;  %v4088_v36 = vor.u32 %v4086_v63, %v4085_v32  ;;  %v4090_v43 = vrot.slane %v4085_v32, 4  ;;  %v6559_v4 = vshrl.u32 %v8591_v42, 16  ;;  %v8596_v63 = vld [vmem:[#allocation4 + $0x2c] ss:$0 sps:$4 sm:$0x11]  }
 0x1e6   : > { %4351 = vst [vmem:[#allocation4 + $0x48] sm:$0xf] %v4350_v41  ;;  %v4343_v45 = vsel %vm9731_vm6, %v4063_v28, %v4342_v15  ;;  %v4071_v47 = vor.u32 %v4069_v50, %v4068_v39  ;;  %v4073_v48 = vrot.slane %v4068_v39, 4  ;;  %6131 = vrot.lane.b32.xlu0 %v6087_v61, %s8809_s28  ;;  %v6561_v5 = vshll.u32 %v8591_v42, 16 }
 0x1e7   : > { %4344 = vst [vmem:[#allocation4 + $0x3c] sm:$0xf] %v4343_v45  ;;  %v4089_v51 = vsel %vm8986_vm7, %v4081_v31, %v4088_v36  ;;  %v4354_v52 = vsel %vm9739_vm10, %v4090_v43, %v4353_v21  ;;  %v4801_v7 = vor.u32 %v4800_v0, %v4796_v6  ;;  %v6575_v53 = vrot.slane %v6573_v1, 1 }
 0x1e8   : > { %4352 = vst.msk [vmem:[#allocation4 + $0x4c] sm:$0xf] %vm3837_vm0, %v4089_v51  ;;  %4355 = vst [vmem:[#allocation4 + $0x50] sm:$0x1] %v4354_v52  ;;  %v4072_v59 = vsel %vm8986_vm7, %v4064_v37, %v4071_v47  ;;  %v4347_v60 = vsel %vm9739_vm10, %v4073_v48, %v4346_v33  ;;  %v6580_v8 = vrot.slane %v6578_v2, 1  ;;  %v6563_v40 = vrot.slane %v6561_v5, 1 }
 0x1e9   : > { %4345 = vst.msk [vmem:[#allocation4 + $0x40] sm:$0xf] %vm3837_vm0, %v4072_v59  ;;  %4348 = vst [vmem:[#allocation4 + $0x44] sm:$0x1] %v4347_v60  ;;  %v6566_v58 = vshll.u32 %v8592_v27, 16  ;;  %v5673_v10 = vshll.u32 %v8593_v25, 16  ;;  %v4806_v12 = vsel %vm1130_vm4, %v4801_v7, %v4805_v3  ;;  %v6576_v9 = vor.u32 %v6575_v53, %v6571_v62 }
 0x1ea   : > { %4947 = vrot.lane.b32.xlu1 %v4806_v12, %s8800_s30  ;;  %v6564_v13 = vor.u32 %v6563_v40, %v6559_v4  ;;  %v5671_v14 = vshrl.u32 %v8593_v25, 16  ;;  %v5678_v17 = vshll.u32 %v8594_v11, 16  ;;  %v4786_v6 = vshll.u32 %v8595_v46, 16  ;;  %v9900_v62 = vld [vmem:[%s10649_s2] ss:$0 sm:$0xff] }
 0x1eb   : > { %v5675_v15 = vrot.slane %v5673_v10, 1  ;;  %v6581_v18 = vsel %vm1130_vm4, %v6576_v9, %v6580_v8  ;;  %v6568_v54 = vrot.slane %v6566_v58, 1  ;;  %v4784_v21 = vshrl.u32 %v8595_v46, 16  ;;  %v9908_v7 = vld [vmem:[%s10650_s3] ss:$0 sm:$0xff] }
 0x1ec   : > { %6742 = vrot.lane.b32.xlu0 %v6581_v18, %s8811_s8  ;;  %v4791_v22 = vshll.u32 %v8596_v63, 16  ;;  %v5680_v26 = vrot.slane %v5678_v17, 1  ;;  %v4788_v29 = vrot.slane %v4786_v6, 1 }
 0x1ed   : > { %v5676_v19 = vor.u32 %v5675_v15, %v5671_v14  ;;  %v6569_v50 = vsel %vm1130_vm4, %v6564_v13, %v6568_v54 }
 0x1ee   : > { %6740 = vrot.lane.b32.xlu1 %v6569_v50, %s8811_s8  ;;  %v4793_v30 = vrot.slane %v4791_v22, 1  ;;  %v4789_v33 = vor.u32 %v4788_v29, %v4784_v21 }
 0x1ef   : > { %v8597_v31 = vld [vmem:[#allocation4 + $0x48] sm:$0xff]   ;;  %v5681_v32 = vsel %vm1130_vm4, %v5676_v19, %v5680_v26  ;;  %v8602_v28 = vld [vmem:[#allocation4 + $0x50] ss:$0 sps:$4 sm:$0x11]  }
 0x1f0   : > { %5842 = vrot.lane.b32.xlu0 %v5681_v32, %s8805_s12  ;;  %v8601_v34 = vld [vmem:[#allocation4 + $0x48] sm:$0xfe]   ;;  %v4794_v35 = vsel %vm1130_vm4, %v4789_v33, %v4793_v30  ;;  %v8604_v41 = vld [vmem:[#allocation4 + $0x50] ss:$0 sps:$4 sm:$0x11]   ;;  %v8600_v36 = vld [vmem:[#allocation4 + $0x3c] sm:$0xff]  }
 0x1f1   : > { %v9886_v37 = vld [vmem:[#allocation4 + $0x48] sm:$0xff]   ;;  %v6094_v24 = vrot.slane %v8601_v34, 1  ;;  %v6095_v43 = vrot.slane %v8602_v28, 1  ;;  %v8606_v45 = vld [vmem:[#allocation4 + $0x50] ss:$0 sps:$4 sm:$0x11]  }
 0x1f2   : > { %4945 = vrot.lane.b32.xlu1 %v4794_v35, %s8800_s30  ;;  %v8598_v39 = vld [vmem:[#allocation4 + $0x48] sm:$0xff]   ;;  %v5707_v47 = vshrl.u32 %v9886_v37, 16  ;;  %v8599_v48 = vld [vmem:[#allocation4 + $0x3c] sm:$0xff]   ;;  %v6992_v49 = vrot.slane %v8604_v41, 1  ;;  %v5709_v56 = vshll.u32 %v9886_v37, 16  ;;  %v5199_v60 = vrot.slane %v8606_v45, 1 }
 0x1f3   : > { %v8603_v16 = vld [vmem:[#allocation4 + $0x48] sm:$0xfe]   ;;  %v8607_v52 = vld [vmem:[#allocation4 + $0x3c] sm:$0xfe]   ;;  %v6096_v58 = vsel %vm10658_vm3, %v6094_v24, %v6095_v43 }
 0x1f4   : > { %6313 = vrot.lane.b32.xlu0 %v8597_v31, %s8808_s27  ;;  %v6991_v44 = vrot.slane %v8603_v16, 1  ;;  %v8605_v42 = vld [vmem:[#allocation4 + $0x48] sm:$0xfe]   ;;  %v8608_v55 = vld [vmem:[#allocation4 + $0x44] ss:$0 sps:$4 sm:$0x11]  }
 0x1f5   : > { %v5198_v51 = vrot.slane %v8605_v42, 1  ;;  %v9894_v57 = vld [vmem:[#allocation4 + $0x48] sm:$0xff]   ;;  %v8609_v61 = vld [vmem:[#allocation4 + $0x3c] sm:$0xfe]   ;;  %v5195_v1 = vrot.slane %v8607_v52, 1  ;;  %v5196_v2 = vrot.slane %v8608_v55, 1 }
 0x1f6   : > { %5415 = vrot.lane.b32.xlu1 %v8598_v39, %s8803_s10  ;;  %v8610_v46 = vld [vmem:[#allocation4 + $0x44] ss:$0 sps:$4 sm:$0x11]   ;;  %v6993_v4 = vsel %vm10658_vm3, %v6991_v44, %v6992_v49  ;;  %v5711_v5 = vrot.slane %v5709_v56, 1  ;;  %v6988_v11 = vrot.slane %v8609_v61, 1  ;;  %v4822_v54 = vshll.u32 %v9894_v57, 16 }
 0x1f7   : > { %v5200_v9 = vsel %vm10658_vm3, %v5198_v51, %v5199_v60  ;;  %v6989_v13 = vrot.slane %v8610_v46, 1  ;;  %v8612_v14 = vld [vmem:[#allocation4 + $0x50] ss:$0 sps:$4 sm:$0x11]   ;;  %v5197_v63 = vsel %vm10658_vm3, %v5195_v1, %v5196_v2  ;;  %v8613_v18 = vld [vmem:[#allocation4 + $0x3c] sm:$0xfe]  }
 0x1f8   : > { %5413 = vrot.lane.b32.xlu0 %v8600_v36, %s8803_s10  ;;  %v5714_v21 = vshll.u32 %v8612_v14, 16  ;;  %v8614_v22 = vld [vmem:[#allocation4 + $0x44] ss:$0 sps:$4 sm:$0x11]   ;;  %v4820_v50 = vshrl.u32 %v9894_v57, 16  ;;  %v5712_v30 = vor.u32 %v5711_v5, %v5707_v47  ;;  %v6091_v31 = vrot.slane %v8613_v18, 1 }
 0x1f9   : > { %v6092_v35 = vrot.slane %v8614_v22, 1  ;;  %v8616_v16 = vld [vmem:[#allocation4 + $0x50] ss:$0 sps:$4 sm:$0x11]   ;;  %v4824_v24 = vrot.slane %v4822_v54, 1  ;;  %v6990_v42 = vsel %vm10658_vm3, %v6988_v11, %v6989_v13  ;;  %v8617_v52 = vld [vmem:[#allocation4 + $0x48] sm:$0xff]  }
 0x1fa   : > { %6311 = vrot.lane.b32.xlu1 %v8599_v48, %s8808_s27  ;;  %v5716_v34 = vrot.slane %v5714_v21, 1  ;;  %v4363_v41 = vld [vmem:[#allocation4 + $0x60] sm:$0xf]  ;;  %v4356_v47 = vld [vmem:[#allocation4 + $0x54] sm:$0xf]  ;;  %v4827_v46 = vshll.u32 %v8616_v16, 16 }
 0x1fb   : > { %v8216_v59 = vpop.f32.mrb[12].mxu0  ;;  %v4367_v56 = vld [vmem:[#allocation4 + $0x68] sm:$0x1]  ;;  %v6093_v60 = vsel %vm10658_vm3, %v6091_v31, %v6092_v35  ;;  %v8618_v61 = vld [vmem:[#allocation4 + $0x50] ss:$0 sps:$4 sm:$0x11]   ;;  %v4825_v2 = vor.u32 %v4824_v24, %v4820_v50 }
 0x1fc   : > { %v3748_v25 = vmul.f32 %v9900_v62, %v8216_v59  ;;  %v3648_v0 = vpop.f32.mrb[13].mxu0  ;;  %7035 = vrot.lane.b32.xlu0 %v6993_v4, %s8810_s29  ;;  %v5717_v51 = vsel %vm1130_vm4, %v5712_v30, %v5716_v34  ;;  %v4360_v1 = vld [vmem:[#allocation4 + $0x5c] sm:$0x1]  ;;  %v8687_v18 = vld [vmem:[%s10651_s4 + $0x8] sm:$0xff]   ;;  %v6602_v21 = vshll.u32 %v8618_v61, 16 }
 0x1fd   : > { %v3746_v3 = vmul.f32 %v9900_v62, %v3648_v0  ;;  %v8217_v27 = vpop.f32.mrb[14].mxu0  ;;  %v8690_v22 = vld [vmem:[#allocation4 + $0x30] sm:$0xff]   ;;  %v8622_v31 = vld [vmem:[#allocation4 + $0x44] ss:$0 sps:$4 sm:$0x11]  }
 0x1fe   : > { %v3787_v53 = vadd.f32 %v9908_v7, %v3748_v25  ;;  %v3749_v8 = vmul.f32 %v9900_v62, %v8217_v27  ;;  %v3651_v40 = vpop.f32.mrb[15].mxu0  ;;  %6137 = vrot.lane.b32.xlu1 %v6096_v58, %s8809_s28  ;;  %4559 = vst.msk [vmem:[#allocation5 + $0x20] sm:$0xff] %vm4554_vm13, %v8690_v22 }
 0x1ff   : > { %v3785_v10 = vadd.f32 %v9908_v7, %v3746_v3  ;;  %v3747_v12 = vmul.f32 %v9900_v62, %v3651_v40  ;;  %v8619_v3 = vld [vmem:[#allocation4 + $0x3c] sm:$0xff]   ;;  %v8684_v40 = vld [vmem:[%s10651_s4] sm:$0xff]  }
 0x200   : > { %v3819_v15 = vmax.f32 %v3787_v53, 0.0  ;;  %v3788_v17 = vadd.f32 %v9908_v7, %v3749_v8  ;;  %5240 = vrot.lane.b32.xlu0 %v5200_v9, %s8806_s13  ;;  %v8621_v8 = vld [vmem:[#allocation4 + $0x3c] sm:$0xff]   ;;  %8234 = vmatprep.subr.bf16.mxu1 %v8684_v40  ;;  %v6585_v34 = vshll.u32 %v8619_v3, 16  ;;  %v6583_v16 = vshrl.u32 %v8619_v3, 16 }
 0x201   : > { %v3817_v6 = vmax.f32 %v3785_v10, 0.0  ;;  %v3786_v19 = vadd.f32 %v9908_v7, %v3747_v12  ;;  %v4829_v12 = vrot.slane %v4827_v46, 1  ;;  %8235 = vmatpush3.bf16.msra.mxu1 %v8684_v40 }
 0x202   : > { %v8138_v26 = vpack.c.bf16 %v3819_v15, %v3819_v15  ;;  %v3820_v29 = vmax.f32 %v3788_v17, 0.0  ;;  %5238 = vrot.lane.b32.xlu1 %v5197_v63, %s8806_s13  ;;  %v6597_v15 = vshll.u32 %v8617_v52, 16  ;;  %v8620_v17 = vld [vmem:[#allocation4 + $0x44] ss:$0 sps:$4 sm:$0x11]   ;;  %v8623_v63 = vld [vmem:[#allocation4 + $0x3c] sm:$0xff]   ;;  %8236 = vmatprep.subr.bf16.mxu1 %v8687_v18 }
 0x203   : > { %v8136_v32 = vpack.c.bf16 %v3817_v6, %v3817_v6  ;;  %v3818_v33 = vmax.f32 %v3786_v19, 0.0  ;;  %v4830_v19 = vsel %vm1130_vm4, %v4825_v2, %v4829_v12  ;;  %v6590_v35 = vshll.u32 %v8620_v17, 16 }
 0x204   : > { %v4109_v28 = vshrl.u32 %v8138_v26, 16  ;;  %v4112_v37 = vshll.u32 %v8138_v26, 16  ;;  %v8139_v39 = vpack.c.bf16 %v3820_v29, %v3820_v29  ;;  %7033 = vrot.lane.b32.xlu0 %v6990_v42, %s8810_s29  ;;  %v6595_v29 = vshrl.u32 %v8617_v52, 16 }
 0x205   : > { %v4092_v36 = vshrl.u32 %v8136_v32, 16  ;;  %v4095_v43 = vshll.u32 %v8136_v32, 16  ;;  %v8137_v44 = vpack.c.bf16 %v3818_v33, %v3818_v33  ;;  %v6599_v30 = vrot.slane %v6597_v15, 1  ;;  %v8691_v32 = vld [vmem:[%s10651_s4 + $0x10] sm:$0xff]   ;;  %8237 = vmatpush3.bf16.msra.mxu1 %v8687_v18 }
 0x206   : > { %v4111_v45 = vrot.slane %v4109_v28, 7  ;;  %v4117_v48 = vshrl.u32 %v8139_v39, 16  ;;  %v4120_v49 = vshll.u32 %v8139_v39, 16  ;;  %5848 = vrot.lane.b32.xlu1 %v5717_v51, %s8805_s12  ;;  %v6604_v33 = vrot.slane %v6602_v21, 1  ;;  %8238 = vmatprep.subr.bf16.mxu1 %v8691_v32 }
 0x207   : > { %v4094_v55 = vrot.slane %v4092_v36, 7  ;;  %v4100_v57 = vshrl.u32 %v8137_v44, 16  ;;  %v4103_v59 = vshll.u32 %v8137_v44, 16  ;;  %v6600_v28 = vor.u32 %v6599_v30, %v6595_v29  ;;  %v8624_v36 = vld [vmem:[#allocation4 + $0x44] ss:$0 sps:$4 sm:$0x11]  }
 0x208   : > { %v4114_v25 = vor.u32 %v4112_v37, %v4111_v45  ;;  %v4119_v0 = vrot.slane %v4117_v48, 7  ;;  %v4115_v27 = vrot.slane %v4111_v45, 4  ;;  %6135 = vrot.lane.b32.xlu0 %v6093_v60, %s8809_s28  ;;  %v5697_v37 = vshll.u32 %v8621_v8, 16 }
 0x209   : > { %v4097_v4 = vor.u32 %v4095_v43, %v4094_v55  ;;  %v4098_v5 = vrot.slane %v4094_v55, 4  ;;  %v4102_v53 = vrot.slane %v4100_v57, 7  ;;  %v5702_v39 = vshll.u32 %v8622_v31, 16  ;;  %8239 = vmatpush3.bf16.msra.mxu1 %v8691_v32 }
 0x20a   : > { %v4364_v58 = vsel %vm9731_vm6, %v4114_v25, %v4363_v41  ;;  %v4122_v11 = vor.u32 %v4120_v49, %v4119_v0  ;;  %v4124_v10 = vrot.slane %v4119_v0, 4  ;;  %4951 = vrot.lane.b32.xlu1 %v4830_v19, %s8800_s30  ;;  %v6587_v24 = vrot.slane %v6585_v34, 1 }
 0x20b   : > { %4365 = vst [vmem:[#allocation4 + $0x60] sm:$0xf] %v4364_v58  ;;  %v4357_v9 = vsel %vm9731_vm6, %v4097_v4, %v4356_v47  ;;  %v4105_v13 = vor.u32 %v4103_v59, %v4102_v53  ;;  %v4107_v14 = vrot.slane %v4102_v53, 4  ;;  %v5695_v41 = vshrl.u32 %v8621_v8, 16  ;;  %v8696_v47 = vld [vmem:[%s10651_s4 + $0x18] sm:$0xff]  }
 0x20c   : > { %4358 = vst [vmem:[#allocation4 + $0x54] sm:$0xf] %v4357_v9  ;;  %v4123_v54 = vsel %vm8986_vm7, %v4115_v27, %v4122_v11  ;;  %v4368_v6 = vsel %vm9739_vm10, %v4124_v10, %v4367_v56  ;;  %v6605_v43 = vsel %vm1130_vm4, %v6600_v28, %v6604_v33  ;;  %v6592_v44 = vrot.slane %v6590_v35, 1  ;;  %8240 = vmatprep.subr.bf16.mxu1 %v8696_v47 }
 0x20d   : > { %4366 = vst.msk [vmem:[#allocation4 + $0x64] sm:$0xf] %vm3837_vm0, %v4123_v54  ;;  %4369 = vst [vmem:[#allocation4 + $0x68] sm:$0x1] %v4368_v6  ;;  %v4106_v50 = vsel %vm8986_vm7, %v4098_v5, %v4105_v13  ;;  %v4361_v26 = vsel %vm9739_vm10, %v4107_v14, %v4360_v1  ;;  %v5699_v42 = vrot.slane %v5697_v37, 1  ;;  %v4810_v45 = vshll.u32 %v8623_v63, 16  ;;  %6746 = vrot.lane.b32.xlu0 %v6605_v43, %s8811_s8 }
 0x20e   : > { %4359 = vst.msk [vmem:[#allocation4 + $0x58] sm:$0xf] %vm3837_vm0, %v4106_v50  ;;  %4362 = vst [vmem:[#allocation4 + $0x5c] sm:$0x1] %v4361_v26  ;;  %v6588_v48 = vor.u32 %v6587_v24, %v6583_v16  ;;  %v4808_v49 = vshrl.u32 %v8623_v63, 16  ;;  %v4815_v51 = vshll.u32 %v8624_v36, 16  ;;  %8241 = vmatpush3.bf16.msra.mxu1 %v8696_v47 }
 0x20f   : > { %v5700_v52 = vor.u32 %v5699_v42, %v5695_v41  ;;  %v5704_v55 = vrot.slane %v5702_v39, 1  ;;  %v4812_v56 = vrot.slane %v4810_v45, 1 }
 0x210   : > { %v6593_v57 = vsel %vm1130_vm4, %v6588_v48, %v6592_v44  ;;  %v4817_v61 = vrot.slane %v4815_v51, 1 }
 0x211   : > { %6744 = vrot.lane.b32.xlu1 %v6593_v57, %s8811_s8  ;;  %v5705_v59 = vsel %vm1130_vm4, %v5700_v52, %v5704_v55  ;;  %v4813_v60 = vor.u32 %v4812_v56, %v4808_v49 }
 0x212   : > { %5846 = vrot.lane.b32.xlu0 %v5705_v59, %s8805_s12 }
 0x213   : > { %v4818_v1 = vsel %vm1130_vm4, %v4813_v60, %v4817_v61 }
 0x214   : > { %v8625_v25 = vld [vmem:[#allocation4 + $0x60] sm:$0xff]   ;;  %v8630_v46 = vld [vmem:[#allocation4 + $0x68] ss:$0 sps:$4 sm:$0x11]  }
 0x215   : > { %v8629_v0 = vld [vmem:[#allocation4 + $0x60] sm:$0xfe]   ;;  %4949 = vrot.lane.b32.xlu1 %v4818_v1, %s8800_s30  ;;  %v8628_v4 = vld [vmem:[#allocation4 + $0x54] sm:$0xff]   ;;  %v6101_v5 = vrot.slane %v8630_v46, 1 }
 0x216   : > { %v8626_v2 = vld [vmem:[#allocation4 + $0x60] sm:$0xff]   ;;  %v6100_v3 = vrot.slane %v8629_v0, 1  ;;  %6317 = vrot.lane.b32.xlu0 %v8625_v25, %s8808_s27  ;;  %v8632_v8 = vld [vmem:[#allocation4 + $0x68] ss:$0 sps:$4 sm:$0x11]   ;;  %v8627_v10 = vld [vmem:[#allocation4 + $0x54] sm:$0xff]  }
 0x217   : > { %v8640_v27 = vld [vmem:[#allocation4 + $0x60] sm:$0xff]   ;;  %v6998_v58 = vrot.slane %v8632_v8, 1  ;;  %v8635_v12 = vld [vmem:[#allocation4 + $0x68] ss:$0 sps:$4 sm:$0x11]  }
 0x218   : > { %v8631_v53 = vld [vmem:[#allocation4 + $0x60] sm:$0xfe]   ;;  %v5731_v9 = vshrl.u32 %v8640_v27, 16  ;;  %v8636_v14 = vld [vmem:[#allocation4 + $0x54] sm:$0xfe]   ;;  %v5733_v15 = vshll.u32 %v8640_v27, 16  ;;  %v6102_v39 = vsel %vm10658_vm3, %v6100_v3, %v6101_v5 }
 0x219   : > { %v6997_v40 = vrot.slane %v8631_v53, 1  ;;  %v8634_v11 = vld [vmem:[#allocation4 + $0x60] sm:$0xfe]   ;;  %5419 = vrot.lane.b32.xlu1 %v8626_v2, %s8803_s10  ;;  %v5205_v63 = vrot.slane %v8635_v12, 1  ;;  %v5201_v21 = vrot.slane %v8636_v14, 1 }
 0x21a   : > { %5417 = vrot.lane.b32.xlu0 %v8628_v4, %s8803_s10  ;;  %v5204_v13 = vrot.slane %v8634_v11, 1  ;;  %v8637_v18 = vld [vmem:[#allocation4 + $0x5c] ss:$0 sps:$4 sm:$0x11]   ;;  %v9975_v6 = vld [vmem:[#allocation4 + $0x60] sm:$0xff]   ;;  %v5735_v44 = vrot.slane %v5733_v15, 1 }
 0x21b   : > { %v6999_v26 = vsel %vm10658_vm3, %v6997_v40, %v6998_v58  ;;  %v5202_v29 = vrot.slane %v8637_v18, 1  ;;  %v8638_v30 = vld [vmem:[#allocation4 + $0x54] sm:$0xfe]   ;;  %v8639_v33 = vld [vmem:[#allocation4 + $0x5c] ss:$0 sps:$4 sm:$0x11]  }
 0x21c   : > { %v6994_v16 = vrot.slane %v8638_v30, 1  ;;  %v6995_v36 = vrot.slane %v8639_v33, 1  ;;  %v8641_v43 = vld [vmem:[#allocation4 + $0x68] ss:$0 sps:$4 sm:$0x11]   ;;  %v5206_v47 = vsel %vm10658_vm3, %v5204_v13, %v5205_v63  ;;  %v4844_v48 = vshrl.u32 %v9975_v6, 16 }
 0x21d   : > { %6315 = vrot.lane.b32.xlu1 %v8627_v10, %s8808_s27  ;;  %v5203_v55 = vsel %vm10658_vm3, %v5201_v21, %v5202_v29  ;;  %v8642_v57 = vld [vmem:[#allocation4 + $0x54] sm:$0xfe]   ;;  %v8643_v59 = vld [vmem:[#allocation4 + $0x5c] ss:$0 sps:$4 sm:$0x11]   ;;  %v5736_v25 = vor.u32 %v5735_v44, %v5731_v9  ;;  %v5738_v0 = vshll.u32 %v8641_v43, 16 }
 0x21e   : > { %7039 = vrot.lane.b32.xlu0 %v6999_v26, %s8810_s29  ;;  %v6996_v56 = vsel %vm10658_vm3, %v6994_v16, %v6995_v36  ;;  %v6097_v46 = vrot.slane %v8642_v57, 1  ;;  %v6098_v3 = vrot.slane %v8643_v59, 1  ;;  %v8645_v40 = vld [vmem:[#allocation4 + $0x68] ss:$0 sps:$4 sm:$0x11]   ;;  %v4846_v30 = vshll.u32 %v9975_v6, 16 }
 0x21f   : > { %v5740_v8 = vrot.slane %v5738_v0, 1  ;;  %v4377_v58 = vld [vmem:[#allocation4 + $0x78] sm:$0xf]  ;;  %v4370_v14 = vld [vmem:[#allocation4 + $0x6c] sm:$0xf] }
 0x220   : > { %v6099_v9 = vsel %vm10658_vm3, %v6097_v46, %v6098_v3  ;;  %v8650_v36 = vld [vmem:[#allocation4 + $0x54] sm:$0xff]   ;;  %v8649_v57 = vld [vmem:[#allocation4 + $0x5c] ss:$0 sps:$4 sm:$0x11]  }
 0x221   : > { %6141 = vrot.lane.b32.xlu1 %v6102_v39, %s8809_s28  ;;  %v5741_v18 = vsel %vm1130_vm4, %v5736_v25, %v5740_v8  ;;  %v8652_v25 = vld [vmem:[#allocation4 + $0x54] sm:$0xff]   ;;  %v8651_v46 = vld [vmem:[#allocation4 + $0x5c] ss:$0 sps:$4 sm:$0x11]  }
 0x222   : > { %v9971_v17 = vpop.permute.xlu0 %6305  ;;  %5244 = vrot.lane.b32.xlu0 %v5206_v47, %s8806_s13 }
 0x223   : > { %v9973_v54 = vpop.permute.xlu1 %5407 }
 0x225   : > { %5242 = vrot.lane.b32.xlu1 %v5203_v55, %s8806_s13 }
 0x226   : > { %v5406_v34 = vpop.permute.xlu0 %5405  ;;  %7037 = vrot.lane.b32.xlu0 %v6996_v56, %s8810_s29 }
 0x227   : > { %5454 = vst.msk [vmem:[#allocation5] sm:$0xff] %vm10659_vm1, %v5406_v34  ;;  %v9992_v49 = vpop.permute.xlu1 %6129  ;;  %v4374_v34 = vld [vmem:[#allocation4 + $0x74] sm:$0x1] }
 0x229   : > { %v8220_v19 = vpop.f32.mrb[16].mxu0  ;;  %5852 = vrot.lane.b32.xlu1 %v5741_v18, %s8805_s12  ;;  %v4834_v18 = vshll.u32 %v8652_v25, 16 }
 0x22a   : > { %v3752_v22 = vmul.f32 %v9900_v62, %v8220_v19  ;;  %v3664_v50 = vpop.f32.mrb[17].mxu0  ;;  %v9998_v27 = vpop.permute.xlu0 %7027  ;;  %v8646_v19 = vld [vmem:[#allocation4 + $0x60] sm:$0xff]   ;;  %6139 = vrot.lane.b32.xlu0 %v6099_v9, %s8809_s28  ;;  %v5726_v9 = vshll.u32 %v8651_v46, 16 }
 0x22b   : > { %v3750_v31 = vmul.f32 %v9900_v62, %v3664_v50  ;;  %v8221_v32 = vpop.f32.mrb[18].mxu0  ;;  %v10004_v21 = vpop.permute.xlu1 %5230  ;;  %v4381_v50 = vld [vmem:[#allocation4 + $0x80] sm:$0x1]  ;;  %v6619_v3 = vshrl.u32 %v8646_v19, 16 }
 0x22c   : > { %v3791_v35 = vadd.f32 %v9908_v7, %v3752_v22  ;;  %v3753_v28 = vmul.f32 %v9900_v62, %v8221_v32  ;;  %v3667_v37 = vpop.f32.mrb[19].mxu0 }
 0x22d   : > { %v3789_v24 = vadd.f32 %v9908_v7, %v3750_v31  ;;  %v3751_v41 = vmul.f32 %v9900_v62, %v3667_v37  ;;  %v8648_v37 = vld [vmem:[#allocation4 + $0x54] sm:$0xff]  }
 0x22e   : > { %v3823_v42 = vmax.f32 %v3791_v35, 0.0  ;;  %v3792_v45 = vadd.f32 %v9908_v7, %v3753_v28  ;;  %v4851_v35 = vshll.u32 %v8645_v40, 16  ;;  %v8647_v28 = vld [vmem:[#allocation4 + $0x68] ss:$0 sps:$4 sm:$0x11]   ;;  %v5233_v43 = vpop.permute.xlu0 %5232  ;;  %v6607_v8 = vshrl.u32 %v8648_v37, 16 }
 0x22f   : > { %v3821_v51 = vmax.f32 %v3789_v24, 0.0  ;;  %v3790_v52 = vadd.f32 %v9908_v7, %v3751_v41  ;;  %v4848_v41 = vrot.slane %v4846_v30, 1  ;;  %v10019_v0 = vpop.permute.xlu1 %5840  ;;  %v5721_v40 = vshll.u32 %v8650_v36, 16 }
 0x230   : > { %v8142_v60 = vpack.c.bf16 %v3823_v42, %v3823_v42  ;;  %v3824_v61 = vmax.f32 %v3792_v45, 0.0  ;;  %v4853_v47 = vrot.slane %v4851_v35, 1 }
 0x231   : > { %v8140_v1 = vpack.c.bf16 %v3821_v51, %v3821_v51  ;;  %v3822_v2 = vmax.f32 %v3790_v52, 0.0  ;;  %v4849_v56 = vor.u32 %v4848_v41, %v4844_v48 }
 0x232   : > { %v4143_v4 = vshrl.u32 %v8142_v60, 16  ;;  %v4146_v5 = vshll.u32 %v8142_v60, 16  ;;  %v8143_v53 = vpack.c.bf16 %v3824_v61, %v3824_v61  ;;  %v6621_v61 = vshll.u32 %v8646_v19, 16 }
 0x233   : > { %v4126_v11 = vshrl.u32 %v8140_v1, 16  ;;  %v4129_v10 = vshll.u32 %v8140_v1, 16  ;;  %v8141_v12 = vpack.c.bf16 %v3822_v2, %v3822_v2  ;;  %v4854_v48 = vsel %vm1130_vm4, %v4849_v56, %v4853_v47  ;;  %v4944_v19 = vpop.permute.xlu1 %4943 }
 0x234   : > { %v4145_v13 = vrot.slane %v4143_v4, 7  ;;  %v4151_v15 = vshrl.u32 %v8143_v53, 16  ;;  %v4154_v63 = vshll.u32 %v8143_v53, 16  ;;  %v6626_v2 = vshll.u32 %v8647_v28, 16  ;;  %4955 = vrot.lane.b32.xlu1 %v4854_v48, %s8800_s30  ;;  %4990 = vst.msk [vmem:[#allocation5 + $0x10] sm:$0xff] %vm4987_vm2, %v4944_v19 }
 0x235   : > { %v4128_v22 = vrot.slane %v4126_v11, 7  ;;  %v4134_v26 = vshrl.u32 %v8141_v12, 16  ;;  %v4137_v29 = vshll.u32 %v8141_v12, 16  ;;  %v6623_v4 = vrot.slane %v6621_v61, 1  ;;  %5279 = vst.msk [vmem:[#allocation5 + $0x10] sm:$0xff] %vm5276_vm15, %v5233_v43 }
 0x236   : > { %v4148_v31 = vor.u32 %v4146_v5, %v4145_v13  ;;  %v4149_v32 = vrot.slane %v4145_v13, 4  ;;  %v4153_v33 = vrot.slane %v4151_v15, 7  ;;  %v6609_v5 = vshll.u32 %v8648_v37, 16  ;;  %v8653_v13 = vld [vmem:[#allocation4 + $0x5c] ss:$0 sps:$4 sm:$0x11]  }
 0x237   : > { %v4131_v39 = vor.u32 %v4129_v10, %v4128_v22  ;;  %v4132_v16 = vrot.slane %v4128_v22, 4  ;;  %v4136_v24 = vrot.slane %v4134_v26, 7  ;;  %v6614_v53 = vshll.u32 %v8649_v57, 16 }
 0x238   : > { %v4378_v44 = vsel %vm9731_vm6, %v4148_v31, %v4377_v58  ;;  %v4156_v42 = vor.u32 %v4154_v63, %v4153_v33  ;;  %v4158_v45 = vrot.slane %v4153_v33, 4  ;;  %v6128_v58 = vpop.permute.xlu0 %6127  ;;  %v6624_v11 = vor.u32 %v6623_v4, %v6619_v3 }
 0x239   : > { %4379 = vst [vmem:[#allocation4 + $0x78] sm:$0xf] %v4378_v44  ;;  %v4371_v51 = vsel %vm9731_vm6, %v4131_v39, %v4370_v14  ;;  %v4139_v52 = vor.u32 %v4137_v29, %v4136_v24  ;;  %v4141_v55 = vrot.slane %v4136_v24, 4  ;;  %v6628_v10 = vrot.slane %v6626_v2, 1  ;;  %v8701_v29 = vld [vmem:[#allocation4 + $0x24] sm:$0xff]  }
 0x23a   : > { %4372 = vst [vmem:[#allocation4 + $0x6c] sm:$0xf] %v4371_v51  ;;  %v4157_v59 = vsel %vm8986_vm7, %v4149_v32, %v4156_v42  ;;  %v4382_v60 = vsel %vm9739_vm10, %v4158_v45, %v4381_v50  ;;  %v6611_v12 = vrot.slane %v6609_v5, 1  ;;  %v6616_v14 = vrot.slane %v6614_v53, 1  ;;  %4558 = vst.msk [vmem:[#allocation5 + $0x18] sm:$0xff] %vm4554_vm13, %v8701_v29 }
 0x23b   : > { %4380 = vst.msk [vmem:[#allocation4 + $0x7c] sm:$0xf] %vm3837_vm0, %v4157_v59  ;;  %4383 = vst [vmem:[#allocation4 + $0x80] sm:$0x1] %v4382_v60  ;;  %v4140_v1 = vsel %vm8986_vm7, %v4132_v16, %v4139_v52  ;;  %v4375_v6 = vsel %vm9739_vm10, %v4141_v55, %v4374_v34  ;;  %v5719_v15 = vshrl.u32 %v8650_v36, 16  ;;  %v5723_v63 = vrot.slane %v5721_v40, 1 }
 0x23c   : > { %4373 = vst.msk [vmem:[#allocation4 + $0x70] sm:$0xf] %vm3837_vm0, %v4140_v1  ;;  %4376 = vst [vmem:[#allocation4 + $0x74] sm:$0x1] %v4375_v6  ;;  %v6629_v22 = vsel %vm1130_vm4, %v6624_v11, %v6628_v10  ;;  %v6612_v50 = vor.u32 %v6611_v12, %v6607_v8  ;;  %v4839_v26 = vshll.u32 %v8653_v13, 16  ;;  %v4832_v31 = vshrl.u32 %v8652_v25, 16  ;;  %v6739_v28 = vpop.permute.xlu0 %6738 }
 0x23d   : > { %6750 = vrot.lane.b32.xlu0 %v6629_v22, %s8811_s8  ;;  %v5724_v30 = vor.u32 %v5723_v63, %v5719_v15  ;;  %v4836_v32 = vrot.slane %v4834_v18, 1  ;;  %v5728_v34 = vrot.slane %v5726_v9, 1 }
 0x23e   : > { %v6617_v33 = vsel %vm1130_vm4, %v6612_v50, %v6616_v14  ;;  %v4841_v39 = vrot.slane %v4839_v26, 1  ;;  %v4942_v44 = vpop.permute.xlu1 %4941 }
 0x23f   : > { %6748 = vrot.lane.b32.xlu1 %v6617_v33, %s8811_s8  ;;  %v4837_v35 = vor.u32 %v4836_v32, %v4832_v31  ;;  %v5729_v37 = vsel %vm1130_vm4, %v5724_v30, %v5728_v34  ;;  %4989 = vst.msk [vmem:[#allocation5 + $0x8] sm:$0xff] %vm4987_vm2, %v4942_v44 }
 0x240   : > { %v5839_v55 = vpop.permute.xlu0 %5838  ;;  %5278 = vst.msk [vmem:[#allocation5 + $0x8] sm:$0xff] %vm5276_vm15, %v10004_v21 }
 0x241   : > { %5850 = vrot.lane.b32.xlu0 %v5729_v37, %s8805_s12  ;;  %v4842_v24 = vsel %vm1130_vm4, %v4837_v35, %v4841_v39  ;;  %5887 = vst.msk [vmem:[#allocation5] sm:$0xff] %vm5886_vm5, %v5839_v55 }
 0x242   : > { %v8654_v16 = vld [vmem:[#allocation4 + $0x78] sm:$0xff]   ;;  %v8661_v43 = vld [vmem:[#allocation4 + $0x80] ss:$0 sps:$4 sm:$0x11]   ;;  %5455 = vst.msk [vmem:[#allocation5 + $0x8] sm:$0xff] %vm10659_vm1, %v9973_v54 }
 0x243   : > { %v8660_v41 = vld [vmem:[#allocation4 + $0x78] sm:$0xfe]   ;;  %4953 = vrot.lane.b32.xlu1 %v4842_v24, %s8800_s30  ;;  %v8658_v47 = vld [vmem:[#allocation4 + $0x6c] sm:$0xff]   ;;  %v8663_v52 = vld [vmem:[#allocation4 + $0x80] ss:$0 sps:$4 sm:$0x11]   ;;  %v10055_v21 = vpop.permute.xlu1 %5411 }
 0x244   : > { %v8655_v36 = vld [vmem:[#allocation4 + $0x78] sm:$0xff]   ;;  %v6106_v51 = vrot.slane %v8660_v41, 1  ;;  %v6107_v56 = vrot.slane %v8661_v43, 1  ;;  %v8657_v60 = vld [vmem:[#allocation4 + $0x6c] sm:$0xff]   ;;  %v7004_v61 = vrot.slane %v8663_v52, 1  ;;  %6176 = vst.msk [vmem:[#allocation5] sm:$0xff] %vm6175_vm8, %v6128_v58  ;;  %v10061_v2 = vpop.permute.xlu0 %6309 }
 0x245   : > { %v8662_v42 = vld [vmem:[#allocation4 + $0x78] sm:$0xfe]   ;;  %6321 = vrot.lane.b32.xlu0 %v8654_v16, %s8808_s27  ;;  %v8665_v1 = vld [vmem:[#allocation4 + $0x80] ss:$0 sps:$4 sm:$0x11]   ;;  %6354 = vst.msk [vmem:[#allocation5] sm:$0xff] %vm10660_vm9, %v9971_v17 }
 0x246   : > { %v8670_v45 = vld [vmem:[#allocation4 + $0x78] sm:$0xff]   ;;  %v7003_v57 = vrot.slane %v8662_v42, 1  ;;  %5888 = vst.msk [vmem:[#allocation5 + $0x8] sm:$0xff] %vm5886_vm5, %v10019_v0  ;;  %v8666_v54 = vld [vmem:[#allocation4 + $0x6c] sm:$0xfe]   ;;  %v5211_v0 = vrot.slane %v8665_v1, 1  ;;  %v6108_v10 = vsel %vm10658_vm3, %v6106_v51, %v6107_v56 }
 0x247   : > { %v10045_v59 = vld [vmem:[#allocation4 + $0x78] sm:$0xff]   ;;  %5423 = vrot.lane.b32.xlu1 %v8655_v36, %s8803_s10  ;;  %6787 = vst.msk [vmem:[#allocation5] sm:$0xff] %vm6786_vm11, %v6739_v28  ;;  %v5755_v48 = vshrl.u32 %v8670_v45, 16  ;;  %v8667_v17 = vld [vmem:[#allocation4 + $0x74] ss:$0 sps:$4 sm:$0x11]   ;;  %v6308_v8 = vpop.permute.xlu1 %6307 }
 0x248   : > { %v8664_v25 = vld [vmem:[#allocation4 + $0x78] sm:$0xfe]   ;;  %6177 = vst.msk [vmem:[#allocation5 + $0x8] sm:$0xff] %vm6175_vm8, %v9992_v49  ;;  %v5757_v46 = vshll.u32 %v8670_v45, 16  ;;  %v5207_v3 = vrot.slane %v8666_v54, 1  ;;  %v7005_v5 = vsel %vm10658_vm3, %v7003_v57, %v7004_v61  ;;  %v4868_v49 = vshrl.u32 %v10045_v59, 16 }
 0x249   : > { %5421 = vrot.lane.b32.xlu0 %v8658_v47, %s8803_s10  ;;  %v5210_v6 = vrot.slane %v8664_v25, 1  ;;  %7076 = vst.msk [vmem:[#allocation5] sm:$0xff] %vm7075_vm12, %v9998_v27  ;;  %v8668_v4 = vld [vmem:[#allocation4 + $0x6c] sm:$0xfe]   ;;  %v5208_v40 = vrot.slane %v8667_v17, 1  ;;  %v5410_v27 = vpop.permute.xlu0 %5409  ;;  %v8224_v11 = vpop.f32.mrb[20].mxu0 }
 0x24a   : > { %v8669_v53 = vld [vmem:[#allocation4 + $0x74] ss:$0 sps:$4 sm:$0x11]   ;;  %v5759_v58 = vrot.slane %v5757_v46, 1  ;;  %6355 = vst.msk [vmem:[#allocation5 + $0x8] sm:$0xff] %vm10660_vm9, %v6308_v8  ;;  %v7000_v12 = vrot.slane %v8668_v4, 1  ;;  %v3756_v14 = vmul.f32 %v9900_v62, %v8224_v11 }
 0x24b   : > { %6319 = vrot.lane.b32.xlu1 %v8657_v60, %s8808_s27  ;;  %v7001_v9 = vrot.slane %v8669_v53, 1  ;;  %v8671_v13 = vld [vmem:[#allocation4 + $0x80] ss:$0 sps:$4 sm:$0x11]   ;;  %5456 = vst.msk [vmem:[#allocation5 + $0x10] sm:$0xff] %vm10659_vm1, %v5410_v27  ;;  %v3680_v15 = vpop.f32.mrb[21].mxu0  ;;  %v5212_v50 = vsel %vm10658_vm3, %v5210_v6, %v5211_v0  ;;  %v10079_v31 = vpop.permute.xlu1 %6133  ;;  %v5209_v35 = vsel %vm10658_vm3, %v5207_v3, %v5208_v40 }
 0x24c   : > { %v4870_v63 = vshll.u32 %v10045_v59, 16  ;;  %v3754_v18 = vmul.f32 %v9900_v62, %v3680_v15  ;;  %v8225_v22 = vpop.f32.mrb[22].mxu0  ;;  %v5760_v26 = vor.u32 %v5759_v58, %v5755_v48  ;;  %v5762_v19 = vshll.u32 %v8671_v13, 16  ;;  %v8672_v29 = vld [vmem:[#allocation4 + $0x6c] sm:$0xfe]   ;;  %v10077_v30 = vld [vmem:[#allocation4 + $0x78] sm:$0xff]  }
 0x24d   : > { %7043 = vrot.lane.b32.xlu0 %v7005_v5, %s8810_s29  ;;  %v3795_v32 = vadd.f32 %v9908_v7, %v3756_v14  ;;  %v3757_v33 = vmul.f32 %v9900_v62, %v8225_v22  ;;  %v3683_v34 = vpop.f32.mrb[23].mxu0  ;;  %v8673_v28 = vld [vmem:[#allocation4 + $0x74] ss:$0 sps:$4 sm:$0x11]   ;;  %v10085_v37 = vpop.permute.xlu0 %7031  ;;  %v6103_v41 = vrot.slane %v8672_v29, 1  ;;  %v7002_v52 = vsel %vm10658_vm3, %v7000_v12, %v7001_v9  ;;  %v8678_v12 = vld [vmem:[#allocation4 + $0x6c] sm:$0xff]  }
 0x24e   : > { %v3793_v39 = vadd.f32 %v9908_v7, %v3754_v18  ;;  %v3755_v16 = vmul.f32 %v9900_v62, %v3683_v34  ;;  %v5764_v24 = vrot.slane %v5762_v19, 1  ;;  %v6104_v44 = vrot.slane %v8673_v28, 1  ;;  %v8675_v42 = vld [vmem:[#allocation4 + $0x80] ss:$0 sps:$4 sm:$0x11]  }
 0x24f   : > { %6145 = vrot.lane.b32.xlu1 %v6108_v10, %s8809_s28  ;;  %v3827_v36 = vmax.f32 %v3795_v32, 0.0  ;;  %v3796_v43 = vadd.f32 %v9908_v7, %v3757_v33  ;;  %v4872_v45 = vrot.slane %v4870_v63, 1  ;;  %v4875_v6 = vshll.u32 %v8675_v42, 16  ;;  %v10102_v3 = vpop.permute.xlu1 %5234  ;;  %v4391_v4 = vld [vmem:[#allocation4 + $0x90] sm:$0xf] }
 0x250   : > { %v3825_v47 = vmax.f32 %v3793_v39, 0.0  ;;  %v3794_v51 = vadd.f32 %v9908_v7, %v3755_v16  ;;  %v5765_v55 = vsel %vm1130_vm4, %v5760_v26, %v5764_v24  ;;  %v7092_v56 = vld [vmem:[#allocation5] sm:$0xff]  ;;  %v6105_v59 = vsel %vm10658_vm3, %v6103_v41, %v6104_v44  ;;  %v8677_v7 = vld [vmem:[#allocation4 + $0x80] ss:$0 sps:$4 sm:$0x11]  }
 0x251   : > { %5248 = vrot.lane.b32.xlu0 %v5212_v50, %s8806_s13  ;;  %v8146_v57 = vpack.c.bf16 %v3827_v36, %v3827_v36  ;;  %v3828_v62 = vmax.f32 %v3796_v43, 0.0  ;;  %v4873_v60 = vor.u32 %v4872_v45, %v4868_v49  ;;  %8244 = vmatprep.mubr.msk.bf16.mxu1 %vm7144_vm14, %v7092_v56  ;;  %v10097_v61 = vpop.permute.xlu0 %5236  ;;  %v6643_v54 = vshrl.u32 %v10077_v30, 16  ;;  %v4384_v58 = vld [vmem:[#allocation4 + $0x84] sm:$0xf]  ;;  %v4395_v14 = vld [vmem:[#allocation4 + $0x98] sm:$0x1] }
 0x252   : > { %v8144_v25 = vpack.c.bf16 %v3825_v47, %v3825_v47  ;;  %v3826_v1 = vmax.f32 %v3794_v51, 0.0  ;;  %v6645_v0 = vshll.u32 %v10077_v30, 16  ;;  %v4877_v8 = vrot.slane %v4875_v6, 1  ;;  %v8679_v22 = vld [vmem:[#allocation4 + $0x74] ss:$0 sps:$4 sm:$0x11]  }
 0x253   : > { %5246 = vrot.lane.b32.xlu1 %v5209_v35, %s8806_s13  ;;  %v4177_v48 = vshrl.u32 %v8146_v57, 16  ;;  %v4180_v17 = vshll.u32 %v8146_v57, 16  ;;  %v8147_v46 = vpack.c.bf16 %v3828_v62, %v3828_v62  ;;  %v4388_v29 = vld [vmem:[#allocation4 + $0x8c] sm:$0x1]  ;;  %v6650_v34 = vshll.u32 %v8677_v7, 16  ;;  %v10111_v36 = vpop.permute.xlu1 %5844  ;;  %v8731_v6 = vld [vmem:[#allocation4 + $0x3c] sm:$0xff]  }
 0x254   : > { %v4160_v5 = vshrl.u32 %v8144_v25, 16  ;;  %v4163_v53 = vshll.u32 %v8144_v25, 16  ;;  %v8145_v49 = vpack.c.bf16 %v3826_v1, %v3826_v1  ;;  %v6647_v10 = vrot.slane %v6645_v0, 1  ;;  %v8680_v35 = vld [vmem:[#allocation4 + $0x6c] sm:$0xff]   ;;  %4560 = vst.msk [vmem:[#allocation5 + $0x28] sm:$0xff] %vm4554_vm13, %v8731_v6 }
 0x255   : > { %7041 = vrot.lane.b32.xlu0 %v7002_v52, %s8810_s29  ;;  %v4179_v40 = vrot.slane %v4177_v48, 7  ;;  %v4185_v27 = vshrl.u32 %v8147_v46, 16  ;;  %v4188_v11 = vshll.u32 %v8147_v46, 16  ;;  %v10105_v9 = vpop.permute.xlu0 %7029  ;;  %v4878_v18 = vsel %vm1130_vm4, %v4873_v60, %v4877_v8  ;;  %v8681_v28 = vld [vmem:[#allocation4 + $0x74] ss:$0 sps:$4 sm:$0x11]  }
 0x256   : > { %v4162_v13 = vrot.slane %v4160_v5, 7  ;;  %v4168_v15 = vshrl.u32 %v8145_v49, 16  ;;  %v4171_v63 = vshll.u32 %v8145_v49, 16  ;;  %v6648_v33 = vor.u32 %v6647_v10, %v6643_v54  ;;  %v8682_v47 = vld [vmem:[#allocation4 + $0x6c] sm:$0xff]   ;;  %v8752_v5 = vld [vmem:[#allocation4 + $0x60] sm:$0xff]  }
 0x257   : > { %5856 = vrot.lane.b32.xlu1 %v5765_v55, %s8805_s12  ;;  %v4182_v50 = vor.u32 %v4180_v17, %v4179_v40  ;;  %v4183_v26 = vrot.slane %v4179_v40, 4  ;;  %v4187_v19 = vrot.slane %v4185_v27, 7  ;;  %v6652_v45 = vrot.slane %v6650_v34, 1  ;;  %v8683_v57 = vld [vmem:[#allocation4 + $0x74] ss:$0 sps:$4 sm:$0x11]  }
 0x258   : > { %v4165_v30 = vor.u32 %v4163_v53, %v4162_v13  ;;  %v4170_v32 = vrot.slane %v4168_v15, 7  ;;  %v4166_v16 = vrot.slane %v4162_v13, 4  ;;  %v6633_v55 = vshll.u32 %v8678_v12, 16  ;;  %v8702_v10 = vld [vmem:[%s10651_s4 + $0x20] ss:$0 sps:$4 sm:$0xff]   ;;  %4563 = vst.msk [vmem:[#allocation5 + $0x40] sm:$0xff] %vm4554_vm13, %v8752_v5 }
 0x259   : > { %6143 = vrot.lane.b32.xlu0 %v6105_v59, %s8809_s28  ;;  %v4392_v39 = vsel %vm9731_vm6, %v4182_v50, %v4391_v4  ;;  %v4190_v24 = vor.u32 %v4188_v11, %v4187_v19  ;;  %v4192_v41 = vrot.slane %v4187_v19, 4  ;;  %v6638_v56 = vshll.u32 %v8679_v22, 16  ;;  %v6132_v62 = vpop.permute.xlu0 %6131  ;;  %v8723_v59 = vld [vmem:[#allocation4 + $0x48] sm:$0xff]  }
 0x25a   : > { %4393 = vst [vmem:[#allocation4 + $0x90] sm:$0xf] %v4392_v39  ;;  %v4385_v43 = vsel %vm9731_vm6, %v4165_v30, %v4384_v58  ;;  %v4173_v44 = vor.u32 %v4171_v63, %v4170_v32  ;;  %v4175_v42 = vrot.slane %v4170_v32, 4  ;;  %v6653_v1 = vsel %vm1130_vm4, %v6648_v33, %v6652_v45  ;;  %4561 = vst.msk [vmem:[#allocation5 + $0x30] sm:$0xff] %vm4554_vm13, %v8723_v59 }
 0x25b   : > { %4959 = vrot.lane.b32.xlu1 %v4878_v18, %s8800_s30  ;;  %4386 = vst [vmem:[#allocation4 + $0x84] sm:$0xf] %v4385_v43  ;;  %v4191_v51 = vsel %vm8986_vm7, %v4183_v26, %v4190_v24  ;;  %v4396_v52 = vsel %vm9739_vm10, %v4192_v41, %v4395_v14  ;;  %v6631_v7 = vshrl.u32 %v8678_v12, 16  ;;  %v6635_v54 = vrot.slane %v6633_v55, 1 }
 0x25c   : > { %4394 = vst.msk [vmem:[#allocation4 + $0x94] sm:$0xf] %vm3837_vm0, %v4191_v51  ;;  %4397 = vst [vmem:[#allocation4 + $0x98] sm:$0x1] %v4396_v52  ;;  %v4174_v60 = vsel %vm8986_vm7, %v4166_v16, %v4173_v44  ;;  %v4389_v25 = vsel %vm9739_vm10, %v4175_v42, %v4388_v29  ;;  %v5745_v48 = vshll.u32 %v8680_v35, 16  ;;  %v5750_v17 = vshll.u32 %v8681_v28, 16  ;;  %v4948_v58 = vpop.permute.xlu1 %4947 }
 0x25d   : > { %4387 = vst.msk [vmem:[#allocation4 + $0x88] sm:$0xf] %vm3837_vm0, %v4174_v60  ;;  %4390 = vst [vmem:[#allocation4 + $0x8c] sm:$0x1] %v4389_v25  ;;  %6754 = vrot.lane.b32.xlu0 %v6653_v1, %s8811_s8  ;;  %v6640_v46 = vrot.slane %v6638_v56, 1  ;;  %v5743_v0 = vshrl.u32 %v8680_v35, 16  ;;  %v6636_v53 = vor.u32 %v6635_v54, %v6631_v7 }
 0x25e   : > { %v4858_v4 = vshll.u32 %v8682_v47, 16  ;;  %vm7193_vm3 = vcmask 1043456   ;;  %v5747_v49 = vrot.slane %v5745_v48, 1  ;;  %v4856_v8 = vshrl.u32 %v8682_v47, 16  ;;  %4992 = vst.msk [vmem:[#allocation5 + $0x20] sm:$0xff] %vm4987_vm2, %v4948_v58  ;;  %v6743_v14 = vpop.permute.xlu0 %6742 }
 0x25f   : > { %v4863_v40 = vshll.u32 %v8683_v57, 16  ;;  %v5752_v27 = vrot.slane %v5750_v17, 1  ;;  %v6641_v12 = vsel %vm1130_vm4, %v6636_v53, %v6640_v46  ;;  %5281 = vst.msk [vmem:[#allocation5 + $0x20] sm:$0xff] %vm5276_vm15, %v10097_v61  ;;  %8277 = vmatprep.subr.msk.bf16.mxu1 %vm7193_vm3, %v8702_v10  ;;  %v7195_v50 = vsel %vm7193_vm3, %v8702_v10, 0  ;;  %v10182_v25 = vld [vmem:[%s10649_s2] ss:$0 sm:$0xff] }
 0x260   : > { %v4860_v11 = vrot.slane %v4858_v4, 1  ;;  %v5748_v13 = vor.u32 %v5747_v49, %v5743_v0  ;;  %6752 = vrot.lane.b32.xlu1 %v6641_v12, %s8811_s8  ;;  %v6741_v22 = vpop.permute.xlu1 %6740  ;;  %8243 = vmatpush3.bf16.msra.mxu1 %v7195_v50  ;;  %vm10680_vm3 = vcmask 1046528  }
 0x261   : > { %v4865_v18 = vrot.slane %v4863_v40, 1  ;;  %6788 = vst.msk [vmem:[#allocation5 + $0x8] sm:$0xff] %vm6786_vm11, %v6741_v22 }
 0x262   : > { %v4861_v15 = vor.u32 %v4860_v11, %v4856_v8  ;;  %v5753_v63 = vsel %vm1130_vm4, %v5748_v13, %v5752_v27  ;;  %7077 = vst.msk [vmem:[#allocation5 + $0x8] sm:$0xff] %vm7075_vm12, %v10105_v9  ;;  %v5843_v29 = vpop.permute.xlu0 %5842  ;;  %v10196_v8 = vld [vmem:[%s10650_s3] ss:$0 sm:$0xff] }
 0x263   : > { %5854 = vrot.lane.b32.xlu0 %v5753_v63, %s8805_s12  ;;  %v8685_v26 = vld [vmem:[#allocation4 + $0x90] sm:$0xff]   ;;  %5889 = vst.msk [vmem:[#allocation5 + $0x10] sm:$0xff] %vm5886_vm5, %v5843_v29  ;;  %v8693_v32 = vld [vmem:[#allocation4 + $0x98] ss:$0 sps:$4 sm:$0x11]  }
 0x264   : > { %v4866_v61 = vsel %vm1130_vm4, %v4861_v15, %v4865_v18  ;;  %v8686_v19 = vld [vmem:[#allocation4 + $0x90] sm:$0xff]   ;;  %6178 = vst.msk [vmem:[#allocation5 + $0x10] sm:$0xff] %vm6175_vm8, %v6132_v62  ;;  %v4946_v33 = vpop.permute.xlu1 %4945  ;;  %v8689_v35 = vld [vmem:[#allocation4 + $0x84] sm:$0xff]   ;;  %v8695_v39 = vld [vmem:[#allocation4 + $0x98] ss:$0 sps:$4 sm:$0x11]  }
 0x265   : > { %4957 = vrot.lane.b32.xlu1 %v4866_v61, %s8800_s30  ;;  %v8692_v30 = vld [vmem:[#allocation4 + $0x90] sm:$0xfe]   ;;  %6356 = vst.msk [vmem:[#allocation5 + $0x10] sm:$0xff] %vm10660_vm9, %v10061_v2  ;;  %v6113_v16 = vrot.slane %v8693_v32, 1  ;;  %v8688_v41 = vld [vmem:[#allocation4 + $0x84] sm:$0xff]   ;;  %v7010_v44 = vrot.slane %v8695_v39, 1 }
 0x266   : > { %v10149_v34 = vld [vmem:[#allocation4 + $0x90] sm:$0xff]   ;;  %4991 = vst.msk [vmem:[#allocation5 + $0x18] sm:$0xff] %vm4987_vm2, %v4946_v33  ;;  %v6112_v9 = vrot.slane %v8692_v30, 1  ;;  %v10158_v24 = vpop.permute.xlu0 %6313  ;;  %v8698_v2 = vld [vmem:[#allocation4 + $0x98] ss:$0 sps:$4 sm:$0x11]  }
 0x267   : > { %6325 = vrot.lane.b32.xlu0 %v8685_v26, %s8808_s27  ;;  %v8694_v28 = vld [vmem:[#allocation4 + $0x90] sm:$0xfe]   ;;  %6789 = vst.msk [vmem:[#allocation5 + $0x10] sm:$0xff] %vm6786_vm11, %v6743_v14  ;;  %v5217_v52 = vrot.slane %v8698_v2, 1  ;;  %v8703_v62 = vld [vmem:[#allocation4 + $0x84] sm:$0xfe]  }
 0x268   : > { %5280 = vst.msk [vmem:[#allocation5 + $0x18] sm:$0xff] %vm5276_vm15, %v10102_v3  ;;  %v7009_v43 = vrot.slane %v8694_v28, 1  ;;  %v8697_v42 = vld [vmem:[#allocation4 + $0x90] sm:$0xfe]   ;;  %v5781_v3 = vshll.u32 %v10149_v34, 16  ;;  %v10168_v45 = vpop.permute.xlu1 %5415  ;;  %v8228_v60 = vpop.f32.mrb[24].mxu0 }
 0x269   : > { %5427 = vrot.lane.b32.xlu1 %v8686_v19, %s8803_s10  ;;  %7078 = vst.msk [vmem:[#allocation5 + $0x10] sm:$0xff] %vm7075_vm12, %v10085_v37  ;;  %v5216_v47 = vrot.slane %v8697_v42, 1  ;;  %v7093_v51 = vld [vmem:[#allocation5 + $0x8] sm:$0xff]  ;;  %v8700_v55 = vld [vmem:[#allocation4 + $0x8c] ss:$0 sps:$4 sm:$0x11]   ;;  %v3760_v1 = vmul.f32 %v10182_v25, %v8228_v60 }
 0x26a   : > { %5457 = vst.msk [vmem:[#allocation5 + $0x18] sm:$0xff] %vm10659_vm1, %v10055_v21  ;;  %v8699_v37 = vld [vmem:[#allocation4 + $0x84] sm:$0xfe]   ;;  %8245 = vmatmul.mubr.msk.bf16.vlgmr.msra.gmra.mrb[0].mxu1 %vm7144_vm14, %v7093_v51  ;;  %v5414_v21 = vpop.permute.xlu0 %5413  ;;  %v5214_v57 = vrot.slane %v8700_v55, 1  ;;  %v3696_v6 = vpop.f32.mrb[25].mxu0  ;;  %v7006_v54 = vrot.slane %v8703_v62, 1 }
 0x26b   : > { %5890 = vst.msk [vmem:[#allocation5 + $0x18] sm:$0xff] %vm5886_vm5, %v10111_v36  ;;  %5425 = vrot.lane.b32.xlu0 %v8689_v35, %s8803_s10  ;;  %v7011_v36 = vsel %vm10680_vm3, %v7009_v43, %v7010_v44  ;;  %v5213_v56 = vrot.slane %v8699_v37, 1  ;;  %v5783_v48 = vrot.slane %v5781_v3, 1  ;;  %v10186_v17 = vld [vmem:[#allocation4 + $0x90] sm:$0xff]   ;;  %v3758_v0 = vmul.f32 %v10182_v25, %v3696_v6  ;;  %v8229_v4 = vpop.f32.mrb[26].mxu0 }
 0x26c   : > { %6179 = vst.msk [vmem:[#allocation5 + $0x18] sm:$0xff] %vm6175_vm8, %v10079_v31  ;;  %v6312_v59 = vpop.permute.xlu1 %6311  ;;  %v8704_v31 = vld [vmem:[#allocation4 + $0x8c] ss:$0 sps:$4 sm:$0x11]   ;;  %v5779_v49 = vshrl.u32 %v10149_v34, 16  ;;  %v3799_v40 = vadd.f32 %v10196_v8, %v3760_v1  ;;  %v3761_v58 = vmul.f32 %v10182_v25, %v8229_v4  ;;  %v3699_v27 = vpop.f32.mrb[27].mxu0 }
 0x26d   : > { %6323 = vrot.lane.b32.xlu1 %v8688_v41, %s8808_s27  ;;  %5458 = vst.msk [vmem:[#allocation5 + $0x20] sm:$0xff] %vm10659_vm1, %v5414_v21  ;;  %vm10681_vm1 = vmmov %vm10680_vm3  ;;  %v7007_v5 = vrot.slane %v8704_v31, 1  ;;  %v8706_v53 = vld [vmem:[#allocation4 + $0x98] ss:$0 sps:$4 sm:$0x11]   ;;  %v3797_v13 = vadd.f32 %v10196_v8, %v3758_v0  ;;  %v3759_v14 = vmul.f32 %v10182_v25, %v3699_v27  ;;  %v4892_v18 = vshrl.u32 %v10186_v17, 16 }
 0x26e   : > { %6357 = vst.msk [vmem:[#allocation5 + $0x18] sm:$0xff] %vm10660_vm9, %v6312_v59  ;;  %v6114_v7 = vsel %vm10681_vm1, %v6112_v9, %v6113_v16  ;;  %v10188_v46 = vpop.permute.xlu0 %7035  ;;  %v5218_v11 = vsel %vm10681_vm1, %v5216_v47, %v5217_v52  ;;  %vm10682_vm3 = vmmov %vm10681_vm1  ;;  %v5786_v15 = vshll.u32 %v8706_v53, 16  ;;  %v8707_v63 = vld [vmem:[#allocation4 + $0x84] sm:$0xfe]   ;;  %v3831_v22 = vmax.f32 %v3799_v40, 0.0 }
 0x26f   : > { %7047 = vrot.lane.b32.xlu0 %v7011_v36, %s8810_s29  ;;  %v5215_v10 = vsel %vm10682_vm3, %v5213_v56, %v5214_v57  ;;  %v3800_v50 = vadd.f32 %v10196_v8, %v3761_v58  ;;  %vm10683_vm9 = vmmov %vm10681_vm1  ;;  %v5784_v61 = vor.u32 %v5783_v48, %v5779_v49  ;;  %v8708_v19 = vld [vmem:[#allocation4 + $0x8c] ss:$0 sps:$4 sm:$0x11]   ;;  %v3829_v30 = vmax.f32 %v3797_v13, 0.0  ;;  %v4405_v37 = vld [vmem:[#allocation4 + $0xa8] sm:$0xf] }
 0x270   : > { %v10202_v12 = vpop.permute.xlu1 %6137  ;;  %v7008_v26 = vsel %vm10683_vm9, %v7006_v54, %v7007_v5  ;;  %v3798_v32 = vadd.f32 %v10196_v8, %v3759_v14  ;;  %v5788_v33 = vrot.slane %v5786_v15, 1  ;;  %v6109_v34 = vrot.slane %v8707_v63, 1  ;;  %v7094_v35 = vld [vmem:[#allocation5 + $0x10] sm:$0xff]  ;;  %v8710_v42 = vld [vmem:[#allocation4 + $0x98] ss:$0 sps:$4 sm:$0x11]   ;;  %vm10684_vm9 = vmmov %vm10681_vm1 }
 0x271   : > { %6149 = vrot.lane.b32.xlu1 %v6114_v7, %s8809_s28  ;;  %v8150_v28 = vpack.c.bf16 %v3831_v22, %v3831_v22  ;;  %v3832_v39 = vmax.f32 %v3800_v50, 0.0  ;;  %v6110_v9 = vrot.slane %v8708_v19, 1  ;;  %v4894_v16 = vshll.u32 %v10186_v17, 16  ;;  %8248 = vmatprep.mubr.msk.bf16.mxu1 %vm7144_vm14, %v7094_v35  ;;  %v8711_v57 = vld [vmem:[#allocation4 + $0x90] sm:$0xff]   ;;  %v4398_v60 = vld [vmem:[#allocation4 + $0x9c] sm:$0xf] }
 0x272   : > { %v10210_v29 = vpop.permute.xlu0 %5240  ;;  %v8148_v43 = vpack.c.bf16 %v3829_v30, %v3829_v30  ;;  %v3830_v44 = vmax.f32 %v3798_v32, 0.0  ;;  %v5789_v51 = vsel %vm1130_vm4, %v5784_v61, %v5788_v33  ;;  %v4899_v1 = vshll.u32 %v8710_v42, 16  ;;  %v8712_v6 = vld [vmem:[#allocation4 + $0x98] ss:$0 sps:$4 sm:$0x11]   ;;  %v8713_v5 = vld [vmem:[#allocation4 + $0x84] sm:$0xff]  }
 0x273   : > { %5252 = vrot.lane.b32.xlu0 %v5218_v11, %s8806_s13  ;;  %v4211_v2 = vshrl.u32 %v8150_v28, 16  ;;  %v4214_v3 = vshll.u32 %v8150_v28, 16  ;;  %v8151_v47 = vpack.c.bf16 %v3832_v39, %v3832_v39  ;;  %v6111_v36 = vsel %vm10684_vm9, %v6109_v34, %v6110_v9  ;;  %v4409_v17 = vld [vmem:[#allocation4 + $0xb0] sm:$0x1]  ;;  %v4402_v58 = vld [vmem:[#allocation4 + $0xa4] sm:$0x1] }
 0x274   : > { %v10216_v41 = vpop.permute.xlu1 %5238  ;;  %v4194_v55 = vshrl.u32 %v8148_v43, 16  ;;  %v8149_v21 = vpack.c.bf16 %v3830_v44, %v3830_v44  ;;  %v4896_v56 = vrot.slane %v4894_v16, 1  ;;  %v4197_v59 = vshll.u32 %v8148_v43, 16  ;;  %v8760_v11 = vld [vmem:[#allocation4 + $0x54] sm:$0xff]   ;;  %v8717_v44 = vld [vmem:[#allocation4 + $0x84] sm:$0xff]  }
 0x275   : > { %5250 = vrot.lane.b32.xlu1 %v5215_v10, %s8806_s13  ;;  %v4213_v62 = vrot.slane %v4211_v2, 7  ;;  %v4219_v31 = vshrl.u32 %v8151_v47, 16  ;;  %v4222_v48 = vshll.u32 %v8151_v47, 16  ;;  %v4901_v27 = vrot.slane %v4899_v1, 1  ;;  %4562 = vst.msk [vmem:[#allocation5 + $0x38] sm:$0xff] %vm4554_vm13, %v8760_v11 }
 0x276   : > { %v10220_v52 = vpop.permute.xlu0 %7033  ;;  %v4196_v54 = vrot.slane %v4194_v55, 7  ;;  %v4202_v0 = vshrl.u32 %v8149_v21, 16  ;;  %v4897_v4 = vor.u32 %v4896_v56, %v4892_v18  ;;  %v4205_v40 = vshll.u32 %v8149_v21, 16  ;;  %v8714_v63 = vld [vmem:[#allocation4 + $0x8c] ss:$0 sps:$4 sm:$0x11]  }
 0x277   : > { %7045 = vrot.lane.b32.xlu0 %v7008_v26, %s8810_s29  ;;  %v4216_v53 = vor.u32 %v4214_v3, %v4213_v62  ;;  %v4221_v49 = vrot.slane %v4219_v31, 7  ;;  %v4217_v10 = vrot.slane %v4213_v62, 4  ;;  %v8715_v18 = vld [vmem:[#allocation4 + $0x84] sm:$0xff]   ;;  %v6669_v34 = vshll.u32 %v8711_v57, 16 }
 0x278   : > { %v10224_v7 = vpop.permute.xlu1 %5848  ;;  %v4199_v13 = vor.u32 %v4197_v59, %v4196_v54  ;;  %v4200_v14 = vrot.slane %v4196_v54, 4  ;;  %v4204_v15 = vrot.slane %v4202_v0, 7  ;;  %v4902_v61 = vsel %vm1130_vm4, %v4897_v4, %v4901_v27  ;;  %v8716_v43 = vld [vmem:[#allocation4 + $0x8c] ss:$0 sps:$4 sm:$0x11]  }
 0x279   : > { %5860 = vrot.lane.b32.xlu1 %v5789_v51, %s8805_s12  ;;  %v4406_v22 = vsel %vm9731_vm6, %v4216_v53, %v4405_v37  ;;  %v4224_v50 = vor.u32 %v4222_v48, %v4221_v49  ;;  %v4226_v26 = vrot.slane %v4221_v49, 4  ;;  %v6667_v9 = vshrl.u32 %v8711_v57, 16  ;;  %v8718_v62 = vld [vmem:[#allocation4 + $0x8c] ss:$0 sps:$4 sm:$0x11]  }
 0x27a   : > { %v6136_v19 = vpop.permute.xlu0 %6135  ;;  %4407 = vst [vmem:[#allocation4 + $0xa8] sm:$0xf] %v4406_v22  ;;  %v4399_v30 = vsel %vm9731_vm6, %v4199_v13, %v4398_v60  ;;  %v4207_v32 = vor.u32 %v4205_v40, %v4204_v15  ;;  %v4209_v33 = vrot.slane %v4204_v15, 4  ;;  %v6674_v16 = vshll.u32 %v8712_v6, 16  ;;  %v8778_v40 = vld [vmem:[#allocation4 + $0x78] sm:$0xff]  }
 0x27b   : > { %6147 = vrot.lane.b32.xlu0 %v6111_v36, %s8809_s28  ;;  %4400 = vst [vmem:[#allocation4 + $0x9c] sm:$0xf] %v4399_v30  ;;  %v4225_v28 = vsel %vm8986_vm7, %v4217_v10, %v4224_v50  ;;  %v4410_v39 = vsel %vm9739_vm10, %v4226_v26, %v4409_v17  ;;  %v6671_v3 = vrot.slane %v6669_v34, 1  ;;  %v6657_v47 = vshll.u32 %v8713_v5, 16  ;;  %4565 = vst.msk [vmem:[#allocation5 + $0x50] sm:$0xff] %vm4554_vm13, %v8778_v40 }
 0x27c   : > { %v4952_v35 = vpop.permute.xlu1 %4951  ;;  %4408 = vst.msk [vmem:[#allocation4 + $0xac] sm:$0xf] %vm3837_vm0, %v4225_v28  ;;  %4411 = vst [vmem:[#allocation4 + $0xb0] sm:$0x1] %v4410_v39  ;;  %v4208_v42 = vsel %vm8986_vm7, %v4200_v14, %v4207_v32  ;;  %v4403_v2 = vsel %vm9739_vm10, %v4209_v33, %v4402_v58  ;;  %v6655_v51 = vshrl.u32 %v8713_v5, 16  ;;  %v6662_v37 = vshll.u32 %v8714_v63, 16 }
 0x27d   : > { %4963 = vrot.lane.b32.xlu1 %v4902_v61, %s8800_s30  ;;  %4994 = vst.msk [vmem:[#allocation5 + $0x30] sm:$0xff] %vm4987_vm2, %v4952_v35  ;;  %4404 = vst [vmem:[#allocation4 + $0xa4] sm:$0x1] %v4403_v2  ;;  %v5769_v55 = vshll.u32 %v8715_v18, 16  ;;  %v6672_v21 = vor.u32 %v6671_v3, %v6667_v9  ;;  %v6676_v36 = vrot.slane %v6674_v16, 1  ;;  %v6659_v56 = vrot.slane %v6657_v47, 1 }
 0x27e   : > { %5283 = vst.msk [vmem:[#allocation5 + $0x30] sm:$0xff] %vm5276_vm15, %v10210_v29  ;;  %v5774_v57 = vshll.u32 %v8716_v43, 16  ;;  %v5767_v59 = vshrl.u32 %v8715_v18, 16  ;;  %v4882_v31 = vshll.u32 %v8717_v44, 16  ;;  %v6664_v48 = vrot.slane %v6662_v37, 1 }
 0x27f   : > { %4401 = vst.msk [vmem:[#allocation4 + $0xa0] sm:$0xf] %vm3837_vm0, %v4208_v42  ;;  %v5771_v60 = vrot.slane %v5769_v55, 1  ;;  %v6747_v1 = vpop.permute.xlu0 %6746  ;;  %v6677_v6 = vsel %vm1130_vm4, %v6672_v21, %v6676_v36  ;;  %v6660_v54 = vor.u32 %v6659_v56, %v6655_v51  ;;  %v4887_v29 = vshll.u32 %v8718_v62, 16 }
 0x280   : > { %6758 = vrot.lane.b32.xlu0 %v6677_v6, %s8811_s8  ;;  %v4880_v0 = vshrl.u32 %v8717_v44, 16  ;;  %v4884_v4 = vrot.slane %v4882_v31, 1  ;;  %v5776_v53 = vrot.slane %v5774_v57, 1  ;;  %vm10685_vm1 = vcmask 458112  }
 0x281   : > { %v5772_v17 = vor.u32 %v5771_v60, %v5767_v59  ;;  %v6665_v5 = vsel %vm1130_vm4, %v6660_v54, %v6664_v48  ;;  %v4889_v10 = vrot.slane %v4887_v29, 1  ;;  %vm10686_vm3 = vcmask 261312  }
 0x282   : > { %6756 = vrot.lane.b32.xlu1 %v6665_v5, %s8811_s8  ;;  %v4885_v58 = vor.u32 %v4884_v4, %v4880_v0 }
 0x283   : > { %v6745_v49 = vpop.permute.xlu1 %6744  ;;  %v5777_v11 = vsel %vm1130_vm4, %v5772_v17, %v5776_v53  ;;  %v8753_v38 = vld [vmem:[#allocation4 + $0xa8] sm:$0xff]  }
 0x284   : > { %6790 = vst.msk [vmem:[#allocation5 + $0x18] sm:$0xff] %vm6786_vm11, %v6745_v49  ;;  %v5847_v27 = vpop.permute.xlu0 %5846  ;;  %5858 = vrot.lane.b32.xlu0 %v5777_v11, %s8805_s12  ;;  %v4890_v14 = vsel %vm1130_vm4, %v4885_v58, %v4889_v10  ;;  %v8721_v63 = vld [vmem:[#allocation4 + $0xa4] ss:$0 sps:$4 sm:$0x11]   ;;  %v8737_v10 = vld [vmem:[#allocation4 + $0xa8] sm:$0xff]  }
 0x285   : > { %7079 = vst.msk [vmem:[#allocation5 + $0x18] sm:$0xff] %vm7075_vm12, %v10220_v52  ;;  %v7013_v61 = vrot.slane %v8721_v63, 1  ;;  %v8728_v28 = vld [vmem:[#allocation4 + $0xa4] ss:$0 sps:$4 sm:$0x11]  }
 0x286   : > { %5891 = vst.msk [vmem:[#allocation5 + $0x20] sm:$0xff] %vm5886_vm5, %v5847_v27  ;;  %v8720_v13 = vld [vmem:[#allocation4 + $0x9c] sm:$0xfe]   ;;  %4961 = vrot.lane.b32.xlu1 %v4890_v14, %s8800_s30  ;;  %v5798_v16 = vshll.u32 %v8728_v28, 16 }
 0x287   : > { %6180 = vst.msk [vmem:[#allocation5 + $0x20] sm:$0xff] %vm6175_vm8, %v6136_v19  ;;  %v8719_v15 = vld [vmem:[#allocation4 + $0x9c] sm:$0xff]   ;;  %v4950_v22 = vpop.permute.xlu1 %4949  ;;  %v7012_v52 = vrot.slane %v8720_v13, 1  ;;  %v8733_v21 = vld [vmem:[#allocation4 + $0xa4] ss:$0 sps:$4 sm:$0x11]  }
 0x288   : > { %6358 = vst.msk [vmem:[#allocation5 + $0x20] sm:$0xff] %vm10685_vm1, %v10158_v24  ;;  %v8727_v50 = vld [vmem:[#allocation4 + $0x9c] sm:$0xff]   ;;  %v10265_v26 = vpop.permute.xlu0 %6317  ;;  %v8726_v24 = vld [vmem:[#allocation4 + $0xa4] ss:$0 sps:$4 sm:$0x11]   ;;  %vm10687_vm1 = vmmov %vm10686_vm3  ;;  %v5800_v3 = vrot.slane %v5798_v16, 1 }
 0x289   : > { %6791 = vst.msk [vmem:[#allocation5 + $0x20] sm:$0xff] %vm6786_vm11, %v6747_v1  ;;  %v8725_v18 = vld [vmem:[#allocation4 + $0x9c] sm:$0xfe]   ;;  %v7014_v30 = vsel %vm10684_vm9, %v7012_v52, %v7013_v61  ;;  %v5791_v32 = vshrl.u32 %v8727_v50, 16  ;;  %v5793_v33 = vshll.u32 %v8727_v50, 16  ;;  %v5220_v39 = vrot.slane %v8726_v24, 1 }
 0x28a   : > { %4993 = vst.msk [vmem:[#allocation5 + $0x28] sm:$0xff] %vm4987_vm2, %v4950_v22  ;;  %v8729_v19 = vld [vmem:[#allocation4 + $0x9c] sm:$0xff]   ;;  %6327 = vrot.lane.b32.xlu1 %v8719_v15, %s8808_s27  ;;  %7049 = vrot.lane.b32.xlu0 %v7014_v30, %s8810_s29  ;;  %v5219_v35 = vrot.slane %v8725_v18, 1  ;;  %v8735_v60 = vld [vmem:[#allocation4 + $0xa4] ss:$0 sps:$4 sm:$0x11]  }
 0x28b   : > { %7080 = vst.msk [vmem:[#allocation5 + $0x20] sm:$0xff] %vm7075_vm12, %v10188_v46  ;;  %v10276_v34 = vpop.permute.xlu1 %5419  ;;  %v8722_v46 = vld [vmem:[#allocation4 + $0xa8] sm:$0xff]   ;;  %v5795_v9 = vrot.slane %v5793_v33, 1  ;;  %v6681_v43 = vshll.u32 %v8729_v19, 16  ;;  %v8734_v44 = vld [vmem:[#allocation4 + $0x9c] sm:$0xff]   ;;  %v6679_v47 = vshrl.u32 %v8729_v19, 16 }
 0x28c   : > { %5282 = vst.msk [vmem:[#allocation5 + $0x28] sm:$0xff] %vm5276_vm15, %v10216_v41  ;;  %v8724_v41 = vld [vmem:[#allocation4 + $0x9c] sm:$0xff]   ;;  %v4904_v36 = vshrl.u32 %v8734_v44, 16  ;;  %v5221_v56 = vsel %vm10684_vm9, %v5219_v35, %v5220_v39  ;;  %v6116_v6 = vrot.slane %v8733_v21, 1  ;;  %v4906_v54 = vshll.u32 %v8734_v44, 16  ;;  %v7095_v48 = vld [vmem:[#allocation5 + $0x18] sm:$0xff] }
 0x28d   : > { %5459 = vst.msk [vmem:[#allocation5 + $0x28] sm:$0xff] %vm10686_vm3, %v10168_v45  ;;  %v5418_v45 = vpop.permute.xlu0 %5417  ;;  %v5796_v42 = vor.u32 %v5795_v9, %v5791_v32  ;;  %v6683_v51 = vrot.slane %v6681_v43, 1  ;;  %vm10688_vm3 = vcmask 458112   ;;  %v8732_v55 = vld [vmem:[#allocation4 + $0x9c] sm:$0xfe]   ;;  %v4911_v0 = vshll.u32 %v8735_v60, 16  ;;  %8249 = vmatmul.mubr.msk.bf16.gmra.mrb[4].mxu1 %vm7144_vm14, %v7095_v48 }
 0x28e   : > { %5892 = vst.msk [vmem:[#allocation5 + $0x28] sm:$0xff] %vm5886_vm5, %v10224_v7  ;;  %v8730_v7 = vld [vmem:[#allocation4 + $0xa4] ss:$0 sps:$4 sm:$0x11]   ;;  %5431 = vrot.lane.b32.xlu1 %v8722_v46, %s8803_s10  ;;  %5429 = vrot.lane.b32.xlu0 %v8724_v41, %s8803_s10  ;;  %v6115_v59 = vrot.slane %v8732_v55, 1  ;;  %v4908_v53 = vrot.slane %v4906_v54, 1 }
 0x28f   : > { %6181 = vst.msk [vmem:[#allocation5 + $0x28] sm:$0xff] %vm6175_vm8, %v10202_v12  ;;  %v6316_v2 = vpop.permute.xlu1 %6315  ;;  %v6686_v37 = vshll.u32 %v8730_v7, 16  ;;  %v5801_v57 = vsel %vm1130_vm4, %v5796_v42, %v5800_v3  ;;  %v6684_v62 = vor.u32 %v6683_v51, %v6679_v47  ;;  %v4913_v11 = vrot.slane %v4911_v0, 1  ;;  %v8738_v13 = vld [vmem:[#allocation4 + $0xb0] ss:$0 sps:$4 sm:$0x11]  }
 0x290   : > { %5460 = vst.msk [vmem:[#allocation5 + $0x30] sm:$0xff] %vm10687_vm1, %v5418_v45  ;;  %vm10689_vm1 = vmmov %vm10684_vm9  ;;  %v4909_v52 = vor.u32 %v4908_v53, %v4904_v36  ;;  %v8736_v50 = vld [vmem:[#allocation4 + $0xa8] sm:$0xff]   ;;  %v5803_v19 = vshrl.u32 %v8737_v10, 16  ;;  %v5805_v30 = vshll.u32 %v8737_v10, 16  ;;  %v5810_v41 = vshll.u32 %v8738_v13, 16 }
 0x291   : > { %6359 = vst.msk [vmem:[#allocation5 + $0x28] sm:$0xff] %vm10688_vm3, %v6316_v2  ;;  %v10286_v12 = vpop.permute.xlu0 %7039  ;;  %v6688_v1 = vrot.slane %v6686_v37, 1  ;;  %v6117_v27 = vsel %vm10689_vm1, %v6115_v59, %v6116_v6  ;;  %v8739_v61 = vld [vmem:[#allocation4 + $0xa8] sm:$0xff]   ;;  %v8740_v35 = vld [vmem:[#allocation4 + $0xb0] ss:$0 sps:$4 sm:$0x11]   ;;  %vm10690_vm3 = vmmov %vm10689_vm1 }
 0x292   : > { %5254 = vrot.lane.b32.xlu1 %v5221_v56, %s8806_s13  ;;  %5862 = vrot.lane.b32.xlu0 %v5801_v57, %s8805_s12  ;;  %v4914_v46 = vsel %vm1130_vm4, %v4909_v52, %v4913_v11  ;;  %v7096_v28 = vld [vmem:[#allocation5 + $0x20] sm:$0xff]  ;;  %v5807_v16 = vrot.slane %v5805_v30, 1  ;;  %v6691_v7 = vshrl.u32 %v8739_v61, 16  ;;  %v5812_v42 = vrot.slane %v5810_v41, 1  ;;  %v8781_v3 = vld [vmem:[#allocation4 + $0x6c] sm:$0xff]   ;;  %vm10695_vm9 = vmmov %vm10689_vm1 }
 0x293   : > { %v10290_v31 = vpop.permute.xlu1 %6141  ;;  %v8232_v17 = vpop.f32.mrb[28].mxu0  ;;  %v6689_v58 = vsel %vm1130_vm4, %v6684_v62, %v6688_v1  ;;  %8252 = vmatprep.mubr.msk.bf16.mxu1 %vm7144_vm14, %v7096_v28  ;;  %v6693_v2 = vshll.u32 %v8739_v61, 16  ;;  %v6698_v55 = vshll.u32 %v8740_v35, 16  ;;  %v8742_v62 = vld [vmem:[#allocation4 + $0xb0] ss:$0 sps:$4 sm:$0x11]  }
 0x294   : > { %v3764_v4 = vmul.f32 %v10182_v25, %v8232_v17  ;;  %v3712_v5 = vpop.f32.mrb[29].mxu0  ;;  %v5808_v37 = vor.u32 %v5807_v16, %v5803_v19  ;;  %4564 = vst.msk [vmem:[#allocation5 + $0x48] sm:$0xff] %vm4554_vm13, %v8781_v3  ;;  %v4419_v59 = vld [vmem:[#allocation4 + $0xc0] sm:$0xf]  ;;  %v4412_v17 = vld [vmem:[#allocation4 + $0xb4] sm:$0xf] }
 0x295   : > { %v10294_v29 = vpop.permute.xlu0 %5244  ;;  %v3762_v49 = vmul.f32 %v10182_v25, %v3712_v5  ;;  %v8233_v40 = vpop.f32.mrb[30].mxu0  ;;  %v6695_v57 = vrot.slane %v6693_v2, 1  ;;  %v8743_v53 = vld [vmem:[#allocation4 + $0xa8] sm:$0xfe]   ;;  %v6700_v13 = vrot.slane %v6698_v55, 1  ;;  %v6119_v35 = vrot.slane %v8742_v62, 1 }
 0x296   : > { %v3803_v15 = vadd.f32 %v10196_v8, %v3764_v4  ;;  %v3765_v63 = vmul.f32 %v10182_v25, %v8233_v40  ;;  %v3715_v22 = vpop.f32.mrb[31].mxu0  ;;  %6760 = vrot.lane.b32.xlu1 %v6689_v58, %s8811_s8  ;;  %6151 = vrot.lane.b32.xlu0 %v6117_v27, %s8809_s28  ;;  %v5813_v54 = vsel %vm1130_vm4, %v5808_v37, %v5812_v42  ;;  %v8782_v40 = vld [vmem:[#allocation4 + $0x90] sm:$0xff]   ;;  %v4423_v27 = vld [vmem:[#allocation4 + $0xc8] sm:$0x1]  ;;  %v4416_v41 = vld [vmem:[#allocation4 + $0xbc] sm:$0x1] }
 0x297   : > { %v10301_v14 = vpop.permute.xlu1 %5242  ;;  %v3801_v18 = vadd.f32 %v10196_v8, %v3762_v49  ;;  %v3763_v24 = vmul.f32 %v10182_v25, %v3715_v22  ;;  %v6696_v5 = vor.u32 %v6695_v57, %v6691_v7  ;;  %v8744_v61 = vld [vmem:[#allocation4 + $0xb0] ss:$0 sps:$4 sm:$0x11]   ;;  %4567 = vst.msk [vmem:[#allocation5 + $0x60] sm:$0xff] %vm4554_vm13, %v8782_v40  ;;  %v7015_v16 = vrot.slane %v8743_v53, 1  ;;  %v8783_v7 = vld [vmem:[#allocation4 + $0x84] sm:$0xff]  }
 0x298   : > { %v3835_v32 = vmax.f32 %v3803_v15, 0.0  ;;  %v3804_v33 = vadd.f32 %v10196_v8, %v3765_v63  ;;  %v7016_v42 = vrot.slane %v8744_v61, 1  ;;  %v8784_v3 = vld [vmem:[#allocation4 + $0x9c] sm:$0xff]   ;;  %4566 = vst.msk [vmem:[#allocation5 + $0x58] sm:$0xff] %vm4554_vm13, %v8783_v7  ;;  %v8748_v37 = vld [vmem:[#allocation4 + $0xa8] sm:$0xfe]  }
 0x299   : > { %v10311_v45 = vpop.permute.xlu0 %7037  ;;  %v3833_v39 = vmax.f32 %v3801_v18, 0.0  ;;  %v3802_v9 = vadd.f32 %v10196_v8, %v3763_v24  ;;  %v8741_v8 = vld [vmem:[#allocation4 + $0xa8] sm:$0xfe]   ;;  %v6701_v30 = vsel %vm1130_vm4, %v6696_v5, %v6700_v13  ;;  %v8749_v55 = vld [vmem:[#allocation4 + $0xb0] ss:$0 sps:$4 sm:$0x11]  }
 0x29a   : > { %v8154_v43 = vpack.c.bf16 %v3835_v32, %v3835_v32  ;;  %v3836_v44 = vmax.f32 %v3804_v33, 0.0  ;;  %4965 = vrot.lane.b32.xlu1 %v4914_v46, %s8800_s30  ;;  %6329 = vrot.lane.b32.xlu0 %v8736_v50, %s8808_s27  ;;  %v6118_v50 = vrot.slane %v8741_v8, 1  ;;  %4568 = vst.msk [vmem:[#allocation5 + $0x68] sm:$0xff] %vm4554_vm13, %v8784_v3 }
 0x29b   : > { %v10315_v25 = vpop.permute.xlu1 %5852  ;;  %v8152_v47 = vpack.c.bf16 %v3833_v39, %v3833_v39  ;;  %v3834_v51 = vmax.f32 %v3802_v9, 0.0 }
 0x29c   : > { %v4245_v21 = vshrl.u32 %v8154_v43, 16  ;;  %v4248_v36 = vshll.u32 %v8154_v43, 16  ;;  %v8155_v56 = vpack.c.bf16 %v3836_v44, %v3836_v44  ;;  %v6120_v44 = vsel %vm10690_vm3, %v6118_v50, %v6119_v35 }
 0x29d   : > { %v4228_v60 = vshrl.u32 %v8152_v47, 16  ;;  %v4231_v1 = vshll.u32 %v8152_v47, 16  ;;  %v8153_v6 = vpack.c.bf16 %v3834_v51, %v3834_v51  ;;  %v6140_v49 = vpop.permute.xlu0 %6139 }
 0x29e   : > { %v4247_v48 = vrot.slane %v4245_v21, 7  ;;  %v4253_v0 = vshrl.u32 %v8155_v56, 16  ;;  %v4256_v4 = vshll.u32 %v8155_v56, 16  ;;  %5864 = vrot.lane.b32.xlu1 %v5813_v54, %s8805_s12  ;;  %6762 = vrot.lane.b32.xlu0 %v6701_v30, %s8811_s8  ;;  %v8785_v21 = vld [vmem:[#allocation4 + $0xa8] sm:$0xff]   ;;  %v5223_v56 = vrot.slane %v8749_v55, 1 }
 0x29f   : > { %v4230_v58 = vrot.slane %v4228_v60, 7  ;;  %v4236_v11 = vshrl.u32 %v8153_v6, 16  ;;  %v4239_v10 = vshll.u32 %v8153_v6, 16  ;;  %4569 = vst.msk [vmem:[#allocation5 + $0x70] sm:$0xff] %vm4554_vm13, %v8785_v21 }
 0x2a0   : > { %v4250_v63 = vor.u32 %v4248_v36, %v4247_v48  ;;  %v4251_v22 = vrot.slane %v4247_v48, 4  ;;  %v4255_v52 = vrot.slane %v4253_v0, 7  ;;  %v5222_v36 = vrot.slane %v8748_v37, 1 }
 0x2a1   : > { %v4233_v18 = vor.u32 %v4231_v1, %v4230_v58  ;;  %v4234_v24 = vrot.slane %v4230_v58, 4  ;;  %v4238_v19 = vrot.slane %v4236_v11, 7  ;;  %v8754_v1 = vld [vmem:[#allocation4 + $0xb0] ss:$0 sps:$4 sm:$0x11]  }
 0x2a2   : > { %v4420_v32 = vsel %vm9731_vm6, %v4250_v63, %v4419_v59  ;;  %v4258_v33 = vor.u32 %v4256_v4, %v4255_v52  ;;  %v4260_v46 = vrot.slane %v4255_v52, 4  ;;  %6153 = vrot.lane.b32.xlu1 %v6120_v44, %s8809_s28  ;;  %v4918_v59 = vshll.u32 %v8753_v38, 16 }
 0x2a3   : > { %4421 = vst [vmem:[#allocation4 + $0xc0] sm:$0xf] %v4420_v32  ;;  %v4413_v28 = vsel %vm9731_vm6, %v4233_v18, %v4412_v17  ;;  %v4241_v39 = vor.u32 %v4239_v10, %v4238_v19  ;;  %v4243_v9 = vrot.slane %v4238_v19, 4  ;;  %vm10691_vm6 = vmmov %vm10689_vm1  ;;  %v5224_v52 = vsel %vm10690_vm3, %v5222_v36, %v5223_v56 }
 0x2a4   : > { %4414 = vst [vmem:[#allocation4 + $0xb4] sm:$0xf] %v4413_v28  ;;  %v4424_v43 = vsel %vm9739_vm10, %v4260_v46, %v4423_v27  ;;  %v7017_v51 = vsel %vm10691_vm6, %v7015_v16, %v7016_v42  ;;  %v4920_v4 = vrot.slane %v4918_v59, 1  ;;  %v4923_v27 = vshll.u32 %v8754_v1, 16  ;;  %vm10697_vm6 = vmmov %vm10690_vm3 }
 0x2a5   : > { %4425 = vst [vmem:[#allocation4 + $0xc8] sm:$0x1] %v4424_v43  ;;  %v4242_v23 = vsel %vm8986_vm7, %v4234_v24, %v4241_v39  ;;  %v4417_v47 = vsel %vm9739_vm10, %v4243_v9, %v4416_v41  ;;  %7051 = vrot.lane.b32.xlu0 %v7017_v51, %s8810_s29 }
 0x2a6   : > { %v4956_v15 = vpop.permute.xlu1 %4955  ;;  %4415 = vst.msk [vmem:[#allocation4 + $0xb8] sm:$0xf] %vm3837_vm0, %v4242_v23  ;;  %4418 = vst [vmem:[#allocation4 + $0xbc] sm:$0x1] %v4417_v47  ;;  %v4925_v39 = vrot.slane %v4923_v27, 1 }
 0x2a7   : > { %4996 = vst.msk [vmem:[#allocation5 + $0x40] sm:$0xff] %vm4987_vm2, %v4956_v15 }
 0x2a8   : > { %5285 = vst.msk [vmem:[#allocation5 + $0x40] sm:$0xff] %vm5276_vm15, %v10294_v29  ;;  %v4259_v29 = vsel %vm8986_vm7, %v4251_v22, %v4258_v33  ;;  %vm10692_vm7 = vcmask 458112  }
 0x2a9   : > { %4422 = vst.msk [vmem:[#allocation4 + $0xc4] sm:$0xf] %vm3837_vm0, %v4259_v29  ;;  %vm10693_vm0 = vcmask 261312   ;;  %vm10696_vm1 = vmmov %vm10692_vm7 }
 0x2aa   : > { %vm10694_vm10 = vmmov %vm10693_vm0 }
 0x2ac   : > { %v8768_v21 = vld [vmem:[#allocation4 + $0xc8] ss:$0 sps:$4 sm:$0x11]  }
 0x2ad   : > { %v8745_v62 = vld [vmem:[#allocation4 + $0xb4] sm:$0xff]   ;;  %v8751_v48 = vld [vmem:[#allocation4 + $0xbc] ss:$0 sps:$4 sm:$0x11]  }
 0x2ae   : > { %v8746_v60 = vld [vmem:[#allocation4 + $0xb4] sm:$0xfe]   ;;  %6331 = vrot.lane.b32.xlu1 %v8745_v62, %s8808_s27  ;;  %v6710_v5 = vshll.u32 %v8751_v48, 16  ;;  %v8757_v58 = vld [vmem:[#allocation4 + $0xbc] ss:$0 sps:$4 sm:$0x11]  }
 0x2af   : > { %v6751_v2 = vpop.permute.xlu0 %6750  ;;  %v8750_v6 = vld [vmem:[#allocation4 + $0xb4] sm:$0xff]   ;;  %v7018_v54 = vrot.slane %v8746_v60, 1  ;;  %v8759_v22 = vld [vmem:[#allocation4 + $0xbc] ss:$0 sps:$4 sm:$0x11]   ;;  %v5822_v50 = vshll.u32 %v8757_v58, 16 }
 0x2b0   : > { %v6703_v0 = vshrl.u32 %v8750_v6, 16  ;;  %v8758_v10 = vld [vmem:[#allocation4 + $0xb4] sm:$0xff]   ;;  %v6712_v63 = vrot.slane %v6710_v5, 1  ;;  %v4935_v33 = vshll.u32 %v8759_v22, 16  ;;  %v8767_v55 = vld [vmem:[#allocation4 + $0xc0] sm:$0xff]   ;;  %v6722_v48 = vshll.u32 %v8768_v21, 16 }
 0x2b1   : > { %v6749_v8 = vpop.permute.xlu1 %6748  ;;  %v4930_v61 = vshll.u32 %v8758_v10, 16  ;;  %v8761_v46 = vld [vmem:[#allocation4 + $0xb4] sm:$0xfe]   ;;  %v8762_v35 = vld [vmem:[#allocation4 + $0xbc] ss:$0 sps:$4 sm:$0x11]  }
 0x2b2   : > { %6792 = vst.msk [vmem:[#allocation5 + $0x28] sm:$0xff] %vm6786_vm11, %v6749_v8  ;;  %v8755_v9 = vld [vmem:[#allocation4 + $0xb4] sm:$0xff]   ;;  %v4928_v7 = vshrl.u32 %v8758_v10, 16  ;;  %v5824_v29 = vrot.slane %v5822_v50, 1  ;;  %v4937_v43 = vrot.slane %v4935_v33, 1  ;;  %v6121_v47 = vrot.slane %v8761_v46, 1 }
 0x2b3   : > { %7081 = vst.msk [vmem:[#allocation5 + $0x28] sm:$0xff] %vm7075_vm12, %v10311_v45  ;;  %v5851_v20 = vpop.permute.xlu0 %5850  ;;  %v4932_v41 = vrot.slane %v4930_v61, 1  ;;  %v8763_v44 = vld [vmem:[#allocation4 + $0xb4] sm:$0xfe]   ;;  %v6122_v37 = vrot.slane %v8762_v35, 1  ;;  %v10391_v8 = vld [vmem:[#allocation4 + $0xcc] sm:$0xff]  }
 0x2b4   : > { %5893 = vst.msk [vmem:[#allocation5 + $0x30] sm:$0xff] %vm5886_vm5, %v5851_v20  ;;  %v8764_v51 = vld [vmem:[#allocation4 + $0xbc] ss:$0 sps:$4 sm:$0x11]   ;;  %v8769_v20 = vld [vmem:[#allocation4 + $0xc0] sm:$0xff]   ;;  %v5225_v36 = vrot.slane %v8763_v44, 1 }
 0x2b5   : > { %6182 = vst.msk [vmem:[#allocation5 + $0x30] sm:$0xff] %vm6175_vm8, %v6140_v49  ;;  %v4954_v57 = vpop.permute.xlu1 %4953  ;;  %v4933_v23 = vor.u32 %v4932_v41, %v4928_v7  ;;  %v6717_v56 = vshll.u32 %v8767_v55, 16  ;;  %v5226_v60 = vrot.slane %v8764_v51, 1  ;;  %v8770_v1 = vld [vmem:[#allocation4 + $0xc8] ss:$0 sps:$4 sm:$0x11]  }
 0x2b6   : > { %6360 = vst.msk [vmem:[#allocation5 + $0x30] sm:$0xff] %vm10692_vm7, %v10265_v26  ;;  %vm10698_vm7 = vmmov %vm10690_vm3  ;;  %v6715_v58 = vshrl.u32 %v8767_v55, 16  ;;  %v8771_v27 = vld [vmem:[#allocation4 + $0xc0] sm:$0xfe]   ;;  %v6727_v35 = vshrl.u32 %v10391_v8, 16 }
 0x2b7   : > { %4995 = vst.msk [vmem:[#allocation5 + $0x38] sm:$0xff] %vm4987_vm2, %v4954_v57  ;;  %v10360_v45 = vpop.permute.xlu0 %6321  ;;  %v4938_v59 = vsel %vm1130_vm4, %v4933_v23, %v4937_v43  ;;  %v8774_v10 = vld [vmem:[#allocation4 + $0xc8] ss:$0 sps:$4 sm:$0x11]   ;;  %v8773_v50 = vld [vmem:[#allocation4 + $0xc0] sm:$0xfe]  }
 0x2b8   : > { %6793 = vst.msk [vmem:[#allocation5 + $0x30] sm:$0xff] %vm6786_vm11, %v6751_v2  ;;  %v8777_v61 = vld [vmem:[#allocation4 + $0xd4] ss:$0 sps:$4 sm:$0x11]   ;;  %v6124_v46 = vrot.slane %v8773_v50, 1  ;;  %v6125_v41 = vrot.slane %v8774_v10, 1 }
 0x2b9   : > { %5284 = vst.msk [vmem:[#allocation5 + $0x38] sm:$0xff] %vm5276_vm15, %v10301_v14  ;;  %v10368_v26 = vpop.permute.xlu1 %5423  ;;  %v8747_v14 = vld [vmem:[#allocation4 + $0xbc] ss:$0 sps:$4 sm:$0x11]   ;;  %v8775_v43 = vld [vmem:[#allocation4 + $0xcc] sm:$0xff]  }
 0x2ba   : > { %7082 = vst.msk [vmem:[#allocation5 + $0x30] sm:$0xff] %vm7075_vm12, %v10286_v12  ;;  %v7019_v17 = vrot.slane %v8747_v14, 1  ;;  %v7097_v18 = vld [vmem:[#allocation5 + $0x28] sm:$0xff]  ;;  %v5829_v14 = vshll.u32 %v8769_v20, 16 }
 0x2bb   : > { %5461 = vst.msk [vmem:[#allocation5 + $0x38] sm:$0xff] %vm10693_vm0, %v10276_v34  ;;  %v5422_v12 = vpop.permute.xlu0 %5421  ;;  %v6705_v34 = vshll.u32 %v8750_v6, 16  ;;  %8253 = vmatmul.mubr.msk.bf16.gmra.mrb[8].mxu1 %vm7144_vm14, %v7097_v18  ;;  %vm10699_vm0 = vmmov %vm10690_vm3  ;;  %v8780_v23 = vld [vmem:[#allocation4 + $0xd4] ss:$0 sps:$4 sm:$0x11]  }
 0x2bc   : > { %5894 = vst.msk [vmem:[#allocation5 + $0x38] sm:$0xff] %vm5886_vm5, %v10315_v25  ;;  %v8756_v25 = vld [vmem:[#allocation4 + $0xb4] sm:$0xff]   ;;  %v7020_v49 = vsel %vm10695_vm9, %v7018_v54, %v7019_v17  ;;  %v6719_v54 = vrot.slane %v6717_v56, 1  ;;  %v6729_v17 = vshll.u32 %v10391_v8, 16  ;;  %v5831_v5 = vrot.slane %v5829_v14, 1  ;;  %vm10701_vm9 = vmmov %vm10696_vm1 }
 0x2bd   : > { %6183 = vst.msk [vmem:[#allocation5 + $0x38] sm:$0xff] %vm6175_vm8, %v10290_v31  ;;  %v6320_v53 = vpop.permute.xlu1 %6319  ;;  %v6707_v40 = vrot.slane %v6705_v34, 1  ;;  %7053 = vrot.lane.b32.xlu0 %v7020_v49, %s8810_s29  ;;  %v4916_v31 = vshrl.u32 %v8753_v38, 16  ;;  %v5817_v11 = vshll.u32 %v8756_v25, 16  ;;  %v5815_v16 = vshrl.u32 %v8756_v25, 16  ;;  %v8765_v49 = vld [vmem:[#allocation4 + $0xc0] sm:$0xff]  }
 0x2be   : > { %5462 = vst.msk [vmem:[#allocation5 + $0x40] sm:$0xff] %vm10694_vm10, %v5422_v12  ;;  %v5834_v12 = vshll.u32 %v8770_v1, 16  ;;  %v6123_v34 = vsel %vm10697_vm6, %v6121_v47, %v6122_v37  ;;  %vm10700_vm10 = vmmov %vm10699_vm0 }
 0x2bf   : > { %6361 = vst.msk [vmem:[#allocation5 + $0x38] sm:$0xff] %vm10696_vm1, %v6320_v53  ;;  %v10377_v13 = vpop.permute.xlu0 %7043  ;;  %v6708_v15 = vor.u32 %v6707_v40, %v6703_v0  ;;  %v4921_v30 = vor.u32 %v4920_v4, %v4916_v31  ;;  %v5819_v32 = vrot.slane %v5817_v11, 1  ;;  %v5227_v4 = vsel %vm10698_vm7, %v5225_v36, %v5226_v60  ;;  %v8786_v53 = vld [vmem:[#allocation4 + $0xb4] sm:$0xff]   ;;  %v8766_v40 = vld [vmem:[#allocation4 + $0xc0] sm:$0xff]   ;;  %vm10704_vm6 = vmmov %vm10699_vm0 }
 0x2c0   : > { %v5827_v31 = vshrl.u32 %v8769_v20, 16  ;;  %v8772_v11 = vld [vmem:[#allocation4 + $0xc8] ss:$0 sps:$4 sm:$0x11]   ;;  %4570 = vst.msk [vmem:[#allocation5 + $0x78] sm:$0xff] %vm4554_vm13, %v8786_v53  ;;  %v5836_v22 = vrot.slane %v5834_v12, 1  ;;  %v6126_v7 = vsel %vm10700_vm10, %v6124_v46, %v6125_v41 }
 0x2c1   : > { %v10380_v24 = vpop.permute.xlu1 %6145  ;;  %v6713_v19 = vsel %vm1130_vm4, %v6708_v15, %v6712_v63  ;;  %5256 = vrot.lane.b32.xlu0 %v5224_v52, %s8806_s13  ;;  %v4926_v2 = vsel %vm1130_vm4, %v4921_v30, %v4925_v39  ;;  %v5820_v3 = vor.u32 %v5819_v32, %v5815_v16  ;;  %v7098_v6 = vld [vmem:[#allocation5 + $0x30] sm:$0xff]  ;;  %v6720_v15 = vor.u32 %v6719_v54, %v6715_v58 }
 0x2c2   : > { %6764 = vrot.lane.b32.xlu1 %v6713_v19, %s8811_s8  ;;  %8256 = vmatprep.mubr.msk.bf16.mxu1 %vm7144_vm14, %v7098_v6  ;;  %v6724_v63 = vrot.slane %v6722_v48, 1  ;;  %v5832_v52 = vor.u32 %v5831_v5, %v5827_v31  ;;  %v7021_v30 = vrot.slane %v8771_v27, 1  ;;  %v7022_v33 = vrot.slane %v8772_v11, 1 }
 0x2c3   : > { %v5249_v28 = vpop.permute.xlu0 %5248  ;;  %v5825_v62 = vsel %vm1130_vm4, %v5820_v3, %v5824_v29  ;;  %v6734_v39 = vshll.u32 %v8777_v61, 16  ;;  %v8779_v3 = vld [vmem:[#allocation4 + $0xcc] sm:$0xfe]   ;;  %vm10702_vm1 = vcmask 261312  }
 0x2c4   : > { %v6725_v19 = vsel %vm1130_vm4, %v6720_v15, %v6724_v63  ;;  %v5837_v32 = vsel %vm1130_vm4, %v5832_v52, %v5836_v22  ;;  %v7023_v16 = vsel %vm10699_vm0, %v7021_v30, %v7022_v33  ;;  %v7024_v55 = vrot.slane %v8779_v3, 1  ;;  %vm10703_vm3 = vmmov %vm10702_vm1 }
 0x2c5   : > { %v10386_v42 = vpop.permute.xlu1 %5246  ;;  %5433 = vrot.lane.b32.xlu0 %v8755_v9, %s8803_s10  ;;  %vm10707_vm0 = vmmov %vm10702_vm1 }
 0x2c6   : > { %4967 = vrot.lane.b32.xlu1 %v4926_v2, %s8800_s30  ;;  %v6736_v2 = vrot.slane %v6734_v39, 1  ;;  %v10497_v39 = vld [vmem:[%s10653_s6] ss:$0 sm:$0xff] }
 0x2c7   : > { %v7042_v38 = vpop.permute.xlu0 %7041 }
 0x2c9   : > { %v10393_v57 = vpop.permute.xlu1 %5856  ;;  %5866 = vrot.lane.b32.xlu0 %v5825_v62, %s8805_s12 }
 0x2ca   : > { %4969 = vrot.lane.b32.xlu1 %v4938_v59, %s8800_s30 }
 0x2cb   : > { %v6144_v25 = vpop.permute.xlu0 %6143 }
 0x2cd   : > { %v4960_v0 = vpop.permute.xlu1 %4959  ;;  %6155 = vrot.lane.b32.xlu0 %v6123_v34, %s8809_s28 }
 0x2ce   : > { %4998 = vst.msk [vmem:[#allocation5 + $0x50] sm:$0xff] %vm4987_vm2, %v4960_v0  ;;  %5258 = vrot.lane.b32.xlu1 %v5227_v4, %s8806_s13 }
 0x2cf   : > { %5287 = vst.msk [vmem:[#allocation5 + $0x50] sm:$0xff] %vm5276_vm15, %v5249_v28  ;;  %v6755_v18 = vpop.permute.xlu0 %6754  ;;  %v6731_v28 = vrot.slane %v6729_v17, 1 }
 0x2d1   : > { %6333 = vrot.lane.b32.xlu0 %v8765_v49, %s8808_s27  ;;  %v6732_v44 = vor.u32 %v6731_v28, %v6727_v35  ;;  %v10492_v35 = vld [vmem:[%s10652_s5] ss:$0 sm:$0xff] }
 0x2d2   : > { %5435 = vrot.lane.b32.xlu1 %v8766_v40, %s8803_s10  ;;  %v6753_v9 = vpop.permute.xlu1 %6752 }
 0x2d3   : > { %6794 = vst.msk [vmem:[#allocation5 + $0x38] sm:$0xff] %vm6786_vm11, %v6753_v9  ;;  %v6737_v37 = vsel %vm1130_vm4, %v6732_v44, %v6736_v2  ;;  %vm10705_vm4 = vmmov %vm10701_vm9 }
 0x2d4   : > { %7083 = vst.msk [vmem:[#allocation5 + $0x38] sm:$0xff] %vm7075_vm12, %v7042_v38  ;;  %vm10706_vm7 = vmmov %vm10705_vm4 }
 0x2d5   : > { %6766 = vrot.lane.b32.xlu0 %v6725_v19, %s8811_s8  ;;  %v5855_v29 = vpop.permute.xlu0 %5854  ;;  %vm10708_vm10 = vmmov %vm10705_vm4 }
 0x2d6   : > { %5868 = vrot.lane.b32.xlu1 %v5837_v32, %s8805_s12  ;;  %5895 = vst.msk [vmem:[#allocation5 + $0x40] sm:$0xff] %vm5886_vm5, %v5855_v29 }
 0x2d7   : > { %6184 = vst.msk [vmem:[#allocation5 + $0x40] sm:$0xff] %vm6175_vm8, %v6144_v25  ;;  %v4958_v47 = vpop.permute.xlu1 %4957 }
 0x2d8   : > { %6362 = vst.msk [vmem:[#allocation5 + $0x40] sm:$0xff] %vm10701_vm9, %v10360_v45  ;;  %v7025_v45 = vrot.slane %v8780_v23, 1  ;;  %vm10709_vm9 = vmmov %vm10707_vm0 }
 0x2d9   : > { %7055 = vrot.lane.b32.xlu0 %v7023_v16, %s8810_s29  ;;  %4997 = vst.msk [vmem:[#allocation5 + $0x48] sm:$0xff] %vm4987_vm2, %v4958_v47  ;;  %v6326_v51 = vpop.permute.xlu0 %6325 }
 0x2da   : > { %6157 = vrot.lane.b32.xlu1 %v6126_v7, %s8809_s28  ;;  %6795 = vst.msk [vmem:[#allocation5 + $0x40] sm:$0xff] %vm6786_vm11, %v6755_v18 }
 0x2db   : > { %5286 = vst.msk [vmem:[#allocation5 + $0x48] sm:$0xff] %vm5276_vm15, %v10386_v42  ;;  %v5428_v8 = vpop.permute.xlu1 %5427  ;;  %v7099_v42 = vld [vmem:[#allocation5 + $0x38] sm:$0xff] }
 0x2dc   : > { %7084 = vst.msk [vmem:[#allocation5 + $0x40] sm:$0xff] %vm7075_vm12, %v10377_v13  ;;  %8257 = vmatmul.mubr.msk.bf16.gmra.mrb[12].mxu1 %vm7144_vm14, %v7099_v42 }
 0x2dd   : > { %5463 = vst.msk [vmem:[#allocation5 + $0x48] sm:$0xff] %vm10702_vm1, %v10368_v26  ;;  %v5426_v21 = vpop.permute.xlu0 %5425  ;;  %v7026_v26 = vsel %vm10704_vm6, %v7024_v55, %v7025_v45  ;;  %vm10710_vm1 = vmmov %vm10705_vm4 }
 0x2de   : > { %6335 = vrot.lane.b32.xlu1 %v8775_v43, %s8808_s27  ;;  %5896 = vst.msk [vmem:[#allocation5 + $0x48] sm:$0xff] %vm5886_vm5, %v10393_v57  ;;  %vm10712_vm6 = vmmov %vm10710_vm1  ;;  %s8123_s27 = sshll.u32 %s10718_s25, 8 }
 0x2df   : > { %6185 = vst.msk [vmem:[#allocation5 + $0x48] sm:$0xff] %vm6175_vm8, %v10380_v24  ;;  %v6324_v13 = vpop.permute.xlu1 %6323 }
 0x2e0   : > { %5464 = vst.msk [vmem:[#allocation5 + $0x50] sm:$0xff] %vm10703_vm3, %v5426_v21  ;;  %vm10711_vm3 = vmmov %vm10707_vm0 }
 0x2e1   : > { %6363 = vst.msk [vmem:[#allocation5 + $0x48] sm:$0xff] %vm10705_vm4, %v6324_v13  ;;  %v7048_v20 = vpop.permute.xlu0 %7047  ;;  %vm10713_vm4 = vmmov %vm10707_vm0 }
 0x2e2   : > { %6768 = vrot.lane.b32.xlu1 %v6737_v37, %s8811_s8  ;;  %s10508_s8 = scalar_lea.vmem %s10654_s7, %s8123_s27 }
 0x2e3   : > { %v7100_v38 = vld [vmem:[#allocation5 + $0x40] sm:$0xff]  ;;  %v6150_v24 = vpop.permute.xlu1 %6149 }
 0x2e4   : > { %8260 = vmatprep.mubr.msk.bf16.mxu1 %vm7144_vm14, %v7100_v38 }
 0x2e5   : > { %v5253_v36 = vpop.permute.xlu0 %5252 }
 0x2e6   : > { %7057 = vrot.lane.b32.xlu1 %v7026_v26, %s8810_s29 }
 0x2e7   : > { %v5251_v56 = vpop.permute.xlu1 %5250 }
 0x2e9   : > { %v7046_v62 = vpop.permute.xlu0 %7045 }
 0x2eb   : > { %v5861_v57 = vpop.permute.xlu1 %5860 }
 0x2ed   : > { %v6148_v60 = vpop.permute.xlu0 %6147 }
 0x2ef   : > { %v4964_v59 = vpop.permute.xlu1 %4963 }
 0x2f0   : > { %5000 = vst.msk [vmem:[#allocation5 + $0x60] sm:$0xff] %vm4987_vm2, %v4964_v59 }
 0x2f1   : > { %5289 = vst.msk [vmem:[#allocation5 + $0x60] sm:$0xff] %vm5276_vm15, %v5253_v36 }
 0x2f2   : > { %v6759_v1 = vpop.permute.xlu0 %6758 }
 0x2f4   : > { %v6757_v14 = vpop.permute.xlu1 %6756 }
 0x2f5   : > { %6796 = vst.msk [vmem:[#allocation5 + $0x48] sm:$0xff] %vm6786_vm11, %v6757_v14 }
 0x2f6   : > { %7085 = vst.msk [vmem:[#allocation5 + $0x48] sm:$0xff] %vm7075_vm12, %v7046_v62  ;;  %v5859_v6 = vpop.permute.xlu0 %5858 }
 0x2f7   : > { %5897 = vst.msk [vmem:[#allocation5 + $0x50] sm:$0xff] %vm5886_vm5, %v5859_v6 }
 0x2f8   : > { %6186 = vst.msk [vmem:[#allocation5 + $0x50] sm:$0xff] %vm6175_vm8, %v6148_v60  ;;  %v4962_v54 = vpop.permute.xlu1 %4961 }
 0x2f9   : > { %6364 = vst.msk [vmem:[#allocation5 + $0x50] sm:$0xff] %vm10706_vm7, %v6326_v51  ;;  %vm10715_vm7 = vmmov %vm10707_vm0 }
 0x2fa   : > { %4999 = vst.msk [vmem:[#allocation5 + $0x58] sm:$0xff] %vm4987_vm2, %v4962_v54 }
 0x2fb   : > { %6797 = vst.msk [vmem:[#allocation5 + $0x50] sm:$0xff] %vm6786_vm11, %v6759_v1 }
 0x2fc   : > { %5288 = vst.msk [vmem:[#allocation5 + $0x58] sm:$0xff] %vm5276_vm15, %v5251_v56  ;;  %v6328_v48 = vpop.permute.xlu1 %6327  ;;  %v7050_v12 = vpop.permute.xlu0 %7049 }
 0x2fd   : > { %7086 = vst.msk [vmem:[#allocation5 + $0x50] sm:$0xff] %vm7075_vm12, %v7048_v20  ;;  %v7101_v17 = vld [vmem:[#allocation5 + $0x48] sm:$0xff] }
 0x2fe   : > { %5465 = vst.msk [vmem:[#allocation5 + $0x58] sm:$0xff] %vm10707_vm0, %v5428_v8  ;;  %8261 = vmatmul.mubr.msk.bf16.gmra.mrb[16].mxu1 %vm7144_vm14, %v7101_v17 }
 0x2ff   : > { %5898 = vst.msk [vmem:[#allocation5 + $0x58] sm:$0xff] %vm5886_vm5, %v5861_v57 }
 0x300   : > { %6187 = vst.msk [vmem:[#allocation5 + $0x58] sm:$0xff] %vm6175_vm8, %v6150_v24  ;;  %v5432_v0 = vpop.permute.xlu1 %5431  ;;  %v5430_v34 = vpop.permute.xlu0 %5429 }
 0x301   : > { %6365 = vst.msk [vmem:[#allocation5 + $0x58] sm:$0xff] %vm10708_vm10, %v6328_v48 }
 0x302   : > { %5466 = vst.msk [vmem:[#allocation5 + $0x60] sm:$0xff] %vm10709_vm9, %v5430_v34 }
 0x304   : > { %v7102_v4 = vld [vmem:[#allocation5 + $0x50] sm:$0xff]  ;;  %v5255_v5 = vpop.permute.xlu1 %5254  ;;  %v5863_v25 = vpop.permute.xlu0 %5862 }
 0x305   : > { %8264 = vmatprep.mubr.msk.bf16.mxu1 %vm7144_vm14, %v7102_v4  ;;  %5899 = vst.msk [vmem:[#allocation5 + $0x60] sm:$0xff] %vm5886_vm5, %v5863_v25 }
 0x308   : > { %v6761_v53 = vpop.permute.xlu1 %6760  ;;  %v6152_v49 = vpop.permute.xlu0 %6151 }
 0x309   : > { %6798 = vst.msk [vmem:[#allocation5 + $0x58] sm:$0xff] %vm6786_vm11, %v6761_v53 }
 0x30a   : > { %6188 = vst.msk [vmem:[#allocation5 + $0x60] sm:$0xff] %vm6175_vm8, %v6152_v49 }
 0x30b   : > { %7087 = vst.msk [vmem:[#allocation5 + $0x58] sm:$0xff] %vm7075_vm12, %v7050_v12 }
 0x30c   : > { %v4966_v40 = vpop.permute.xlu1 %4965  ;;  %v6330_v58 = vpop.permute.xlu0 %6329 }
 0x30d   : > { %5001 = vst.msk [vmem:[#allocation5 + $0x68] sm:$0xff] %vm4987_vm2, %v4966_v40 }
 0x30e   : > { %6366 = vst.msk [vmem:[#allocation5 + $0x60] sm:$0xff] %vm10710_vm1, %v6330_v58 }
 0x30f   : > { %5290 = vst.msk [vmem:[#allocation5 + $0x68] sm:$0xff] %vm5276_vm15, %v5255_v5 }
 0x310   : > { %5467 = vst.msk [vmem:[#allocation5 + $0x68] sm:$0xff] %vm10711_vm3, %v5432_v0  ;;  %v5865_v31 = vpop.permute.xlu1 %5864  ;;  %v6763_v11 = vpop.permute.xlu0 %6762 }
 0x311   : > { %5900 = vst.msk [vmem:[#allocation5 + $0x68] sm:$0xff] %vm5886_vm5, %v5865_v31 }
 0x312   : > { %v7103_v27 = vld [vmem:[#allocation5 + $0x58] sm:$0xff]  ;;  %6799 = vst.msk [vmem:[#allocation5 + $0x60] sm:$0xff] %vm6786_vm11, %v6763_v11 }
 0x313   : > { %8265 = vmatmul.mubr.msk.bf16.gmra.mrb[20].mxu1 %vm7144_vm14, %v7103_v27 }
 0x314   : > { %v6154_v10 = vpop.permute.xlu1 %6153 }
 0x315   : > { %6189 = vst.msk [vmem:[#allocation5 + $0x68] sm:$0xff] %vm6175_vm8, %v6154_v10 }
 0x317   : > { %v7052_v15 = vpop.permute.xlu0 %7051 }
 0x318   : > { %7088 = vst.msk [vmem:[#allocation5 + $0x60] sm:$0xff] %vm7075_vm12, %v7052_v15 }
 0x31f   : > { %v7104_v22 = vld [vmem:[#allocation5 + $0x60] sm:$0xff] }
 0x320   : > { %v6332_v63 = vpop.permute.xlu1 %6331  ;;  %8268 = vmatprep.mubr.msk.bf16.mxu1 %vm7144_vm14, %v7104_v22 }
 0x321   : > { %6367 = vst.msk [vmem:[#allocation5 + $0x68] sm:$0xff] %vm10712_vm6, %v6332_v63 }
 0x32f   : > { %v7054_v52 = vpop.permute.xlu0 %7053 }
 0x333   : > { %v5257_v50 = vpop.permute.xlu0 %5256 }
 0x334   : > { %v6765_v61 = vpop.permute.xlu1 %6764 }
 0x335   : > { %6800 = vst.msk [vmem:[#allocation5 + $0x68] sm:$0xff] %vm6786_vm11, %v6765_v61 }
 0x336   : > { %7089 = vst.msk [vmem:[#allocation5 + $0x68] sm:$0xff] %vm7075_vm12, %v7054_v52 }
 0x337   : > { %v5434_v19 = vpop.permute.xlu0 %5433 }
 0x338   : > { %v4968_v18 = vpop.permute.xlu1 %4967 }
 0x339   : > { %5002 = vst.msk [vmem:[#allocation5 + $0x70] sm:$0xff] %vm4987_vm2, %v4968_v18 }
 0x33a   : > { %5291 = vst.msk [vmem:[#allocation5 + $0x70] sm:$0xff] %vm5276_vm15, %v5257_v50 }
 0x33b   : > { %5468 = vst.msk [vmem:[#allocation5 + $0x70] sm:$0xff] %vm10713_vm4, %v5434_v19  ;;  %v5867_v30 = vpop.permute.xlu0 %5866 }
 0x33c   : > { %v4970_v32 = vpop.permute.xlu1 %4969  ;;  %5901 = vst.msk [vmem:[#allocation5 + $0x70] sm:$0xff] %vm5886_vm5, %v5867_v30 }
 0x33d   : > { %5003 = vst.msk [vmem:[#allocation5 + $0x78] sm:$0xff] %vm4987_vm2, %v4970_v32  ;;  %v7105_v33 = vld [vmem:[#allocation5 + $0x68] sm:$0xff]  ;;  %v8246_v28 = vpop.f32.mrb[0].mxu1  ;;  %vm10714_vm2 = vmmov %vm10710_vm1 }
 0x33e   : > { %8269 = vmatmul.mubr.msk.bf16.gmra.mrb[24].mxu1 %vm7144_vm14, %v7105_v33  ;;  %v7367_v7 = vmul.f32 %v8246_v28, %v10492_v35  ;;  %v7231_v29 = vpop.f32.mrb[1].mxu1 }
 0x33f   : > { %v6156_v46 = vpop.permute.xlu0 %6155  ;;  %v7365_v44 = vmul.f32 %v10492_v35, %v7231_v29  ;;  %v8247_v2 = vpop.f32.mrb[2].mxu1 }
 0x340   : > { %v5259_v41 = vpop.permute.xlu1 %5258  ;;  %6190 = vst.msk [vmem:[#allocation5 + $0x70] sm:$0xff] %vm6175_vm8, %v6156_v46  ;;  %v7406_v43 = vadd.f32 %v10497_v39, %v7367_v7  ;;  %v7368_v3 = vmul.f32 %v8247_v2, %v10492_v35  ;;  %v7234_v23 = vpop.f32.mrb[3].mxu1 }
 0x341   : > { %5292 = vst.msk [vmem:[#allocation5 + $0x78] sm:$0xff] %vm5276_vm15, %v5259_v41  ;;  %v7404_v55 = vadd.f32 %v10497_v39, %v7365_v44  ;;  %v7366_v45 = vmul.f32 %v10492_v35, %v7234_v23  ;;  %vm10716_vm15 = vmmov %vm10710_vm1 }
 0x342   : > { %v7438_v37 = vmax.f32 %v7406_v43, 0.0  ;;  %v7407_v8 = vadd.f32 %v10497_v39, %v7368_v3 }
 0x343   : > { %v6334_v9 = vpop.permute.xlu0 %6333  ;;  %v7436_v42 = vmax.f32 %v7404_v55, 0.0  ;;  %v7405_v21 = vadd.f32 %v10497_v39, %v7366_v45 }
 0x344   : > { %v5436_v16 = vpop.permute.xlu1 %5435  ;;  %6368 = vst.msk [vmem:[#allocation5 + $0x70] sm:$0xff] %vm10714_vm2, %v6334_v9  ;;  %v7439_v26 = vmax.f32 %v7407_v8, 0.0 }
 0x345   : > { %5469 = vst.msk [vmem:[#allocation5 + $0x78] sm:$0xff] %vm10715_vm7, %v5436_v16  ;;  %v7437_v38 = vmax.f32 %v7405_v21, 0.0 }
 0x346   : > { %7470 = vst.msk [vmem:[%s10508_s8 + $0x10] sm:$0xff] %vm4554_vm13, %v7438_v37  ;;  %7468 = vst.msk [vmem:[%s10508_s8] sm:$0xff] %vm4554_vm13, %v7436_v42 }
 0x347   : > { %v6767_v47 = vpop.permute.xlu0 %6766  ;;  %7471 = vst.msk [vmem:[%s10508_s8 + $0x18] sm:$0xff] %vm4554_vm13, %v7439_v26  ;;  %7469 = vst.msk [vmem:[%s10508_s8 + $0x8] sm:$0xff] %vm4554_vm13, %v7437_v38 }
 0x348   : > { %v5869_v51 = vpop.permute.xlu1 %5868  ;;  %6801 = vst.msk [vmem:[#allocation5 + $0x70] sm:$0xff] %vm6786_vm11, %v6767_v47 }
 0x349   : > { %5902 = vst.msk [vmem:[#allocation5 + $0x78] sm:$0xff] %vm5886_vm5, %v5869_v51 }
 0x34b   : > { %v7056_v13 = vpop.permute.xlu0 %7055 }
 0x34c   : > { %v6158_v20 = vpop.permute.xlu1 %6157  ;;  %7090 = vst.msk [vmem:[#allocation5 + $0x70] sm:$0xff] %vm7075_vm12, %v7056_v13 }
 0x34d   : > { %6191 = vst.msk [vmem:[#allocation5 + $0x78] sm:$0xff] %vm6175_vm8, %v6158_v20 }
 0x350   : > { %v6336_v24 = vpop.permute.xlu1 %6335 }
 0x351   : > { %6369 = vst.msk [vmem:[#allocation5 + $0x78] sm:$0xff] %vm10716_vm15, %v6336_v24 }
 0x353   : > { %v7106_v56 = vld [vmem:[#allocation5 + $0x70] sm:$0xff] }
 0x354   : > { %v6769_v36 = vpop.permute.xlu1 %6768  ;;  %8272 = vmatprep.mubr.msk.bf16.mxu1 %vm7144_vm14, %v7106_v56 }
 0x355   : > { %6802 = vst.msk [vmem:[#allocation5 + $0x78] sm:$0xff] %vm6786_vm11, %v6769_v36 }
 0x358   : > { %v7058_v57 = vpop.permute.xlu1 %7057 }
 0x359   : > { %7091 = vst.msk [vmem:[#allocation5 + $0x78] sm:$0xff] %vm7075_vm12, %v7058_v57 }
 0x360   : > { %v7107_v62 = vld [vmem:[#allocation5 + $0x78] sm:$0xff]  ;;  %v8250_v59 = vpop.f32.mrb[4].mxu1 }
 0x361   : > { %8273 = vmatmul.mubr.msk.bf16.gmra.mrb[28].mxu1 %vm7144_vm14, %v7107_v62  ;;  %v7371_v60 = vmul.f32 %v8250_v59, %v10492_v35  ;;  %v7247_v1 = vpop.f32.mrb[5].mxu1 }
 0x362   : > { %v7369_v14 = vmul.f32 %v10492_v35, %v7247_v1  ;;  %v8251_v6 = vpop.f32.mrb[6].mxu1 }
 0x363   : > { %v7410_v54 = vadd.f32 %v10497_v39, %v7371_v60  ;;  %v7372_v48 = vmul.f32 %v8251_v6, %v10492_v35  ;;  %v7250_v12 = vpop.f32.mrb[7].mxu1 }
 0x364   : > { %v7408_v17 = vadd.f32 %v10497_v39, %v7369_v14  ;;  %v7370_v0 = vmul.f32 %v10492_v35, %v7250_v12 }
 0x365   : > { %v7442_v34 = vmax.f32 %v7410_v54, 0.0  ;;  %v7411_v4 = vadd.f32 %v10497_v39, %v7372_v48 }
 0x366   : > { %v7440_v5 = vmax.f32 %v7408_v17, 0.0  ;;  %v7409_v25 = vadd.f32 %v10497_v39, %v7370_v0 }
 0x367   : > { %7474 = vst.msk [vmem:[%s10508_s8 + $0x30] sm:$0xff] %vm4554_vm13, %v7442_v34  ;;  %v7443_v53 = vmax.f32 %v7411_v4, 0.0 }
 0x368   : > { %7472 = vst.msk [vmem:[%s10508_s8 + $0x20] sm:$0xff] %vm4554_vm13, %v7440_v5  ;;  %v7441_v49 = vmax.f32 %v7409_v25, 0.0 }
 0x369   : > { %7475 = vst.msk [vmem:[%s10508_s8 + $0x38] sm:$0xff] %vm4554_vm13, %v7443_v53 }
 0x36a   : > { %7473 = vst.msk [vmem:[%s10508_s8 + $0x28] sm:$0xff] %vm4554_vm13, %v7441_v49 }
 0x38e   : > { %v8254_v40 = vpop.f32.mrb[8].mxu1 }
 0x38f   : > { %v7375_v58 = vmul.f32 %v8254_v40, %v10492_v35  ;;  %v7263_v31 = vpop.f32.mrb[9].mxu1 }
 0x390   : > { %v7373_v27 = vmul.f32 %v10492_v35, %v7263_v31  ;;  %v8255_v11 = vpop.f32.mrb[10].mxu1 }
 0x391   : > { %v7414_v10 = vadd.f32 %v10497_v39, %v7375_v58  ;;  %v7376_v15 = vmul.f32 %v8255_v11, %v10492_v35  ;;  %v7266_v63 = vpop.f32.mrb[11].mxu1 }
 0x392   : > { %v7412_v22 = vadd.f32 %v10497_v39, %v7373_v27  ;;  %v7374_v52 = vmul.f32 %v10492_v35, %v7266_v63 }
 0x393   : > { %v7446_v50 = vmax.f32 %v7414_v10, 0.0  ;;  %v7415_v61 = vadd.f32 %v10497_v39, %v7376_v15 }
 0x394   : > { %v7444_v18 = vmax.f32 %v7412_v22, 0.0  ;;  %v7413_v19 = vadd.f32 %v10497_v39, %v7374_v52 }
 0x395   : > { %7478 = vst.msk [vmem:[%s10508_s8 + $0x50] sm:$0xff] %vm4554_vm13, %v7446_v50  ;;  %v7447_v30 = vmax.f32 %v7415_v61, 0.0 }
 0x396   : > { %7476 = vst.msk [vmem:[%s10508_s8 + $0x40] sm:$0xff] %vm4554_vm13, %v7444_v18  ;;  %v7445_v32 = vmax.f32 %v7413_v19, 0.0 }
 0x397   : > { %7479 = vst.msk [vmem:[%s10508_s8 + $0x58] sm:$0xff] %vm4554_vm13, %v7447_v30 }
 0x398   : > { %7477 = vst.msk [vmem:[%s10508_s8 + $0x48] sm:$0xff] %vm4554_vm13, %v7445_v32 }
 0x3af   : > { %v8258_v33 = vpop.f32.mrb[12].mxu1 }
 0x3b0   : > { %v7379_v46 = vmul.f32 %v8258_v33, %v10492_v35  ;;  %v7279_v41 = vpop.f32.mrb[13].mxu1 }
 0x3b1   : > { %v7377_v28 = vmul.f32 %v10492_v35, %v7279_v41  ;;  %v8259_v9 = vpop.f32.mrb[14].mxu1 }
 0x3b2   : > { %v7418_v16 = vadd.f32 %v10497_v39, %v7379_v46  ;;  %v7380_v7 = vmul.f32 %v8259_v9, %v10492_v35  ;;  %v7282_v29 = vpop.f32.mrb[15].mxu1 }
 0x3b3   : > { %v7416_v43 = vadd.f32 %v10497_v39, %v7377_v28  ;;  %v7378_v44 = vmul.f32 %v10492_v35, %v7282_v29 }
 0x3b4   : > { %v7450_v2 = vmax.f32 %v7418_v16, 0.0  ;;  %v7419_v3 = vadd.f32 %v10497_v39, %v7380_v7 }
 0x3b5   : > { %v7448_v23 = vmax.f32 %v7416_v43, 0.0  ;;  %v7417_v47 = vadd.f32 %v10497_v39, %v7378_v44 }
 0x3b6   : > { %7482 = vst.msk [vmem:[%s10508_s8 + $0x70] sm:$0xff] %vm4554_vm13, %v7450_v2  ;;  %v7451_v51 = vmax.f32 %v7419_v3, 0.0 }
 0x3b7   : > { %7480 = vst.msk [vmem:[%s10508_s8 + $0x60] sm:$0xff] %vm4554_vm13, %v7448_v23  ;;  %v7449_v37 = vmax.f32 %v7417_v47, 0.0 }
 0x3b8   : > { %7483 = vst.msk [vmem:[%s10508_s8 + $0x78] sm:$0xff] %vm4554_vm13, %v7451_v51 }
 0x3b9   : > { %7481 = vst.msk [vmem:[%s10508_s8 + $0x68] sm:$0xff] %vm4554_vm13, %v7449_v37 }
 0x3d1   : > { %v8262_v55 = vpop.f32.mrb[16].mxu1 }
 0x3d2   : > { %v7383_v45 = vmul.f32 %v8262_v55, %v10492_v35  ;;  %v7295_v8 = vpop.f32.mrb[17].mxu1 }
 0x3d3   : > { %v7381_v42 = vmul.f32 %v10492_v35, %v7295_v8  ;;  %v8263_v21 = vpop.f32.mrb[18].mxu1 }
 0x3d4   : > { %v7422_v26 = vadd.f32 %v10497_v39, %v7383_v45  ;;  %v7384_v13 = vmul.f32 %v8263_v21, %v10492_v35  ;;  %v7298_v20 = vpop.f32.mrb[19].mxu1 }
 0x3d5   : > { %v7420_v38 = vadd.f32 %v10497_v39, %v7381_v42  ;;  %v7382_v24 = vmul.f32 %v10492_v35, %v7298_v20 }
 0x3d6   : > { %v7454_v36 = vmax.f32 %v7422_v26, 0.0  ;;  %v7423_v56 = vadd.f32 %v10497_v39, %v7384_v13 }
 0x3d7   : > { %v7452_v57 = vmax.f32 %v7420_v38, 0.0  ;;  %v7421_v62 = vadd.f32 %v10497_v39, %v7382_v24 }
 0x3d8   : > { %7486 = vst.msk [vmem:[%s10508_s8 + $0x90] sm:$0xff] %vm4554_vm13, %v7454_v36  ;;  %v7455_v59 = vmax.f32 %v7423_v56, 0.0 }
 0x3d9   : > { %7484 = vst.msk [vmem:[%s10508_s8 + $0x80] sm:$0xff] %vm4554_vm13, %v7452_v57  ;;  %v7453_v60 = vmax.f32 %v7421_v62, 0.0 }
 0x3da   : > { %7487 = vst.msk [vmem:[%s10508_s8 + $0x98] sm:$0xff] %vm4554_vm13, %v7455_v59 }
 0x3db   : > { %7485 = vst.msk [vmem:[%s10508_s8 + $0x88] sm:$0xff] %vm4554_vm13, %v7453_v60 }
 0x3e6   : > { %v8266_v1 = vpop.f32.mrb[20].mxu1 }
 0x3e7   : > { %v7387_v14 = vmul.f32 %v8266_v1, %v10492_v35  ;;  %v7311_v6 = vpop.f32.mrb[21].mxu1 }
 0x3e8   : > { %v7385_v54 = vmul.f32 %v10492_v35, %v7311_v6  ;;  %v8267_v48 = vpop.f32.mrb[22].mxu1 }
 0x3e9   : > { %v7426_v12 = vadd.f32 %v10497_v39, %v7387_v14  ;;  %v7388_v17 = vmul.f32 %v8267_v48, %v10492_v35  ;;  %v7314_v0 = vpop.f32.mrb[23].mxu1 }
 0x3ea   : > { %v7424_v34 = vadd.f32 %v10497_v39, %v7385_v54  ;;  %v7386_v4 = vmul.f32 %v10492_v35, %v7314_v0 }
 0x3eb   : > { %v7458_v5 = vmax.f32 %v7426_v12, 0.0  ;;  %v7427_v25 = vadd.f32 %v10497_v39, %v7388_v17 }
 0x3ec   : > { %v7456_v53 = vmax.f32 %v7424_v34, 0.0  ;;  %v7425_v49 = vadd.f32 %v10497_v39, %v7386_v4 }
 0x3ed   : > { %7490 = vst.msk [vmem:[%s10508_s8 + $0xb0] sm:$0xff] %vm4554_vm13, %v7458_v5  ;;  %v7459_v40 = vmax.f32 %v7427_v25, 0.0 }
 0x3ee   : > { %7488 = vst.msk [vmem:[%s10508_s8 + $0xa0] sm:$0xff] %vm4554_vm13, %v7456_v53  ;;  %v7457_v58 = vmax.f32 %v7425_v49, 0.0 }
 0x3ef   : > { %7491 = vst.msk [vmem:[%s10508_s8 + $0xb8] sm:$0xff] %vm4554_vm13, %v7459_v40 }
 0x3f0   : > { %7489 = vst.msk [vmem:[%s10508_s8 + $0xa8] sm:$0xff] %vm4554_vm13, %v7457_v58 }
 0x411   : > { %v8270_v31 = vpop.f32.mrb[24].mxu1 }
 0x412   : > { %v7391_v27 = vmul.f32 %v8270_v31, %v10492_v35  ;;  %v7327_v11 = vpop.f32.mrb[25].mxu1 }
 0x413   : > { %v7389_v10 = vmul.f32 %v10492_v35, %v7327_v11  ;;  %v8271_v15 = vpop.f32.mrb[26].mxu1 }
 0x414   : > { %v7430_v63 = vadd.f32 %v10497_v39, %v7391_v27  ;;  %v7392_v22 = vmul.f32 %v8271_v15, %v10492_v35  ;;  %v7330_v52 = vpop.f32.mrb[27].mxu1 }
 0x415   : > { %v7428_v50 = vadd.f32 %v10497_v39, %v7389_v10  ;;  %v7390_v61 = vmul.f32 %v10492_v35, %v7330_v52 }
 0x416   : > { %v7462_v18 = vmax.f32 %v7430_v63, 0.0  ;;  %v7431_v19 = vadd.f32 %v10497_v39, %v7392_v22 }
 0x417   : > { %v7460_v30 = vmax.f32 %v7428_v50, 0.0  ;;  %v7429_v32 = vadd.f32 %v10497_v39, %v7390_v61 }
 0x418   : > { %7494 = vst.msk [vmem:[%s10508_s8 + $0xd0] sm:$0xff] %vm4554_vm13, %v7462_v18  ;;  %v7463_v33 = vmax.f32 %v7431_v19, 0.0 }
 0x419   : > { %7492 = vst.msk [vmem:[%s10508_s8 + $0xc0] sm:$0xff] %vm4554_vm13, %v7460_v30  ;;  %v7461_v46 = vmax.f32 %v7429_v32, 0.0 }
 0x41a   : > { %7495 = vst.msk [vmem:[%s10508_s8 + $0xd8] sm:$0xff] %vm4554_vm13, %v7463_v33 }
 0x41b   : > { %7493 = vst.msk [vmem:[%s10508_s8 + $0xc8] sm:$0xff] %vm4554_vm13, %v7461_v46 }
 0x434   : > { %v8274_v41 = vpop.f32.mrb[28].mxu1 }
 0x435   : > { %v7395_v28 = vmul.f32 %v8274_v41, %v10492_v35  ;;  %v7343_v9 = vpop.f32.mrb[29].mxu1 }
 0x436   : > { %v7393_v16 = vmul.f32 %v10492_v35, %v7343_v9  ;;  %v8275_v7 = vpop.f32.mrb[30].mxu1 }
 0x437   : > { %v7434_v29 = vadd.f32 %v10497_v39, %v7395_v28  ;;  %v7396_v43 = vmul.f32 %v8275_v7, %v10492_v35  ;;  %v7346_v44 = vpop.f32.mrb[31].mxu1 }
 0x438   : > { %v7432_v2 = vadd.f32 %v10497_v39, %v7393_v16  ;;  %v7394_v3 = vmul.f32 %v10492_v35, %v7346_v44 }
 0x439   : > { %v7466_v23 = vmax.f32 %v7434_v29, 0.0  ;;  %v7435_v47 = vadd.f32 %v10497_v39, %v7396_v43 }
 0x43a   : > { %v7464_v51 = vmax.f32 %v7432_v2, 0.0  ;;  %v7433_v37 = vadd.f32 %v10497_v39, %v7394_v3 }
 0x43b   : > { %7498 = vst.msk [vmem:[%s10508_s8 + $0xf0] sm:$0xff] %vm4554_vm13, %v7466_v23  ;;  %v7467_v55 = vmax.f32 %v7435_v47, 0.0 }
 0x43c   : > { %7496 = vst.msk [vmem:[%s10508_s8 + $0xe0] sm:$0xff] %vm4554_vm13, %v7464_v51  ;;  %v7465_v45 = vmax.f32 %v7433_v37, 0.0 }
 0x43d   : > { %7499 = vst.msk [vmem:[%s10508_s8 + $0xf8] sm:$0xff] %vm4554_vm13, %v7467_v55 }
 0x43e   : > { %7497 = vst.msk [vmem:[%s10508_s8 + $0xe8] sm:$0xff] %vm4554_vm13, %v7465_v45 }
 0x43f PF: > { %s17_s24 = sadd.s32 1, %s8797_s24  }
 0x440   : > { %p14_p4 = scmp.ge.s32.totalorder %s17_s24, 4  }
 0x442   :  { %16 = sbr.rel (!%p14_p4) target bundleno = 1 (0x1), region = 82 }

</bundles_post_ra>
